<compile_context>
chip_gen: v5e
topology: v5e:2x2
jax: 0.10.0
libtpu: 0.0.40
codegen_flags: <defaults>
</compile_context>

<pallas_src>
import jax
import jax.numpy as jnp
from jax.experimental import pallas as pl
from jax.experimental.pallas import tpu as pltpu

NEG_SLOPE = 0.01  # nn.LeakyReLU default
P = 128           # lane width


def _leaky_relu(v):
    return jnp.where(v > 0, v, NEG_SLOPE * v)


def rnn_ae_kernel(
    x_ref,       # (T*Bp, P)    time-major rows, D zero-padded to P, batch padded to Bp
    mask_ref,    # (T, Bp, P)   1.0 where t < length[b], broadcast across lanes
    rnnW_ref,    # (4, P, 3P)   [enc Wih | enc Whh | dec Wih | dec Whh], gate g in lanes [gP:gP+H]
    bias_ref,    # (16, 3P)     packed biases (see wrapper for row layout)
    mlpW_ref,    # (4, P, P)    [latW | oW | d1W | d2W], zero-padded
    recon_ref,   # (T*Bp, P)
    latent_ref,  # (Bp, P)
    discrim_ref, # (Bp, P)
):
    f32 = jnp.float32
    T, Bp, _ = mask_ref.shape

    x2d = x_ref[...]            # (T*Bp, P)
    mask_all = mask_ref[...]    # (T, Bp, P) -- loaded once, hoisted out of loop
    rnnW = rnnW_ref[...]        # (4, P, 3P)
    bias = bias_ref[...]        # (16, 3P)
    mlpW = mlpW_ref[...]        # (4, P, P)

    eWih, eWhh, dWih, dWhh = rnnW[0], rnnW[1], rnnW[2], rnnW[3]

    # ---------------- encoder GRU ----------------
    # Hoisted input projection: ONE (T*Bp, P)@(P, 3P) matmul covering all
    # timesteps and all 3 gates; b_ih (all gates) + b_hh (r,z gates) folded in.
    gi = jnp.dot(x2d, eWih, preferred_element_type=f32) + bias[0:1, :]      # (T*Bp, 3P)
    e_bhn = jnp.broadcast_to(bias[1:2, :P], (Bp, P))                        # pre-broadcast once

    h = jnp.zeros((Bp, P), f32)
    for t in range(T):                     # T small & static -> unrolled
        lo = t * Bp                        # Bp is a multiple of 8 -> sublane-aligned slice
        gi_t = gi[lo:lo + Bp, :]
        gh = jnp.dot(h, eWhh, preferred_element_type=f32)                   # ONE fused gate matmul
        r = jax.nn.sigmoid(gi_t[:, 0:P] + gh[:, 0:P])
        z = jax.nn.sigmoid(gi_t[:, P:2 * P] + gh[:, P:2 * P])
        n = jnp.tanh(gi_t[:, 2 * P:3 * P] + r * (gh[:, 2 * P:3 * P] + e_bhn))
        h_new = (1.0 - z) * n + z * h
        h = jnp.where(mask_all[t] > 0.5, h_new, h)   # length-aware update (pack_padded emulation)

    # ---------------- latent = LeakyReLU(Linear(hidden)) ----------------
    latent = _leaky_relu(jnp.dot(h, mlpW[0], preferred_element_type=f32) + bias[4:5, :P])
    latent_ref[...] = latent

    # ---------------- discriminator MLP ----------------
    d1 = _leaky_relu(jnp.dot(latent, mlpW[2], preferred_element_type=f32) + bias[6:7, :P])
    d2 = _leaky_relu(jnp.dot(d1, mlpW[3], preferred_element_type=f32) + bias[7:8, :P])
    # final 4 -> 1 layer as VPU multiply + lane reduce (MXU matmul with N=1 is near-empty)
    pre = jnp.sum(d2 * bias[8:9, :P], axis=-1, keepdims=True) + bias[9:10, :1]
    discrim_ref[...] = jnp.broadcast_to(jax.nn.sigmoid(pre), (Bp, P))

    # ---------------- decoder GRU ----------------
    # Decoder input is the same latent every step -> input projection done once.
    gid = jnp.dot(latent, dWih, preferred_element_type=f32) + bias[2:3, :]  # (Bp, 3P)
    d_bhn = jnp.broadcast_to(bias[3:4, :P], (Bp, P))

    hd = jnp.zeros((Bp, P), f32)
    hs = []                                # keep hidden states in vregs (small T)
    for t in range(T):
        gh = jnp.dot(hd, dWhh, preferred_element_type=f32)                  # ONE fused gate matmul
        r = jax.nn.sigmoid(gid[:, 0:P] + gh[:, 0:P])
        z = jax.nn.sigmoid(gid[:, P:2 * P] + gh[:, P:2 * P])
        n = jnp.tanh(gid[:, 2 * P:3 * P] + r * (gh[:, 2 * P:3 * P] + d_bhn))
        hd = (1.0 - z) * n + z * hd
        hs.append(hd)

    hs_all = jnp.concatenate(hs, axis=0)                                    # (T*Bp, P)
    out_all = _leaky_relu(jnp.dot(hs_all, mlpW[1], preferred_element_type=f32) + bias[5:6, :P])
    recon_ref[...] = out_all                                                # one lane-dense bulk store


def make_params(key, input_dim, hidden_dim, latent_dim):
    """Deterministic PyTorch-style uniform init. Matrices stored as
    (in_features, out_features), biases as (1, out_features)."""
    ks = jax.random.split(key, 20)

    def u(k, shape, fan):
        b = 1.0 / jnp.sqrt(jnp.float32(fan))
        return jax.random.uniform(k, shape, jnp.float32, -b, b)

    H, D, L = hidden_dim, input_dim, latent_dim
    return dict(
        # encoder GRU (gate order r, z, n — PyTorch convention)
        eWih=u(ks[0], (D, 3 * H), H), eWhh=u(ks[1], (H, 3 * H), H),
        ebih=u(ks[2], (1, 3 * H), H), ebhh=u(ks[3], (1, 3 * H), H),
        # latent_space: Linear(H, L)
        latW=u(ks[4], (H, L), H), latb=u(ks[5], (1, L), H),
        # dnet: Linear(L, L//2) -> Linear(L//2, 4) -> Linear(4, 1)
        d1W=u(ks[6], (L, L // 2), L), d1b=u(ks[7], (1, L // 2), L),
        d2W=u(ks[8], (L // 2, 4), L // 2), d2b=u(ks[9], (1, 4), L // 2),
        d3W=u(ks[10], (4, 1), 4), d3b=u(ks[11], (1, 1), 4),
        # decoder GRU: input_size = L
        dWih=u(ks[12], (L, 3 * H), H), dWhh=u(ks[13], (H, 3 * H), H),
        dbih=u(ks[14], (1, 3 * H), H), dbhh=u(ks[15], (1, 3 * H), H),
        # output_layer: Linear(H, D)
        oW=u(ks[16], (H, D), H), ob=u(ks[17], (1, D), H),
    )


def rnn_autoencoder_forward(x, params):
    B, T, D = x.shape
    H = params["eWhh"].shape[0]
    L = params["latW"].shape[1]
    L2 = L // 2
    assert D <= P and H <= P and L <= P
    G3 = 3 * P
    Bp = ((B + 7) // 8) * 8            # pad batch to a sublane multiple

    # ---- wrapper-side layout plumbing (pure XLA, no kernel cost) ----
    # pack_padded_sequence semantics: lengths = number of nonzero-sum rows.
    lengths = jnp.sum((jnp.sum(x, axis=-1) != 0).astype(jnp.int32), axis=1)        # (B,)
    lengths_p = jnp.pad(lengths, (0, Bp - B))                                       # padded rows -> len 0
    mask = (jnp.arange(T)[:, None] < lengths_p[None, :]).astype(jnp.float32)        # (T, Bp)
    mask = jnp.broadcast_to(mask[:, :, None], (T, Bp, P))                           # lane-dense

    # time-major rows, batch padded to Bp, feature dim padded to 128 lanes
    x_tm = jnp.pad(jnp.transpose(x, (1, 0, 2)), ((0, 0), (0, Bp - B), (0, P - D)))
    x2d = x_tm.reshape(T * Bp, P)

    def pad2(a, rows, cols):
        return jnp.pad(a, ((0, rows - a.shape[0]), (0, cols - a.shape[1])))

    def fuse_gates(w):
        # (in, 3H) -> (P, 3P): gate g occupies lanes [g*P : g*P+H], rows [0:in]; rest zero.
        return jnp.concatenate([pad2(w[:, g * H:(g + 1) * H], P, P) for g in range(3)], axis=1)

    rnnW = jnp.stack([fuse_gates(params["eWih"]), fuse_gates(params["eWhh"]),
                      fuse_gates(params["dWih"]), fuse_gates(params["dWhh"])], axis=0)  # (4, P, 3P)

    def fuse_gi_bias(bih, bhh):
        # b_ih for all 3 gates + b_hh for r,z only (b_hn must stay inside r*(...)).
        blocks = []
        for g in range(3):
            v = bih[:, g * H:(g + 1) * H]
            if g < 2:
                v = v + bhh[:, g * H:(g + 1) * H]
            blocks.append(pad2(v, 1, P))
        return jnp.concatenate(blocks, axis=1)                                      # (1, 3P)

    bias_rows = [
        fuse_gi_bias(params["ebih"], params["ebhh"]),              # 0: enc gi bias (fused)
        pad2(params["ebhh"][:, 2 * H:3 * H], 1, G3),               # 1: enc b_hn  (lanes [0:H])
        fuse_gi_bias(params["dbih"], params["dbhh"]),              # 2: dec gi bias (fused)
        pad2(params["dbhh"][:, 2 * H:3 * H], 1, G3),               # 3: dec b_hn
        pad2(params["latb"], 1, G3),                               # 4: latent bias
        pad2(params["ob"], 1, G3),                                 # 5: output-layer bias
        pad2(params["d1b"], 1, G3),                                # 6: dnet.0 bias
        pad2(params["d2b"], 1, G3),                                # 7: dnet.2 bias
        pad2(params["d3W"].T, 1, G3),                              # 8: dnet.4 weight (as row)
        pad2(params["d3b"], 1, G3),                                # 9: dnet.4 bias
    ]
    biasP = jnp.concatenate(bias_rows, axis=0)
    biasP = jnp.pad(biasP, ((0, 16 - biasP.shape[0]), (0, 0)))                      # (16, 3P)

    mlpW = jnp.stack([pad2(params["latW"], P, P), pad2(params["oW"], P, P),
                      pad2(params["d1W"], P, P), pad2(params["d2W"], P, P)], axis=0)  # (4, P, P)

    # advisory cost estimate for the XLA scheduler
    mm_flops = (2 * T * Bp * P * G3        # encoder input projection
                + 2 * T * Bp * P * G3      # encoder recurrence
                + 2 * Bp * P * G3          # decoder input projection
                + 2 * T * Bp * P * G3      # decoder recurrence
                + 2 * T * Bp * P * P       # output projection
                + 3 * 2 * Bp * P * P)      # latent + dnet.0 + dnet.2
    cost = pl.CostEstimate(
        flops=int(mm_flops),
        transcendentals=int(6 * T * Bp * P + Bp),
        bytes_accessed=int(4 * (x2d.size + mask.size + rnnW.size + biasP.size + mlpW.size
                                + T * Bp * P + 2 * Bp * P)),
    )

    vmem = pl.BlockSpec(memory_space=pltpu.MemorySpace.VMEM)
    recon2d, latent_p, discrim_p = pl.pallas_call(
        rnn_ae_kernel,
        out_shape=(
            jax.ShapeDtypeStruct((T * Bp, P), jnp.float32),   # reconstructed (time-major rows)
            jax.ShapeDtypeStruct((Bp, P), jnp.float32),       # latent (lane-padded)
            jax.ShapeDtypeStruct((Bp, P), jnp.float32),       # discrim (lane-broadcast)
        ),
        in_specs=[vmem] * 5,
        out_specs=(vmem, vmem, vmem),
        cost_estimate=cost,
    )(x2d, mask, rnnW, biasP, mlpW)

    # slice the padding back off outside the kernel (free layout plumbing)
    recon = jnp.transpose(recon2d.reshape(T, Bp, P)[:, :B, :D], (1, 0, 2))          # (B, T, D)
    latent = latent_p[:B, :L]
    discrim = discrim_p[:B, :1]
    return recon, latent, discrim


# ---------------- pure-JAX reference (same math, canonical params) ----------------
def reference_forward(x, p):
    B, T, D = x.shape
    H = p["eWhh"].shape[0]

    lengths = jnp.sum((jnp.sum(x, axis=-1) != 0).astype(jnp.int32), axis=1)

    def gru(gi, h, Whh, bhh):
        gh = h @ Whh + bhh
        r = jax.nn.sigmoid(gi[:, :H] + gh[:, :H])
        z = jax.nn.sigmoid(gi[:, H:2 * H] + gh[:, H:2 * H])
        n = jnp.tanh(gi[:, 2 * H:] + r * gh[:, 2 * H:])
        return (1.0 - z) * n + z * h

    h = jnp.zeros((B, H), jnp.float32)
    for t in range(T):
        gi = x[:, t, :] @ p["eWih"] + p["ebih"]
        h_new = gru(gi, h, p["eWhh"], p["ebhh"])
        h = jnp.where((t < lengths)[:, None], h_new, h)

    lrelu = lambda v: jnp.where(v > 0, v, NEG_SLOPE * v)
    latent = lrelu(h @ p["latW"] + p["latb"])
    d = lrelu(latent @ p["d1W"] + p["d1b"])
    d = lrelu(d @ p["d2W"] + p["d2b"])
    discrim = jax.nn.sigmoid(d @ p["d3W"] + p["d3b"])

    gi_dec = latent @ p["dWih"] + p["dbih"]
    hd = jnp.zeros((B, H), jnp.float32)
    outs = []
    for t in range(T):
        hd = gru(gi_dec, hd, p["dWhh"], p["dbhh"])
        outs.append(lrelu(hd @ p["oW"] + p["ob"]))
    recon = jnp.stack(outs, axis=1)
    return recon, latent, discrim


if __name__ == "__main__":
    B, T, D, H, L = 2, 8, 16, 32, 16  # batch, seq, input_dim, hidden_dim, latent_dim

    key = jax.random.PRNGKey(0)
    kx, kp = jax.random.split(key)

    # padded sequences: sample 0 has full length T, sample 1 has length 5 (zeros after)
    x = jax.random.normal(kx, (B, T, D), jnp.float32)
    valid = jnp.arange(T)[None, :] < jnp.array([T, 5])[:, None]   # (B, T)
    x = x * valid[:, :, None].astype(jnp.float32)

    params = make_params(kp, D, H, L)

    recon, latent, discrim = jax.jit(rnn_autoencoder_forward)(x, params)
    jax.block_until_ready((recon, latent, discrim))

    r_ref, l_ref, d_ref = reference_forward(x, params)
    assert recon.shape == (B, T, D) and latent.shape == (B, L) and discrim.shape == (B, 1)
    assert jnp.allclose(recon, r_ref, atol=2e-4, rtol=2e-4)
    assert jnp.allclose(latent, l_ref, atol=2e-4, rtol=2e-4)
    assert jnp.allclose(discrim, d_ref, atol=2e-4, rtol=2e-4)

    print("KERNEL_OK")
</pallas_src>

<mosaic_0001>
module attributes {stable_mosaic.version = 11 : i64} {
  func.func @rnn_ae_kernel(%arg0: memref<64x128xf32, #tpu.memory_space<vmem>>, %arg1: memref<8x8x128xf32, #tpu.memory_space<vmem>>, %arg2: memref<4x128x384xf32, #tpu.memory_space<vmem>>, %arg3: memref<16x384xf32, #tpu.memory_space<vmem>>, %arg4: memref<4x128x128xf32, #tpu.memory_space<vmem>>, %arg5: memref<64x128xf32, #tpu.memory_space<vmem>>, %arg6: memref<8x128xf32, #tpu.memory_space<vmem>>, %arg7: memref<8x128xf32, #tpu.memory_space<vmem>>) attributes {dimension_semantics = [], scalar_prefetch = 0 : i64, scratch_operands = 0 : i64, tpu.core_type = #tpu.core_type<tc>} {
    %c0 = arith.constant 0 : index
    %c0_0 = arith.constant 0 : index
    %0 = vector.load %arg0[%c0, %c0_0] : memref<64x128xf32, #tpu.memory_space<vmem>>, vector<64x128xf32>
    %c0_1 = arith.constant 0 : index
    %c0_2 = arith.constant 0 : index
    %c0_3 = arith.constant 0 : index
    %1 = vector.load %arg1[%c0_1, %c0_2, %c0_3] : memref<8x8x128xf32, #tpu.memory_space<vmem>>, vector<8x8x128xf32>
    %c0_4 = arith.constant 0 : index
    %c0_5 = arith.constant 0 : index
    %c0_6 = arith.constant 0 : index
    %2 = vector.load %arg2[%c0_4, %c0_5, %c0_6] : memref<4x128x384xf32, #tpu.memory_space<vmem>>, vector<4x128x384xf32>
    %c0_7 = arith.constant 0 : index
    %c0_8 = arith.constant 0 : index
    %3 = vector.load %arg3[%c0_7, %c0_8] : memref<16x384xf32, #tpu.memory_space<vmem>>, vector<16x384xf32>
    %c0_9 = arith.constant 0 : index
    %c0_10 = arith.constant 0 : index
    %c0_11 = arith.constant 0 : index
    %4 = vector.load %arg4[%c0_9, %c0_10, %c0_11] : memref<4x128x128xf32, #tpu.memory_space<vmem>>, vector<4x128x128xf32>
    %5 = vector.extract_strided_slice %2 {offsets = [0, 0, 0], sizes = [1, 128, 384], strides = [1, 1, 1]} : vector<4x128x384xf32> to vector<1x128x384xf32>
    %6 = vector.shape_cast %5 : vector<1x128x384xf32> to vector<128x384xf32>
    %7 = vector.extract_strided_slice %2 {offsets = [1, 0, 0], sizes = [1, 128, 384], strides = [1, 1, 1]} : vector<4x128x384xf32> to vector<1x128x384xf32>
    %8 = vector.shape_cast %7 : vector<1x128x384xf32> to vector<128x384xf32>
    %9 = vector.extract_strided_slice %2 {offsets = [2, 0, 0], sizes = [1, 128, 384], strides = [1, 1, 1]} : vector<4x128x384xf32> to vector<1x128x384xf32>
    %10 = vector.shape_cast %9 : vector<1x128x384xf32> to vector<128x384xf32>
    %11 = vector.extract_strided_slice %2 {offsets = [3, 0, 0], sizes = [1, 128, 384], strides = [1, 1, 1]} : vector<4x128x384xf32> to vector<1x128x384xf32>
    %12 = vector.shape_cast %11 : vector<1x128x384xf32> to vector<128x384xf32>
    %cst = arith.constant dense<0.000000e+00> : vector<64x384xf32>
    %13 = tpu.matmul %0, %6, %cst {dimension_numbers = #tpu.dot_dimension_numbers<[1], [0], [0], [1], [0, 0, 1, 1], [], []>} : vector<64x128xf32>, vector<128x384xf32>, vector<64x384xf32> -> vector<64x384xf32>
    %14 = vector.extract_strided_slice %3 {offsets = [0, 0], sizes = [1, 384], strides = [1, 1]} : vector<16x384xf32> to vector<1x384xf32>
    %15 = vector.broadcast %14 : vector<1x384xf32> to vector<64x384xf32>
    %16 = arith.addf %13, %15 : vector<64x384xf32>
    %17 = vector.extract_strided_slice %3 {offsets = [1, 0], sizes = [1, 128], strides = [1, 1]} : vector<16x384xf32> to vector<1x128xf32>
    %18 = vector.shape_cast %17 : vector<1x128xf32> to vector<1x128xf32>
    %19 = vector.broadcast %18 : vector<1x128xf32> to vector<8x128xf32>
    %cst_12 = arith.constant 0.000000e+00 : f32
    %20 = vector.broadcast %cst_12 : f32 to vector<8x128xf32>
    %21 = vector.extract_strided_slice %16 {offsets = [0, 0], sizes = [8, 384], strides = [1, 1]} : vector<64x384xf32> to vector<8x384xf32>
    %cst_13 = arith.constant dense<0.000000e+00> : vector<8x384xf32>
    %22 = tpu.matmul %20, %8, %cst_13 {dimension_numbers = #tpu.dot_dimension_numbers<[1], [0], [0], [1], [0, 0, 1, 1], [], []>} : vector<8x128xf32>, vector<128x384xf32>, vector<8x384xf32> -> vector<8x384xf32>
    %23 = vector.extract_strided_slice %21 {offsets = [0, 0], sizes = [8, 128], strides = [1, 1]} : vector<8x384xf32> to vector<8x128xf32>
    %24 = vector.extract_strided_slice %22 {offsets = [0, 0], sizes = [8, 128], strides = [1, 1]} : vector<8x384xf32> to vector<8x128xf32>
    %25 = arith.addf %23, %24 : vector<8x128xf32>
    %26 = arith.negf %25 : vector<8x128xf32>
    %27 = math.exp %26 : vector<8x128xf32>
    %cst_14 = arith.constant 1.000000e+00 : f32
    %28 = vector.broadcast %cst_14 : f32 to vector<8x128xf32>
    %29 = arith.addf %28, %27 : vector<8x128xf32>
    %30 = arith.divf %28, %29 : vector<8x128xf32>
    %31 = vector.extract_strided_slice %21 {offsets = [0, 128], sizes = [8, 128], strides = [1, 1]} : vector<8x384xf32> to vector<8x128xf32>
    %32 = vector.extract_strided_slice %22 {offsets = [0, 128], sizes = [8, 128], strides = [1, 1]} : vector<8x384xf32> to vector<8x128xf32>
    %33 = arith.addf %31, %32 : vector<8x128xf32>
    %34 = arith.negf %33 : vector<8x128xf32>
    %35 = math.exp %34 : vector<8x128xf32>
    %cst_15 = arith.constant 1.000000e+00 : f32
    %36 = vector.broadcast %cst_15 : f32 to vector<8x128xf32>
    %37 = arith.addf %36, %35 : vector<8x128xf32>
    %38 = arith.divf %36, %37 : vector<8x128xf32>
    %39 = vector.extract_strided_slice %21 {offsets = [0, 256], sizes = [8, 128], strides = [1, 1]} : vector<8x384xf32> to vector<8x128xf32>
    %40 = vector.extract_strided_slice %22 {offsets = [0, 256], sizes = [8, 128], strides = [1, 1]} : vector<8x384xf32> to vector<8x128xf32>
    %41 = arith.addf %40, %19 : vector<8x128xf32>
    %42 = arith.mulf %30, %41 : vector<8x128xf32>
    %43 = arith.addf %39, %42 : vector<8x128xf32>
    %44 = math.tanh %43 : vector<8x128xf32>
    %cst_16 = arith.constant 1.000000e+00 : f32
    %45 = vector.broadcast %cst_16 : f32 to vector<8x128xf32>
    %46 = arith.subf %45, %38 : vector<8x128xf32>
    %47 = arith.mulf %46, %44 : vector<8x128xf32>
    %48 = arith.mulf %38, %20 : vector<8x128xf32>
    %49 = arith.addf %47, %48 : vector<8x128xf32>
    %50 = vector.extract_strided_slice %1 {offsets = [0, 0, 0], sizes = [1, 8, 128], strides = [1, 1, 1]} : vector<8x8x128xf32> to vector<1x8x128xf32>
    %51 = vector.shape_cast %50 : vector<1x8x128xf32> to vector<8x128xf32>
    %cst_17 = arith.constant 5.000000e-01 : f32
    %52 = vector.broadcast %cst_17 : f32 to vector<8x128xf32>
    %53 = arith.cmpf ogt, %51, %52 : vector<8x128xf32>
    %54 = arith.select %53, %49, %20 : vector<8x128xi1>, vector<8x128xf32>
    %55 = vector.extract_strided_slice %16 {offsets = [8, 0], sizes = [8, 384], strides = [1, 1]} : vector<64x384xf32> to vector<8x384xf32>
    %cst_18 = arith.constant dense<0.000000e+00> : vector<8x384xf32>
    %56 = tpu.matmul %54, %8, %cst_18 {dimension_numbers = #tpu.dot_dimension_numbers<[1], [0], [0], [1], [0, 0, 1, 1], [], []>} : vector<8x128xf32>, vector<128x384xf32>, vector<8x384xf32> -> vector<8x384xf32>
    %57 = vector.extract_strided_slice %55 {offsets = [0, 0], sizes = [8, 128], strides = [1, 1]} : vector<8x384xf32> to vector<8x128xf32>
    %58 = vector.extract_strided_slice %56 {offsets = [0, 0], sizes = [8, 128], strides = [1, 1]} : vector<8x384xf32> to vector<8x128xf32>
    %59 = arith.addf %57, %58 : vector<8x128xf32>
    %60 = arith.negf %59 : vector<8x128xf32>
    %61 = math.exp %60 : vector<8x128xf32>
    %cst_19 = arith.constant 1.000000e+00 : f32
    %62 = vector.broadcast %cst_19 : f32 to vector<8x128xf32>
    %63 = arith.addf %62, %61 : vector<8x128xf32>
    %64 = arith.divf %62, %63 : vector<8x128xf32>
    %65 = vector.extract_strided_slice %55 {offsets = [0, 128], sizes = [8, 128], strides = [1, 1]} : vector<8x384xf32> to vector<8x128xf32>
    %66 = vector.extract_strided_slice %56 {offsets = [0, 128], sizes = [8, 128], strides = [1, 1]} : vector<8x384xf32> to vector<8x128xf32>
    %67 = arith.addf %65, %66 : vector<8x128xf32>
    %68 = arith.negf %67 : vector<8x128xf32>
    %69 = math.exp %68 : vector<8x128xf32>
    %cst_20 = arith.constant 1.000000e+00 : f32
    %70 = vector.broadcast %cst_20 : f32 to vector<8x128xf32>
    %71 = arith.addf %70, %69 : vector<8x128xf32>
    %72 = arith.divf %70, %71 : vector<8x128xf32>
    %73 = vector.extract_strided_slice %55 {offsets = [0, 256], sizes = [8, 128], strides = [1, 1]} : vector<8x384xf32> to vector<8x128xf32>
    %74 = vector.extract_strided_slice %56 {offsets = [0, 256], sizes = [8, 128], strides = [1, 1]} : vector<8x384xf32> to vector<8x128xf32>
    %75 = arith.addf %74, %19 : vector<8x128xf32>
    %76 = arith.mulf %64, %75 : vector<8x128xf32>
    %77 = arith.addf %73, %76 : vector<8x128xf32>
    %78 = math.tanh %77 : vector<8x128xf32>
    %cst_21 = arith.constant 1.000000e+00 : f32
    %79 = vector.broadcast %cst_21 : f32 to vector<8x128xf32>
    %80 = arith.subf %79, %72 : vector<8x128xf32>
    %81 = arith.mulf %80, %78 : vector<8x128xf32>
    %82 = arith.mulf %72, %54 : vector<8x128xf32>
    %83 = arith.addf %81, %82 : vector<8x128xf32>
    %84 = vector.extract_strided_slice %1 {offsets = [1, 0, 0], sizes = [1, 8, 128], strides = [1, 1, 1]} : vector<8x8x128xf32> to vector<1x8x128xf32>
    %85 = vector.shape_cast %84 : vector<1x8x128xf32> to vector<8x128xf32>
    %cst_22 = arith.constant 5.000000e-01 : f32
    %86 = vector.broadcast %cst_22 : f32 to vector<8x128xf32>
    %87 = arith.cmpf ogt, %85, %86 : vector<8x128xf32>
    %88 = arith.select %87, %83, %54 : vector<8x128xi1>, vector<8x128xf32>
    %89 = vector.extract_strided_slice %16 {offsets = [16, 0], sizes = [8, 384], strides = [1, 1]} : vector<64x384xf32> to vector<8x384xf32>
    %cst_23 = arith.constant dense<0.000000e+00> : vector<8x384xf32>
    %90 = tpu.matmul %88, %8, %cst_23 {dimension_numbers = #tpu.dot_dimension_numbers<[1], [0], [0], [1], [0, 0, 1, 1], [], []>} : vector<8x128xf32>, vector<128x384xf32>, vector<8x384xf32> -> vector<8x384xf32>
    %91 = vector.extract_strided_slice %89 {offsets = [0, 0], sizes = [8, 128], strides = [1, 1]} : vector<8x384xf32> to vector<8x128xf32>
    %92 = vector.extract_strided_slice %90 {offsets = [0, 0], sizes = [8, 128], strides = [1, 1]} : vector<8x384xf32> to vector<8x128xf32>
    %93 = arith.addf %91, %92 : vector<8x128xf32>
    %94 = arith.negf %93 : vector<8x128xf32>
    %95 = math.exp %94 : vector<8x128xf32>
    %cst_24 = arith.constant 1.000000e+00 : f32
    %96 = vector.broadcast %cst_24 : f32 to vector<8x128xf32>
    %97 = arith.addf %96, %95 : vector<8x128xf32>
    %98 = arith.divf %96, %97 : vector<8x128xf32>
    %99 = vector.extract_strided_slice %89 {offsets = [0, 128], sizes = [8, 128], strides = [1, 1]} : vector<8x384xf32> to vector<8x128xf32>
    %100 = vector.extract_strided_slice %90 {offsets = [0, 128], sizes = [8, 128], strides = [1, 1]} : vector<8x384xf32> to vector<8x128xf32>
    %101 = arith.addf %99, %100 : vector<8x128xf32>
    %102 = arith.negf %101 : vector<8x128xf32>
    %103 = math.exp %102 : vector<8x128xf32>
    %cst_25 = arith.constant 1.000000e+00 : f32
    %104 = vector.broadcast %cst_25 : f32 to vector<8x128xf32>
    %105 = arith.addf %104, %103 : vector<8x128xf32>
    %106 = arith.divf %104, %105 : vector<8x128xf32>
    %107 = vector.extract_strided_slice %89 {offsets = [0, 256], sizes = [8, 128], strides = [1, 1]} : vector<8x384xf32> to vector<8x128xf32>
    %108 = vector.extract_strided_slice %90 {offsets = [0, 256], sizes = [8, 128], strides = [1, 1]} : vector<8x384xf32> to vector<8x128xf32>
    %109 = arith.addf %108, %19 : vector<8x128xf32>
    %110 = arith.mulf %98, %109 : vector<8x128xf32>
    %111 = arith.addf %107, %110 : vector<8x128xf32>
    %112 = math.tanh %111 : vector<8x128xf32>
    %cst_26 = arith.constant 1.000000e+00 : f32
    %113 = vector.broadcast %cst_26 : f32 to vector<8x128xf32>
    %114 = arith.subf %113, %106 : vector<8x128xf32>
    %115 = arith.mulf %114, %112 : vector<8x128xf32>
    %116 = arith.mulf %106, %88 : vector<8x128xf32>
    %117 = arith.addf %115, %116 : vector<8x128xf32>
    %118 = vector.extract_strided_slice %1 {offsets = [2, 0, 0], sizes = [1, 8, 128], strides = [1, 1, 1]} : vector<8x8x128xf32> to vector<1x8x128xf32>
    %119 = vector.shape_cast %118 : vector<1x8x128xf32> to vector<8x128xf32>
    %cst_27 = arith.constant 5.000000e-01 : f32
    %120 = vector.broadcast %cst_27 : f32 to vector<8x128xf32>
    %121 = arith.cmpf ogt, %119, %120 : vector<8x128xf32>
    %122 = arith.select %121, %117, %88 : vector<8x128xi1>, vector<8x128xf32>
    %123 = vector.extract_strided_slice %16 {offsets = [24, 0], sizes = [8, 384], strides = [1, 1]} : vector<64x384xf32> to vector<8x384xf32>
    %cst_28 = arith.constant dense<0.000000e+00> : vector<8x384xf32>
    %124 = tpu.matmul %122, %8, %cst_28 {dimension_numbers = #tpu.dot_dimension_numbers<[1], [0], [0], [1], [0, 0, 1, 1], [], []>} : vector<8x128xf32>, vector<128x384xf32>, vector<8x384xf32> -> vector<8x384xf32>
    %125 = vector.extract_strided_slice %123 {offsets = [0, 0], sizes = [8, 128], strides = [1, 1]} : vector<8x384xf32> to vector<8x128xf32>
    %126 = vector.extract_strided_slice %124 {offsets = [0, 0], sizes = [8, 128], strides = [1, 1]} : vector<8x384xf32> to vector<8x128xf32>
    %127 = arith.addf %125, %126 : vector<8x128xf32>
    %128 = arith.negf %127 : vector<8x128xf32>
    %129 = math.exp %128 : vector<8x128xf32>
    %cst_29 = arith.constant 1.000000e+00 : f32
    %130 = vector.broadcast %cst_29 : f32 to vector<8x128xf32>
    %131 = arith.addf %130, %129 : vector<8x128xf32>
    %132 = arith.divf %130, %131 : vector<8x128xf32>
    %133 = vector.extract_strided_slice %123 {offsets = [0, 128], sizes = [8, 128], strides = [1, 1]} : vector<8x384xf32> to vector<8x128xf32>
    %134 = vector.extract_strided_slice %124 {offsets = [0, 128], sizes = [8, 128], strides = [1, 1]} : vector<8x384xf32> to vector<8x128xf32>
    %135 = arith.addf %133, %134 : vector<8x128xf32>
    %136 = arith.negf %135 : vector<8x128xf32>
    %137 = math.exp %136 : vector<8x128xf32>
    %cst_30 = arith.constant 1.000000e+00 : f32
    %138 = vector.broadcast %cst_30 : f32 to vector<8x128xf32>
    %139 = arith.addf %138, %137 : vector<8x128xf32>
    %140 = arith.divf %138, %139 : vector<8x128xf32>
    %141 = vector.extract_strided_slice %123 {offsets = [0, 256], sizes = [8, 128], strides = [1, 1]} : vector<8x384xf32> to vector<8x128xf32>
    %142 = vector.extract_strided_slice %124 {offsets = [0, 256], sizes = [8, 128], strides = [1, 1]} : vector<8x384xf32> to vector<8x128xf32>
    %143 = arith.addf %142, %19 : vector<8x128xf32>
    %144 = arith.mulf %132, %143 : vector<8x128xf32>
    %145 = arith.addf %141, %144 : vector<8x128xf32>
    %146 = math.tanh %145 : vector<8x128xf32>
    %cst_31 = arith.constant 1.000000e+00 : f32
    %147 = vector.broadcast %cst_31 : f32 to vector<8x128xf32>
    %148 = arith.subf %147, %140 : vector<8x128xf32>
    %149 = arith.mulf %148, %146 : vector<8x128xf32>
    %150 = arith.mulf %140, %122 : vector<8x128xf32>
    %151 = arith.addf %149, %150 : vector<8x128xf32>
    %152 = vector.extract_strided_slice %1 {offsets = [3, 0, 0], sizes = [1, 8, 128], strides = [1, 1, 1]} : vector<8x8x128xf32> to vector<1x8x128xf32>
    %153 = vector.shape_cast %152 : vector<1x8x128xf32> to vector<8x128xf32>
    %cst_32 = arith.constant 5.000000e-01 : f32
    %154 = vector.broadcast %cst_32 : f32 to vector<8x128xf32>
    %155 = arith.cmpf ogt, %153, %154 : vector<8x128xf32>
    %156 = arith.select %155, %151, %122 : vector<8x128xi1>, vector<8x128xf32>
    %157 = vector.extract_strided_slice %16 {offsets = [32, 0], sizes = [8, 384], strides = [1, 1]} : vector<64x384xf32> to vector<8x384xf32>
    %cst_33 = arith.constant dense<0.000000e+00> : vector<8x384xf32>
    %158 = tpu.matmul %156, %8, %cst_33 {dimension_numbers = #tpu.dot_dimension_numbers<[1], [0], [0], [1], [0, 0, 1, 1], [], []>} : vector<8x128xf32>, vector<128x384xf32>, vector<8x384xf32> -> vector<8x384xf32>
    %159 = vector.extract_strided_slice %157 {offsets = [0, 0], sizes = [8, 128], strides = [1, 1]} : vector<8x384xf32> to vector<8x128xf32>
    %160 = vector.extract_strided_slice %158 {offsets = [0, 0], sizes = [8, 128], strides = [1, 1]} : vector<8x384xf32> to vector<8x128xf32>
    %161 = arith.addf %159, %160 : vector<8x128xf32>
    %162 = arith.negf %161 : vector<8x128xf32>
    %163 = math.exp %162 : vector<8x128xf32>
    %cst_34 = arith.constant 1.000000e+00 : f32
    %164 = vector.broadcast %cst_34 : f32 to vector<8x128xf32>
    %165 = arith.addf %164, %163 : vector<8x128xf32>
    %166 = arith.divf %164, %165 : vector<8x128xf32>
    %167 = vector.extract_strided_slice %157 {offsets = [0, 128], sizes = [8, 128], strides = [1, 1]} : vector<8x384xf32> to vector<8x128xf32>
    %168 = vector.extract_strided_slice %158 {offsets = [0, 128], sizes = [8, 128], strides = [1, 1]} : vector<8x384xf32> to vector<8x128xf32>
    %169 = arith.addf %167, %168 : vector<8x128xf32>
    %170 = arith.negf %169 : vector<8x128xf32>
    %171 = math.exp %170 : vector<8x128xf32>
    %cst_35 = arith.constant 1.000000e+00 : f32
    %172 = vector.broadcast %cst_35 : f32 to vector<8x128xf32>
    %173 = arith.addf %172, %171 : vector<8x128xf32>
    %174 = arith.divf %172, %173 : vector<8x128xf32>
    %175 = vector.extract_strided_slice %157 {offsets = [0, 256], sizes = [8, 128], strides = [1, 1]} : vector<8x384xf32> to vector<8x128xf32>
    %176 = vector.extract_strided_slice %158 {offsets = [0, 256], sizes = [8, 128], strides = [1, 1]} : vector<8x384xf32> to vector<8x128xf32>
    %177 = arith.addf %176, %19 : vector<8x128xf32>
    %178 = arith.mulf %166, %177 : vector<8x128xf32>
    %179 = arith.addf %175, %178 : vector<8x128xf32>
    %180 = math.tanh %179 : vector<8x128xf32>
    %cst_36 = arith.constant 1.000000e+00 : f32
    %181 = vector.broadcast %cst_36 : f32 to vector<8x128xf32>
    %182 = arith.subf %181, %174 : vector<8x128xf32>
    %183 = arith.mulf %182, %180 : vector<8x128xf32>
    %184 = arith.mulf %174, %156 : vector<8x128xf32>
    %185 = arith.addf %183, %184 : vector<8x128xf32>
    %186 = vector.extract_strided_slice %1 {offsets = [4, 0, 0], sizes = [1, 8, 128], strides = [1, 1, 1]} : vector<8x8x128xf32> to vector<1x8x128xf32>
    %187 = vector.shape_cast %186 : vector<1x8x128xf32> to vector<8x128xf32>
    %cst_37 = arith.constant 5.000000e-01 : f32
    %188 = vector.broadcast %cst_37 : f32 to vector<8x128xf32>
    %189 = arith.cmpf ogt, %187, %188 : vector<8x128xf32>
    %190 = arith.select %189, %185, %156 : vector<8x128xi1>, vector<8x128xf32>
    %191 = vector.extract_strided_slice %16 {offsets = [40, 0], sizes = [8, 384], strides = [1, 1]} : vector<64x384xf32> to vector<8x384xf32>
    %cst_38 = arith.constant dense<0.000000e+00> : vector<8x384xf32>
    %192 = tpu.matmul %190, %8, %cst_38 {dimension_numbers = #tpu.dot_dimension_numbers<[1], [0], [0], [1], [0, 0, 1, 1], [], []>} : vector<8x128xf32>, vector<128x384xf32>, vector<8x384xf32> -> vector<8x384xf32>
    %193 = vector.extract_strided_slice %191 {offsets = [0, 0], sizes = [8, 128], strides = [1, 1]} : vector<8x384xf32> to vector<8x128xf32>
    %194 = vector.extract_strided_slice %192 {offsets = [0, 0], sizes = [8, 128], strides = [1, 1]} : vector<8x384xf32> to vector<8x128xf32>
    %195 = arith.addf %193, %194 : vector<8x128xf32>
    %196 = arith.negf %195 : vector<8x128xf32>
    %197 = math.exp %196 : vector<8x128xf32>
    %cst_39 = arith.constant 1.000000e+00 : f32
    %198 = vector.broadcast %cst_39 : f32 to vector<8x128xf32>
    %199 = arith.addf %198, %197 : vector<8x128xf32>
    %200 = arith.divf %198, %199 : vector<8x128xf32>
    %201 = vector.extract_strided_slice %191 {offsets = [0, 128], sizes = [8, 128], strides = [1, 1]} : vector<8x384xf32> to vector<8x128xf32>
    %202 = vector.extract_strided_slice %192 {offsets = [0, 128], sizes = [8, 128], strides = [1, 1]} : vector<8x384xf32> to vector<8x128xf32>
    %203 = arith.addf %201, %202 : vector<8x128xf32>
    %204 = arith.negf %203 : vector<8x128xf32>
    %205 = math.exp %204 : vector<8x128xf32>
    %cst_40 = arith.constant 1.000000e+00 : f32
    %206 = vector.broadcast %cst_40 : f32 to vector<8x128xf32>
    %207 = arith.addf %206, %205 : vector<8x128xf32>
    %208 = arith.divf %206, %207 : vector<8x128xf32>
    %209 = vector.extract_strided_slice %191 {offsets = [0, 256], sizes = [8, 128], strides = [1, 1]} : vector<8x384xf32> to vector<8x128xf32>
    %210 = vector.extract_strided_slice %192 {offsets = [0, 256], sizes = [8, 128], strides = [1, 1]} : vector<8x384xf32> to vector<8x128xf32>
    %211 = arith.addf %210, %19 : vector<8x128xf32>
    %212 = arith.mulf %200, %211 : vector<8x128xf32>
    %213 = arith.addf %209, %212 : vector<8x128xf32>
    %214 = math.tanh %213 : vector<8x128xf32>
    %cst_41 = arith.constant 1.000000e+00 : f32
    %215 = vector.broadcast %cst_41 : f32 to vector<8x128xf32>
    %216 = arith.subf %215, %208 : vector<8x128xf32>
    %217 = arith.mulf %216, %214 : vector<8x128xf32>
    %218 = arith.mulf %208, %190 : vector<8x128xf32>
    %219 = arith.addf %217, %218 : vector<8x128xf32>
    %220 = vector.extract_strided_slice %1 {offsets = [5, 0, 0], sizes = [1, 8, 128], strides = [1, 1, 1]} : vector<8x8x128xf32> to vector<1x8x128xf32>
    %221 = vector.shape_cast %220 : vector<1x8x128xf32> to vector<8x128xf32>
    %cst_42 = arith.constant 5.000000e-01 : f32
    %222 = vector.broadcast %cst_42 : f32 to vector<8x128xf32>
    %223 = arith.cmpf ogt, %221, %222 : vector<8x128xf32>
    %224 = arith.select %223, %219, %190 : vector<8x128xi1>, vector<8x128xf32>
    %225 = vector.extract_strided_slice %16 {offsets = [48, 0], sizes = [8, 384], strides = [1, 1]} : vector<64x384xf32> to vector<8x384xf32>
    %cst_43 = arith.constant dense<0.000000e+00> : vector<8x384xf32>
    %226 = tpu.matmul %224, %8, %cst_43 {dimension_numbers = #tpu.dot_dimension_numbers<[1], [0], [0], [1], [0, 0, 1, 1], [], []>} : vector<8x128xf32>, vector<128x384xf32>, vector<8x384xf32> -> vector<8x384xf32>
    %227 = vector.extract_strided_slice %225 {offsets = [0, 0], sizes = [8, 128], strides = [1, 1]} : vector<8x384xf32> to vector<8x128xf32>
    %228 = vector.extract_strided_slice %226 {offsets = [0, 0], sizes = [8, 128], strides = [1, 1]} : vector<8x384xf32> to vector<8x128xf32>
    %229 = arith.addf %227, %228 : vector<8x128xf32>
    %230 = arith.negf %229 : vector<8x128xf32>
    %231 = math.exp %230 : vector<8x128xf32>
    %cst_44 = arith.constant 1.000000e+00 : f32
    %232 = vector.broadcast %cst_44 : f32 to vector<8x128xf32>
    %233 = arith.addf %232, %231 : vector<8x128xf32>
    %234 = arith.divf %232, %233 : vector<8x128xf32>
    %235 = vector.extract_strided_slice %225 {offsets = [0, 128], sizes = [8, 128], strides = [1, 1]} : vector<8x384xf32> to vector<8x128xf32>
    %236 = vector.extract_strided_slice %226 {offsets = [0, 128], sizes = [8, 128], strides = [1, 1]} : vector<8x384xf32> to vector<8x128xf32>
    %237 = arith.addf %235, %236 : vector<8x128xf32>
    %238 = arith.negf %237 : vector<8x128xf32>
    %239 = math.exp %238 : vector<8x128xf32>
    %cst_45 = arith.constant 1.000000e+00 : f32
    %240 = vector.broadcast %cst_45 : f32 to vector<8x128xf32>
    %241 = arith.addf %240, %239 : vector<8x128xf32>
    %242 = arith.divf %240, %241 : vector<8x128xf32>
    %243 = vector.extract_strided_slice %225 {offsets = [0, 256], sizes = [8, 128], strides = [1, 1]} : vector<8x384xf32> to vector<8x128xf32>
    %244 = vector.extract_strided_slice %226 {offsets = [0, 256], sizes = [8, 128], strides = [1, 1]} : vector<8x384xf32> to vector<8x128xf32>
    %245 = arith.addf %244, %19 : vector<8x128xf32>
    %246 = arith.mulf %234, %245 : vector<8x128xf32>
    %247 = arith.addf %243, %246 : vector<8x128xf32>
    %248 = math.tanh %247 : vector<8x128xf32>
    %cst_46 = arith.constant 1.000000e+00 : f32
    %249 = vector.broadcast %cst_46 : f32 to vector<8x128xf32>
    %250 = arith.subf %249, %242 : vector<8x128xf32>
    %251 = arith.mulf %250, %248 : vector<8x128xf32>
    %252 = arith.mulf %242, %224 : vector<8x128xf32>
    %253 = arith.addf %251, %252 : vector<8x128xf32>
    %254 = vector.extract_strided_slice %1 {offsets = [6, 0, 0], sizes = [1, 8, 128], strides = [1, 1, 1]} : vector<8x8x128xf32> to vector<1x8x128xf32>
    %255 = vector.shape_cast %254 : vector<1x8x128xf32> to vector<8x128xf32>
    %cst_47 = arith.constant 5.000000e-01 : f32
    %256 = vector.broadcast %cst_47 : f32 to vector<8x128xf32>
    %257 = arith.cmpf ogt, %255, %256 : vector<8x128xf32>
    %258 = arith.select %257, %253, %224 : vector<8x128xi1>, vector<8x128xf32>
    %259 = vector.extract_strided_slice %16 {offsets = [56, 0], sizes = [8, 384], strides = [1, 1]} : vector<64x384xf32> to vector<8x384xf32>
    %cst_48 = arith.constant dense<0.000000e+00> : vector<8x384xf32>
    %260 = tpu.matmul %258, %8, %cst_48 {dimension_numbers = #tpu.dot_dimension_numbers<[1], [0], [0], [1], [0, 0, 1, 1], [], []>} : vector<8x128xf32>, vector<128x384xf32>, vector<8x384xf32> -> vector<8x384xf32>
    %261 = vector.extract_strided_slice %259 {offsets = [0, 0], sizes = [8, 128], strides = [1, 1]} : vector<8x384xf32> to vector<8x128xf32>
    %262 = vector.extract_strided_slice %260 {offsets = [0, 0], sizes = [8, 128], strides = [1, 1]} : vector<8x384xf32> to vector<8x128xf32>
    %263 = arith.addf %261, %262 : vector<8x128xf32>
    %264 = arith.negf %263 : vector<8x128xf32>
    %265 = math.exp %264 : vector<8x128xf32>
    %cst_49 = arith.constant 1.000000e+00 : f32
    %266 = vector.broadcast %cst_49 : f32 to vector<8x128xf32>
    %267 = arith.addf %266, %265 : vector<8x128xf32>
    %268 = arith.divf %266, %267 : vector<8x128xf32>
    %269 = vector.extract_strided_slice %259 {offsets = [0, 128], sizes = [8, 128], strides = [1, 1]} : vector<8x384xf32> to vector<8x128xf32>
    %270 = vector.extract_strided_slice %260 {offsets = [0, 128], sizes = [8, 128], strides = [1, 1]} : vector<8x384xf32> to vector<8x128xf32>
    %271 = arith.addf %269, %270 : vector<8x128xf32>
    %272 = arith.negf %271 : vector<8x128xf32>
    %273 = math.exp %272 : vector<8x128xf32>
    %cst_50 = arith.constant 1.000000e+00 : f32
    %274 = vector.broadcast %cst_50 : f32 to vector<8x128xf32>
    %275 = arith.addf %274, %273 : vector<8x128xf32>
    %276 = arith.divf %274, %275 : vector<8x128xf32>
    %277 = vector.extract_strided_slice %259 {offsets = [0, 256], sizes = [8, 128], strides = [1, 1]} : vector<8x384xf32> to vector<8x128xf32>
    %278 = vector.extract_strided_slice %260 {offsets = [0, 256], sizes = [8, 128], strides = [1, 1]} : vector<8x384xf32> to vector<8x128xf32>
    %279 = arith.addf %278, %19 : vector<8x128xf32>
    %280 = arith.mulf %268, %279 : vector<8x128xf32>
    %281 = arith.addf %277, %280 : vector<8x128xf32>
    %282 = math.tanh %281 : vector<8x128xf32>
    %cst_51 = arith.constant 1.000000e+00 : f32
    %283 = vector.broadcast %cst_51 : f32 to vector<8x128xf32>
    %284 = arith.subf %283, %276 : vector<8x128xf32>
    %285 = arith.mulf %284, %282 : vector<8x128xf32>
    %286 = arith.mulf %276, %258 : vector<8x128xf32>
    %287 = arith.addf %285, %286 : vector<8x128xf32>
    %288 = vector.extract_strided_slice %1 {offsets = [7, 0, 0], sizes = [1, 8, 128], strides = [1, 1, 1]} : vector<8x8x128xf32> to vector<1x8x128xf32>
    %289 = vector.shape_cast %288 : vector<1x8x128xf32> to vector<8x128xf32>
    %cst_52 = arith.constant 5.000000e-01 : f32
    %290 = vector.broadcast %cst_52 : f32 to vector<8x128xf32>
    %291 = arith.cmpf ogt, %289, %290 : vector<8x128xf32>
    %292 = arith.select %291, %287, %258 : vector<8x128xi1>, vector<8x128xf32>
    %293 = vector.extract_strided_slice %4 {offsets = [0, 0, 0], sizes = [1, 128, 128], strides = [1, 1, 1]} : vector<4x128x128xf32> to vector<1x128x128xf32>
    %294 = vector.shape_cast %293 : vector<1x128x128xf32> to vector<128x128xf32>
    %cst_53 = arith.constant dense<0.000000e+00> : vector<8x128xf32>
    %295 = tpu.matmul %292, %294, %cst_53 {dimension_numbers = #tpu.dot_dimension_numbers<[1], [0], [0], [1], [0, 0, 1, 1], [], []>} : vector<8x128xf32>, vector<128x128xf32>, vector<8x128xf32> -> vector<8x128xf32>
    %296 = vector.extract_strided_slice %3 {offsets = [4, 0], sizes = [1, 128], strides = [1, 1]} : vector<16x384xf32> to vector<1x128xf32>
    %297 = vector.broadcast %296 : vector<1x128xf32> to vector<8x128xf32>
    %298 = arith.addf %295, %297 : vector<8x128xf32>
    %cst_54 = arith.constant 0.000000e+00 : f32
    %299 = vector.broadcast %cst_54 : f32 to vector<8x128xf32>
    %300 = arith.cmpf ogt, %298, %299 : vector<8x128xf32>
    %cst_55 = arith.constant 0.00999999977 : f32
    %301 = vector.broadcast %cst_55 : f32 to vector<8x128xf32>
    %302 = arith.mulf %301, %298 : vector<8x128xf32>
    %303 = arith.select %300, %298, %302 : vector<8x128xi1>, vector<8x128xf32>
    %c0_56 = arith.constant 0 : index
    %c0_57 = arith.constant 0 : index
    %304 = vector.load %arg6[%c0_56, %c0_57] : memref<8x128xf32, #tpu.memory_space<vmem>>, vector<8x128xf32>
    tpu.vector_store %arg6[%c0_56, %c0_57], %303 {strides = array<i32>} : memref<8x128xf32, #tpu.memory_space<vmem>>, vector<8x128xf32>,
    %305 = vector.extract_strided_slice %4 {offsets = [2, 0, 0], sizes = [1, 128, 128], strides = [1, 1, 1]} : vector<4x128x128xf32> to vector<1x128x128xf32>
    %306 = vector.shape_cast %305 : vector<1x128x128xf32> to vector<128x128xf32>
    %cst_58 = arith.constant dense<0.000000e+00> : vector<8x128xf32>
    %307 = tpu.matmul %303, %306, %cst_58 {dimension_numbers = #tpu.dot_dimension_numbers<[1], [0], [0], [1], [0, 0, 1, 1], [], []>} : vector<8x128xf32>, vector<128x128xf32>, vector<8x128xf32> -> vector<8x128xf32>
    %308 = vector.extract_strided_slice %3 {offsets = [6, 0], sizes = [1, 128], strides = [1, 1]} : vector<16x384xf32> to vector<1x128xf32>
    %309 = vector.broadcast %308 : vector<1x128xf32> to vector<8x128xf32>
    %310 = arith.addf %307, %309 : vector<8x128xf32>
    %cst_59 = arith.constant 0.000000e+00 : f32
    %311 = vector.broadcast %cst_59 : f32 to vector<8x128xf32>
    %312 = arith.cmpf ogt, %310, %311 : vector<8x128xf32>
    %cst_60 = arith.constant 0.00999999977 : f32
    %313 = vector.broadcast %cst_60 : f32 to vector<8x128xf32>
    %314 = arith.mulf %313, %310 : vector<8x128xf32>
    %315 = arith.select %312, %310, %314 : vector<8x128xi1>, vector<8x128xf32>
    %316 = vector.extract_strided_slice %4 {offsets = [3, 0, 0], sizes = [1, 128, 128], strides = [1, 1, 1]} : vector<4x128x128xf32> to vector<1x128x128xf32>
    %317 = vector.shape_cast %316 : vector<1x128x128xf32> to vector<128x128xf32>
    %cst_61 = arith.constant dense<0.000000e+00> : vector<8x128xf32>
    %318 = tpu.matmul %315, %317, %cst_61 {dimension_numbers = #tpu.dot_dimension_numbers<[1], [0], [0], [1], [0, 0, 1, 1], [], []>} : vector<8x128xf32>, vector<128x128xf32>, vector<8x128xf32> -> vector<8x128xf32>
    %319 = vector.extract_strided_slice %3 {offsets = [7, 0], sizes = [1, 128], strides = [1, 1]} : vector<16x384xf32> to vector<1x128xf32>
    %320 = vector.broadcast %319 : vector<1x128xf32> to vector<8x128xf32>
    %321 = arith.addf %318, %320 : vector<8x128xf32>
    %cst_62 = arith.constant 0.000000e+00 : f32
    %322 = vector.broadcast %cst_62 : f32 to vector<8x128xf32>
    %323 = arith.cmpf ogt, %321, %322 : vector<8x128xf32>
    %cst_63 = arith.constant 0.00999999977 : f32
    %324 = vector.broadcast %cst_63 : f32 to vector<8x128xf32>
    %325 = arith.mulf %324, %321 : vector<8x128xf32>
    %326 = arith.select %323, %321, %325 : vector<8x128xi1>, vector<8x128xf32>
    %327 = vector.extract_strided_slice %3 {offsets = [8, 0], sizes = [1, 128], strides = [1, 1]} : vector<16x384xf32> to vector<1x128xf32>
    %328 = vector.broadcast %327 : vector<1x128xf32> to vector<8x128xf32>
    %329 = arith.mulf %326, %328 : vector<8x128xf32>
    %cst_64 = arith.constant dense<0.000000e+00> : vector<8xf32>
    %330 = vector.multi_reduction <add>, %329, %cst_64 [1] : vector<8x128xf32> to vector<8xf32>
    %331 = vector.shape_cast %330 : vector<8xf32> to vector<8x1xf32>
    %332 = vector.extract_strided_slice %3 {offsets = [9, 0], sizes = [1, 1], strides = [1, 1]} : vector<16x384xf32> to vector<1x1xf32>
    %333 = vector.broadcast %332 : vector<1x1xf32> to vector<8x1xf32>
    %334 = arith.addf %331, %333 : vector<8x1xf32>
    %335 = arith.negf %334 : vector<8x1xf32>
    %336 = math.exp %335 : vector<8x1xf32>
    %cst_65 = arith.constant 1.000000e+00 : f32
    %337 = vector.broadcast %cst_65 : f32 to vector<8x1xf32>
    %338 = arith.addf %337, %336 : vector<8x1xf32>
    %339 = arith.divf %337, %338 : vector<8x1xf32>
    %340 = vector.shape_cast %339 : vector<8x1xf32> to vector<8x1xf32>
    %341 = vector.broadcast %340 : vector<8x1xf32> to vector<8x128xf32>
    %c0_66 = arith.constant 0 : index
    %c0_67 = arith.constant 0 : index
    %342 = vector.load %arg7[%c0_66, %c0_67] : memref<8x128xf32, #tpu.memory_space<vmem>>, vector<8x128xf32>
    tpu.vector_store %arg7[%c0_66, %c0_67], %341 {strides = array<i32>} : memref<8x128xf32, #tpu.memory_space<vmem>>, vector<8x128xf32>,
    %cst_68 = arith.constant dense<0.000000e+00> : vector<8x384xf32>
    %343 = tpu.matmul %303, %10, %cst_68 {dimension_numbers = #tpu.dot_dimension_numbers<[1], [0], [0], [1], [0, 0, 1, 1], [], []>} : vector<8x128xf32>, vector<128x384xf32>, vector<8x384xf32> -> vector<8x384xf32>
    %344 = vector.extract_strided_slice %3 {offsets = [2, 0], sizes = [1, 384], strides = [1, 1]} : vector<16x384xf32> to vector<1x384xf32>
    %345 = vector.broadcast %344 : vector<1x384xf32> to vector<8x384xf32>
    %346 = arith.addf %343, %345 : vector<8x384xf32>
    %347 = vector.extract_strided_slice %3 {offsets = [3, 0], sizes = [1, 128], strides = [1, 1]} : vector<16x384xf32> to vector<1x128xf32>
    %348 = vector.shape_cast %347 : vector<1x128xf32> to vector<1x128xf32>
    %349 = vector.broadcast %348 : vector<1x128xf32> to vector<8x128xf32>
    %cst_69 = arith.constant 0.000000e+00 : f32
    %350 = vector.broadcast %cst_69 : f32 to vector<8x128xf32>
    %cst_70 = arith.constant dense<0.000000e+00> : vector<8x384xf32>
    %351 = tpu.matmul %350, %12, %cst_70 {dimension_numbers = #tpu.dot_dimension_numbers<[1], [0], [0], [1], [0, 0, 1, 1], [], []>} : vector<8x128xf32>, vector<128x384xf32>, vector<8x384xf32> -> vector<8x384xf32>
    %352 = vector.extract_strided_slice %346 {offsets = [0, 0], sizes = [8, 128], strides = [1, 1]} : vector<8x384xf32> to vector<8x128xf32>
    %353 = vector.extract_strided_slice %351 {offsets = [0, 0], sizes = [8, 128], strides = [1, 1]} : vector<8x384xf32> to vector<8x128xf32>
    %354 = arith.addf %352, %353 : vector<8x128xf32>
    %355 = arith.negf %354 : vector<8x128xf32>
    %356 = math.exp %355 : vector<8x128xf32>
    %cst_71 = arith.constant 1.000000e+00 : f32
    %357 = vector.broadcast %cst_71 : f32 to vector<8x128xf32>
    %358 = arith.addf %357, %356 : vector<8x128xf32>
    %359 = arith.divf %357, %358 : vector<8x128xf32>
    %360 = vector.extract_strided_slice %346 {offsets = [0, 128], sizes = [8, 128], strides = [1, 1]} : vector<8x384xf32> to vector<8x128xf32>
    %361 = vector.extract_strided_slice %351 {offsets = [0, 128], sizes = [8, 128], strides = [1, 1]} : vector<8x384xf32> to vector<8x128xf32>
    %362 = arith.addf %360, %361 : vector<8x128xf32>
    %363 = arith.negf %362 : vector<8x128xf32>
    %364 = math.exp %363 : vector<8x128xf32>
    %cst_72 = arith.constant 1.000000e+00 : f32
    %365 = vector.broadcast %cst_72 : f32 to vector<8x128xf32>
    %366 = arith.addf %365, %364 : vector<8x128xf32>
    %367 = arith.divf %365, %366 : vector<8x128xf32>
    %368 = vector.extract_strided_slice %346 {offsets = [0, 256], sizes = [8, 128], strides = [1, 1]} : vector<8x384xf32> to vector<8x128xf32>
    %369 = vector.extract_strided_slice %351 {offsets = [0, 256], sizes = [8, 128], strides = [1, 1]} : vector<8x384xf32> to vector<8x128xf32>
    %370 = arith.addf %369, %349 : vector<8x128xf32>
    %371 = arith.mulf %359, %370 : vector<8x128xf32>
    %372 = arith.addf %368, %371 : vector<8x128xf32>
    %373 = math.tanh %372 : vector<8x128xf32>
    %cst_73 = arith.constant 1.000000e+00 : f32
    %374 = vector.broadcast %cst_73 : f32 to vector<8x128xf32>
    %375 = arith.subf %374, %367 : vector<8x128xf32>
    %376 = arith.mulf %375, %373 : vector<8x128xf32>
    %377 = arith.mulf %367, %350 : vector<8x128xf32>
    %378 = arith.addf %376, %377 : vector<8x128xf32>
    %cst_74 = arith.constant dense<0.000000e+00> : vector<8x384xf32>
    %379 = tpu.matmul %378, %12, %cst_74 {dimension_numbers = #tpu.dot_dimension_numbers<[1], [0], [0], [1], [0, 0, 1, 1], [], []>} : vector<8x128xf32>, vector<128x384xf32>, vector<8x384xf32> -> vector<8x384xf32>
    %380 = vector.extract_strided_slice %346 {offsets = [0, 0], sizes = [8, 128], strides = [1, 1]} : vector<8x384xf32> to vector<8x128xf32>
    %381 = vector.extract_strided_slice %379 {offsets = [0, 0], sizes = [8, 128], strides = [1, 1]} : vector<8x384xf32> to vector<8x128xf32>
    %382 = arith.addf %380, %381 : vector<8x128xf32>
    %383 = arith.negf %382 : vector<8x128xf32>
    %384 = math.exp %383 : vector<8x128xf32>
    %cst_75 = arith.constant 1.000000e+00 : f32
    %385 = vector.broadcast %cst_75 : f32 to vector<8x128xf32>
    %386 = arith.addf %385, %384 : vector<8x128xf32>
    %387 = arith.divf %385, %386 : vector<8x128xf32>
    %388 = vector.extract_strided_slice %346 {offsets = [0, 128], sizes = [8, 128], strides = [1, 1]} : vector<8x384xf32> to vector<8x128xf32>
    %389 = vector.extract_strided_slice %379 {offsets = [0, 128], sizes = [8, 128], strides = [1, 1]} : vector<8x384xf32> to vector<8x128xf32>
    %390 = arith.addf %388, %389 : vector<8x128xf32>
    %391 = arith.negf %390 : vector<8x128xf32>
    %392 = math.exp %391 : vector<8x128xf32>
    %cst_76 = arith.constant 1.000000e+00 : f32
    %393 = vector.broadcast %cst_76 : f32 to vector<8x128xf32>
    %394 = arith.addf %393, %392 : vector<8x128xf32>
    %395 = arith.divf %393, %394 : vector<8x128xf32>
    %396 = vector.extract_strided_slice %346 {offsets = [0, 256], sizes = [8, 128], strides = [1, 1]} : vector<8x384xf32> to vector<8x128xf32>
    %397 = vector.extract_strided_slice %379 {offsets = [0, 256], sizes = [8, 128], strides = [1, 1]} : vector<8x384xf32> to vector<8x128xf32>
    %398 = arith.addf %397, %349 : vector<8x128xf32>
    %399 = arith.mulf %387, %398 : vector<8x128xf32>
    %400 = arith.addf %396, %399 : vector<8x128xf32>
    %401 = math.tanh %400 : vector<8x128xf32>
    %cst_77 = arith.constant 1.000000e+00 : f32
    %402 = vector.broadcast %cst_77 : f32 to vector<8x128xf32>
    %403 = arith.subf %402, %395 : vector<8x128xf32>
    %404 = arith.mulf %403, %401 : vector<8x128xf32>
    %405 = arith.mulf %395, %378 : vector<8x128xf32>
    %406 = arith.addf %404, %405 : vector<8x128xf32>
    %cst_78 = arith.constant dense<0.000000e+00> : vector<8x384xf32>
    %407 = tpu.matmul %406, %12, %cst_78 {dimension_numbers = #tpu.dot_dimension_numbers<[1], [0], [0], [1], [0, 0, 1, 1], [], []>} : vector<8x128xf32>, vector<128x384xf32>, vector<8x384xf32> -> vector<8x384xf32>
    %408 = vector.extract_strided_slice %346 {offsets = [0, 0], sizes = [8, 128], strides = [1, 1]} : vector<8x384xf32> to vector<8x128xf32>
    %409 = vector.extract_strided_slice %407 {offsets = [0, 0], sizes = [8, 128], strides = [1, 1]} : vector<8x384xf32> to vector<8x128xf32>
    %410 = arith.addf %408, %409 : vector<8x128xf32>
    %411 = arith.negf %410 : vector<8x128xf32>
    %412 = math.exp %411 : vector<8x128xf32>
    %cst_79 = arith.constant 1.000000e+00 : f32
    %413 = vector.broadcast %cst_79 : f32 to vector<8x128xf32>
    %414 = arith.addf %413, %412 : vector<8x128xf32>
    %415 = arith.divf %413, %414 : vector<8x128xf32>
    %416 = vector.extract_strided_slice %346 {offsets = [0, 128], sizes = [8, 128], strides = [1, 1]} : vector<8x384xf32> to vector<8x128xf32>
    %417 = vector.extract_strided_slice %407 {offsets = [0, 128], sizes = [8, 128], strides = [1, 1]} : vector<8x384xf32> to vector<8x128xf32>
    %418 = arith.addf %416, %417 : vector<8x128xf32>
    %419 = arith.negf %418 : vector<8x128xf32>
    %420 = math.exp %419 : vector<8x128xf32>
    %cst_80 = arith.constant 1.000000e+00 : f32
    %421 = vector.broadcast %cst_80 : f32 to vector<8x128xf32>
    %422 = arith.addf %421, %420 : vector<8x128xf32>
    %423 = arith.divf %421, %422 : vector<8x128xf32>
    %424 = vector.extract_strided_slice %346 {offsets = [0, 256], sizes = [8, 128], strides = [1, 1]} : vector<8x384xf32> to vector<8x128xf32>
    %425 = vector.extract_strided_slice %407 {offsets = [0, 256], sizes = [8, 128], strides = [1, 1]} : vector<8x384xf32> to vector<8x128xf32>
    %426 = arith.addf %425, %349 : vector<8x128xf32>
    %427 = arith.mulf %415, %426 : vector<8x128xf32>
    %428 = arith.addf %424, %427 : vector<8x128xf32>
    %429 = math.tanh %428 : vector<8x128xf32>
    %cst_81 = arith.constant 1.000000e+00 : f32
    %430 = vector.broadcast %cst_81 : f32 to vector<8x128xf32>
    %431 = arith.subf %430, %423 : vector<8x128xf32>
    %432 = arith.mulf %431, %429 : vector<8x128xf32>
    %433 = arith.mulf %423, %406 : vector<8x128xf32>
    %434 = arith.addf %432, %433 : vector<8x128xf32>
    %cst_82 = arith.constant dense<0.000000e+00> : vector<8x384xf32>
    %435 = tpu.matmul %434, %12, %cst_82 {dimension_numbers = #tpu.dot_dimension_numbers<[1], [0], [0], [1], [0, 0, 1, 1], [], []>} : vector<8x128xf32>, vector<128x384xf32>, vector<8x384xf32> -> vector<8x384xf32>
    %436 = vector.extract_strided_slice %346 {offsets = [0, 0], sizes = [8, 128], strides = [1, 1]} : vector<8x384xf32> to vector<8x128xf32>
    %437 = vector.extract_strided_slice %435 {offsets = [0, 0], sizes = [8, 128], strides = [1, 1]} : vector<8x384xf32> to vector<8x128xf32>
    %438 = arith.addf %436, %437 : vector<8x128xf32>
    %439 = arith.negf %438 : vector<8x128xf32>
    %440 = math.exp %439 : vector<8x128xf32>
    %cst_83 = arith.constant 1.000000e+00 : f32
    %441 = vector.broadcast %cst_83 : f32 to vector<8x128xf32>
    %442 = arith.addf %441, %440 : vector<8x128xf32>
    %443 = arith.divf %441, %442 : vector<8x128xf32>
    %444 = vector.extract_strided_slice %346 {offsets = [0, 128], sizes = [8, 128], strides = [1, 1]} : vector<8x384xf32> to vector<8x128xf32>
    %445 = vector.extract_strided_slice %435 {offsets = [0, 128], sizes = [8, 128], strides = [1, 1]} : vector<8x384xf32> to vector<8x128xf32>
    %446 = arith.addf %444, %445 : vector<8x128xf32>
    %447 = arith.negf %446 : vector<8x128xf32>
    %448 = math.exp %447 : vector<8x128xf32>
    %cst_84 = arith.constant 1.000000e+00 : f32
    %449 = vector.broadcast %cst_84 : f32 to vector<8x128xf32>
    %450 = arith.addf %449, %448 : vector<8x128xf32>
    %451 = arith.divf %449, %450 : vector<8x128xf32>
    %452 = vector.extract_strided_slice %346 {offsets = [0, 256], sizes = [8, 128], strides = [1, 1]} : vector<8x384xf32> to vector<8x128xf32>
    %453 = vector.extract_strided_slice %435 {offsets = [0, 256], sizes = [8, 128], strides = [1, 1]} : vector<8x384xf32> to vector<8x128xf32>
    %454 = arith.addf %453, %349 : vector<8x128xf32>
    %455 = arith.mulf %443, %454 : vector<8x128xf32>
    %456 = arith.addf %452, %455 : vector<8x128xf32>
    %457 = math.tanh %456 : vector<8x128xf32>
    %cst_85 = arith.constant 1.000000e+00 : f32
    %458 = vector.broadcast %cst_85 : f32 to vector<8x128xf32>
    %459 = arith.subf %458, %451 : vector<8x128xf32>
    %460 = arith.mulf %459, %457 : vector<8x128xf32>
    %461 = arith.mulf %451, %434 : vector<8x128xf32>
    %462 = arith.addf %460, %461 : vector<8x128xf32>
    %cst_86 = arith.constant dense<0.000000e+00> : vector<8x384xf32>
    %463 = tpu.matmul %462, %12, %cst_86 {dimension_numbers = #tpu.dot_dimension_numbers<[1], [0], [0], [1], [0, 0, 1, 1], [], []>} : vector<8x128xf32>, vector<128x384xf32>, vector<8x384xf32> -> vector<8x384xf32>
    %464 = vector.extract_strided_slice %346 {offsets = [0, 0], sizes = [8, 128], strides = [1, 1]} : vector<8x384xf32> to vector<8x128xf32>
    %465 = vector.extract_strided_slice %463 {offsets = [0, 0], sizes = [8, 128], strides = [1, 1]} : vector<8x384xf32> to vector<8x128xf32>
    %466 = arith.addf %464, %465 : vector<8x128xf32>
    %467 = arith.negf %466 : vector<8x128xf32>
    %468 = math.exp %467 : vector<8x128xf32>
    %cst_87 = arith.constant 1.000000e+00 : f32
    %469 = vector.broadcast %cst_87 : f32 to vector<8x128xf32>
    %470 = arith.addf %469, %468 : vector<8x128xf32>
    %471 = arith.divf %469, %470 : vector<8x128xf32>
    %472 = vector.extract_strided_slice %346 {offsets = [0, 128], sizes = [8, 128], strides = [1, 1]} : vector<8x384xf32> to vector<8x128xf32>
    %473 = vector.extract_strided_slice %463 {offsets = [0, 128], sizes = [8, 128], strides = [1, 1]} : vector<8x384xf32> to vector<8x128xf32>
    %474 = arith.addf %472, %473 : vector<8x128xf32>
    %475 = arith.negf %474 : vector<8x128xf32>
    %476 = math.exp %475 : vector<8x128xf32>
    %cst_88 = arith.constant 1.000000e+00 : f32
    %477 = vector.broadcast %cst_88 : f32 to vector<8x128xf32>
    %478 = arith.addf %477, %476 : vector<8x128xf32>
    %479 = arith.divf %477, %478 : vector<8x128xf32>
    %480 = vector.extract_strided_slice %346 {offsets = [0, 256], sizes = [8, 128], strides = [1, 1]} : vector<8x384xf32> to vector<8x128xf32>
    %481 = vector.extract_strided_slice %463 {offsets = [0, 256], sizes = [8, 128], strides = [1, 1]} : vector<8x384xf32> to vector<8x128xf32>
    %482 = arith.addf %481, %349 : vector<8x128xf32>
    %483 = arith.mulf %471, %482 : vector<8x128xf32>
    %484 = arith.addf %480, %483 : vector<8x128xf32>
    %485 = math.tanh %484 : vector<8x128xf32>
    %cst_89 = arith.constant 1.000000e+00 : f32
    %486 = vector.broadcast %cst_89 : f32 to vector<8x128xf32>
    %487 = arith.subf %486, %479 : vector<8x128xf32>
    %488 = arith.mulf %487, %485 : vector<8x128xf32>
    %489 = arith.mulf %479, %462 : vector<8x128xf32>
    %490 = arith.addf %488, %489 : vector<8x128xf32>
    %cst_90 = arith.constant dense<0.000000e+00> : vector<8x384xf32>
    %491 = tpu.matmul %490, %12, %cst_90 {dimension_numbers = #tpu.dot_dimension_numbers<[1], [0], [0], [1], [0, 0, 1, 1], [], []>} : vector<8x128xf32>, vector<128x384xf32>, vector<8x384xf32> -> vector<8x384xf32>
    %492 = vector.extract_strided_slice %346 {offsets = [0, 0], sizes = [8, 128], strides = [1, 1]} : vector<8x384xf32> to vector<8x128xf32>
    %493 = vector.extract_strided_slice %491 {offsets = [0, 0], sizes = [8, 128], strides = [1, 1]} : vector<8x384xf32> to vector<8x128xf32>
    %494 = arith.addf %492, %493 : vector<8x128xf32>
    %495 = arith.negf %494 : vector<8x128xf32>
    %496 = math.exp %495 : vector<8x128xf32>
    %cst_91 = arith.constant 1.000000e+00 : f32
    %497 = vector.broadcast %cst_91 : f32 to vector<8x128xf32>
    %498 = arith.addf %497, %496 : vector<8x128xf32>
    %499 = arith.divf %497, %498 : vector<8x128xf32>
    %500 = vector.extract_strided_slice %346 {offsets = [0, 128], sizes = [8, 128], strides = [1, 1]} : vector<8x384xf32> to vector<8x128xf32>
    %501 = vector.extract_strided_slice %491 {offsets = [0, 128], sizes = [8, 128], strides = [1, 1]} : vector<8x384xf32> to vector<8x128xf32>
    %502 = arith.addf %500, %501 : vector<8x128xf32>
    %503 = arith.negf %502 : vector<8x128xf32>
    %504 = math.exp %503 : vector<8x128xf32>
    %cst_92 = arith.constant 1.000000e+00 : f32
    %505 = vector.broadcast %cst_92 : f32 to vector<8x128xf32>
    %506 = arith.addf %505, %504 : vector<8x128xf32>
    %507 = arith.divf %505, %506 : vector<8x128xf32>
    %508 = vector.extract_strided_slice %346 {offsets = [0, 256], sizes = [8, 128], strides = [1, 1]} : vector<8x384xf32> to vector<8x128xf32>
    %509 = vector.extract_strided_slice %491 {offsets = [0, 256], sizes = [8, 128], strides = [1, 1]} : vector<8x384xf32> to vector<8x128xf32>
    %510 = arith.addf %509, %349 : vector<8x128xf32>
    %511 = arith.mulf %499, %510 : vector<8x128xf32>
    %512 = arith.addf %508, %511 : vector<8x128xf32>
    %513 = math.tanh %512 : vector<8x128xf32>
    %cst_93 = arith.constant 1.000000e+00 : f32
    %514 = vector.broadcast %cst_93 : f32 to vector<8x128xf32>
    %515 = arith.subf %514, %507 : vector<8x128xf32>
    %516 = arith.mulf %515, %513 : vector<8x128xf32>
    %517 = arith.mulf %507, %490 : vector<8x128xf32>
    %518 = arith.addf %516, %517 : vector<8x128xf32>
    %cst_94 = arith.constant dense<0.000000e+00> : vector<8x384xf32>
    %519 = tpu.matmul %518, %12, %cst_94 {dimension_numbers = #tpu.dot_dimension_numbers<[1], [0], [0], [1], [0, 0, 1, 1], [], []>} : vector<8x128xf32>, vector<128x384xf32>, vector<8x384xf32> -> vector<8x384xf32>
    %520 = vector.extract_strided_slice %346 {offsets = [0, 0], sizes = [8, 128], strides = [1, 1]} : vector<8x384xf32> to vector<8x128xf32>
    %521 = vector.extract_strided_slice %519 {offsets = [0, 0], sizes = [8, 128], strides = [1, 1]} : vector<8x384xf32> to vector<8x128xf32>
    %522 = arith.addf %520, %521 : vector<8x128xf32>
    %523 = arith.negf %522 : vector<8x128xf32>
    %524 = math.exp %523 : vector<8x128xf32>
    %cst_95 = arith.constant 1.000000e+00 : f32
    %525 = vector.broadcast %cst_95 : f32 to vector<8x128xf32>
    %526 = arith.addf %525, %524 : vector<8x128xf32>
    %527 = arith.divf %525, %526 : vector<8x128xf32>
    %528 = vector.extract_strided_slice %346 {offsets = [0, 128], sizes = [8, 128], strides = [1, 1]} : vector<8x384xf32> to vector<8x128xf32>
    %529 = vector.extract_strided_slice %519 {offsets = [0, 128], sizes = [8, 128], strides = [1, 1]} : vector<8x384xf32> to vector<8x128xf32>
    %530 = arith.addf %528, %529 : vector<8x128xf32>
    %531 = arith.negf %530 : vector<8x128xf32>
    %532 = math.exp %531 : vector<8x128xf32>
    %cst_96 = arith.constant 1.000000e+00 : f32
    %533 = vector.broadcast %cst_96 : f32 to vector<8x128xf32>
    %534 = arith.addf %533, %532 : vector<8x128xf32>
    %535 = arith.divf %533, %534 : vector<8x128xf32>
    %536 = vector.extract_strided_slice %346 {offsets = [0, 256], sizes = [8, 128], strides = [1, 1]} : vector<8x384xf32> to vector<8x128xf32>
    %537 = vector.extract_strided_slice %519 {offsets = [0, 256], sizes = [8, 128], strides = [1, 1]} : vector<8x384xf32> to vector<8x128xf32>
    %538 = arith.addf %537, %349 : vector<8x128xf32>
    %539 = arith.mulf %527, %538 : vector<8x128xf32>
    %540 = arith.addf %536, %539 : vector<8x128xf32>
    %541 = math.tanh %540 : vector<8x128xf32>
    %cst_97 = arith.constant 1.000000e+00 : f32
    %542 = vector.broadcast %cst_97 : f32 to vector<8x128xf32>
    %543 = arith.subf %542, %535 : vector<8x128xf32>
    %544 = arith.mulf %543, %541 : vector<8x128xf32>
    %545 = arith.mulf %535, %518 : vector<8x128xf32>
    %546 = arith.addf %544, %545 : vector<8x128xf32>
    %cst_98 = arith.constant dense<0.000000e+00> : vector<8x384xf32>
    %547 = tpu.matmul %546, %12, %cst_98 {dimension_numbers = #tpu.dot_dimension_numbers<[1], [0], [0], [1], [0, 0, 1, 1], [], []>} : vector<8x128xf32>, vector<128x384xf32>, vector<8x384xf32> -> vector<8x384xf32>
    %548 = vector.extract_strided_slice %346 {offsets = [0, 0], sizes = [8, 128], strides = [1, 1]} : vector<8x384xf32> to vector<8x128xf32>
    %549 = vector.extract_strided_slice %547 {offsets = [0, 0], sizes = [8, 128], strides = [1, 1]} : vector<8x384xf32> to vector<8x128xf32>
    %550 = arith.addf %548, %549 : vector<8x128xf32>
    %551 = arith.negf %550 : vector<8x128xf32>
    %552 = math.exp %551 : vector<8x128xf32>
    %cst_99 = arith.constant 1.000000e+00 : f32
    %553 = vector.broadcast %cst_99 : f32 to vector<8x128xf32>
    %554 = arith.addf %553, %552 : vector<8x128xf32>
    %555 = arith.divf %553, %554 : vector<8x128xf32>
    %556 = vector.extract_strided_slice %346 {offsets = [0, 128], sizes = [8, 128], strides = [1, 1]} : vector<8x384xf32> to vector<8x128xf32>
    %557 = vector.extract_strided_slice %547 {offsets = [0, 128], sizes = [8, 128], strides = [1, 1]} : vector<8x384xf32> to vector<8x128xf32>
    %558 = arith.addf %556, %557 : vector<8x128xf32>
    %559 = arith.negf %558 : vector<8x128xf32>
    %560 = math.exp %559 : vector<8x128xf32>
    %cst_100 = arith.constant 1.000000e+00 : f32
    %561 = vector.broadcast %cst_100 : f32 to vector<8x128xf32>
    %562 = arith.addf %561, %560 : vector<8x128xf32>
    %563 = arith.divf %561, %562 : vector<8x128xf32>
    %564 = vector.extract_strided_slice %346 {offsets = [0, 256], sizes = [8, 128], strides = [1, 1]} : vector<8x384xf32> to vector<8x128xf32>
    %565 = vector.extract_strided_slice %547 {offsets = [0, 256], sizes = [8, 128], strides = [1, 1]} : vector<8x384xf32> to vector<8x128xf32>
    %566 = arith.addf %565, %349 : vector<8x128xf32>
    %567 = arith.mulf %555, %566 : vector<8x128xf32>
    %568 = arith.addf %564, %567 : vector<8x128xf32>
    %569 = math.tanh %568 : vector<8x128xf32>
    %cst_101 = arith.constant 1.000000e+00 : f32
    %570 = vector.broadcast %cst_101 : f32 to vector<8x128xf32>
    %571 = arith.subf %570, %563 : vector<8x128xf32>
    %572 = arith.mulf %571, %569 : vector<8x128xf32>
    %573 = arith.mulf %563, %546 : vector<8x128xf32>
    %574 = arith.addf %572, %573 : vector<8x128xf32>
    %575 = tpu.concatenate %378, %406, %434, %462, %490, %518, %546, %574 in 0 : vector<8x128xf32>, vector<8x128xf32>, vector<8x128xf32>, vector<8x128xf32>, vector<8x128xf32>, vector<8x128xf32>, vector<8x128xf32>, vector<8x128xf32> -> vector<64x128xf32>
    %576 = vector.extract_strided_slice %4 {offsets = [1, 0, 0], sizes = [1, 128, 128], strides = [1, 1, 1]} : vector<4x128x128xf32> to vector<1x128x128xf32>
    %577 = vector.shape_cast %576 : vector<1x128x128xf32> to vector<128x128xf32>
    %cst_102 = arith.constant dense<0.000000e+00> : vector<64x128xf32>
    %578 = tpu.matmul %575, %577, %cst_102 {dimension_numbers = #tpu.dot_dimension_numbers<[1], [0], [0], [1], [0, 0, 1, 1], [], []>} : vector<64x128xf32>, vector<128x128xf32>, vector<64x128xf32> -> vector<64x128xf32>
    %579 = vector.extract_strided_slice %3 {offsets = [5, 0], sizes = [1, 128], strides = [1, 1]} : vector<16x384xf32> to vector<1x128xf32>
    %580 = vector.broadcast %579 : vector<1x128xf32> to vector<64x128xf32>
    %581 = arith.addf %578, %580 : vector<64x128xf32>
    %cst_103 = arith.constant 0.000000e+00 : f32
    %582 = vector.broadcast %cst_103 : f32 to vector<64x128xf32>
    %583 = arith.cmpf ogt, %581, %582 : vector<64x128xf32>
    %cst_104 = arith.constant 0.00999999977 : f32
    %584 = vector.broadcast %cst_104 : f32 to vector<64x128xf32>
    %585 = arith.mulf %584, %581 : vector<64x128xf32>
    %586 = arith.select %583, %581, %585 : vector<64x128xi1>, vector<64x128xf32>
    %c0_105 = arith.constant 0 : index
    %c0_106 = arith.constant 0 : index
    %587 = vector.load %arg5[%c0_105, %c0_106] : memref<64x128xf32, #tpu.memory_space<vmem>>, vector<64x128xf32>
    tpu.vector_store %arg5[%c0_105, %c0_106], %586 {strides = array<i32>} : memref<64x128xf32, #tpu.memory_space<vmem>>, vector<64x128xf32>,
    return
  }
}

</mosaic_0001>

<bundles_post_ra>
// kernel: rnn_autoencoder_forward.1
= control target key start
LH: loop header
LB: loop body
LE: loop exit
PB: predicated region body
PF: predicated region fallthrough
CT: control target
= control target key end

     0   :  { %v5400_v45 = vmov 0.0   ;;  %s5392_s2 = inlined_call_operand.vmem [shape: f32[4,128,384], index: 2, kind: input, shape index: {}]   ;;  %s5393_s0 = inlined_call_operand.vmem [shape: f32[64,128], index: 0, kind: input, shape index: {}]   ;;  %s5394_s3 = inlined_call_operand.vmem [shape: f32[16,384], index: 3, kind: input, shape index: {}]   ;;  %s5395_s1 = inlined_call_operand.vmem [shape: f32[8,8,128], index: 1, kind: input, shape index: {}]   ;;  %s5396_s4 = inlined_call_operand.vmem [shape: f32[4,128,128], index: 4, kind: input, shape index: {}]   ;;  %s5397_s6 = inlined_call_operand.vmem [shape: f32[8,128], index: 6, kind: output, shape index: {1}]   ;;  %s5398_s7 = inlined_call_operand.vmem [shape: f32[8,128], index: 7, kind: output, shape index: {2}]   ;;  %s5399_s5 = inlined_call_operand.vmem [shape: f32[64,128], index: 5, kind: output, shape index: {0}]  }
   0x1   :  { %v84_v0 = vld [vmem:[%s5392_s2 + $0x168] sm:$0xff]  ;;  %v81_v2 = vld [vmem:[%s5392_s2 + $0x150] sm:$0xff]  ;;  %v78_v4 = vld [vmem:[%s5392_s2 + $0x138] sm:$0xff] }
   0x2   :  { %v2791_v1 = vld [vmem:[%s5392_s2 + $0x2e8] sm:$0xff]  ;;  %2460 = vmatpush.msra.mxu2 %v84_v0  ;;  %v2800_v3 = vld [vmem:[%s5392_s2 + $0x2d0] sm:$0xff]  ;;  %302 = vmatpush.msra.mxu1 %v84_v0  ;;  %v2808_v5 = vld [vmem:[%s5392_s2 + $0x2b8] sm:$0xff] }
   0x3   :  { %426 = vmatpush.msra.mxu3 %v2791_v1  ;;  %v75_v6 = vld [vmem:[%s5392_s2 + $0x120] sm:$0xff]  ;;  %v72_v8 = vld [vmem:[%s5392_s2 + $0x108] sm:$0xff]  ;;  %v69_v10 = vld [vmem:[%s5392_s2 + $0xf0] sm:$0xff] }
   0x4   :  { %2461 = vmatpush.msra.mxu2 %v81_v2  ;;  %303 = vmatpush.msra.mxu1 %v81_v2  ;;  %v2817_v7 = vld [vmem:[%s5392_s2 + $0x2a0] sm:$0xff]  ;;  %v2826_v9 = vld [vmem:[%s5392_s2 + $0x288] sm:$0xff]  ;;  %v2835_v11 = vld [vmem:[%s5392_s2 + $0x270] sm:$0xff] }
   0x5   :  { %427 = vmatpush.msra.mxu3 %v2800_v3  ;;  %v66_v12 = vld [vmem:[%s5392_s2 + $0xd8] sm:$0xff]  ;;  %v63_v14 = vld [vmem:[%s5392_s2 + $0xc0] sm:$0xff]  ;;  %v60_v17 = vld [vmem:[%s5392_s2 + $0xa8] sm:$0xff] }
   0x6   :  { %2462 = vmatpush.msra.mxu2 %v78_v4  ;;  %304 = vmatpush.msra.mxu1 %v78_v4  ;;  %v2844_v13 = vld [vmem:[%s5392_s2 + $0x258] sm:$0xff]  ;;  %v2853_v15 = vld [vmem:[%s5392_s2 + $0x240] sm:$0xff]  ;;  %v2867_v18 = vld [vmem:[%s5392_s2 + $0x228] sm:$0xff] }
   0x7   :  { %428 = vmatpush.msra.mxu3 %v2808_v5  ;;  %v2859_v16 = vld [vmem:[%s5392_s2 + $0x2f8] sm:$0xff]  ;;  %v2873_v19 = vld [vmem:[%s5392_s2 + $0x2e0] sm:$0xff]  ;;  %v2879_v20 = vld [vmem:[%s5392_s2 + $0x2c8] sm:$0xff] }
   0x8   :  { %2463 = vmatpush.msra.mxu2 %v75_v6  ;;  %305 = vmatpush.msra.mxu1 %v75_v6  ;;  %v57_v21 = vld [vmem:[%s5392_s2 + $0x90] sm:$0xff]  ;;  %v54_v24 = vld [vmem:[%s5392_s2 + $0x78] sm:$0xff]  ;;  %v51_v27 = vld [vmem:[%s5392_s2 + $0x60] sm:$0xff] }
   0x9   :  { %429 = vmatpush.msra.mxu3 %v2817_v7  ;;  %466 = vmatpush.msra.mxu0 %v2859_v16  ;;  %v2887_v22 = vld [vmem:[%s5392_s2 + $0x210] sm:$0xff]  ;;  %v2902_v25 = vld [vmem:[%s5392_s2 + $0x1f8] sm:$0xff]  ;;  %v2917_v28 = vld [vmem:[%s5392_s2 + $0x1e0] sm:$0xff] }
   0xa   :  { %2464 = vmatpush.msra.mxu2 %v72_v8  ;;  %306 = vmatpush.msra.mxu1 %v72_v8  ;;  %v2894_v23 = vld [vmem:[%s5392_s2 + $0x2b0] sm:$0xff]  ;;  %v2909_v26 = vld [vmem:[%s5392_s2 + $0x298] sm:$0xff]  ;;  %v2924_v29 = vld [vmem:[%s5392_s2 + $0x280] sm:$0xff] }
   0xb   :  { %430 = vmatpush.msra.mxu3 %v2826_v9  ;;  %467 = vmatpush.msra.mxu0 %v2873_v19  ;;  %v48_v30 = vld [vmem:[%s5392_s2 + $0x48] sm:$0xff]  ;;  %v45_v33 = vld [vmem:[%s5392_s2 + $0x30] sm:$0xff]  ;;  %v42_v36 = vld [vmem:[%s5392_s2 + $0x18] sm:$0xff] }
   0xc   :  { %2465 = vmatpush.msra.mxu2 %v69_v10  ;;  %307 = vmatpush.msra.mxu1 %v69_v10  ;;  %v2932_v31 = vld [vmem:[%s5392_s2 + $0x1c8] sm:$0xff]  ;;  %v2947_v34 = vld [vmem:[%s5392_s2 + $0x1b0] sm:$0xff]  ;;  %v2962_v37 = vld [vmem:[%s5392_s2 + $0x198] sm:$0xff] }
   0xd   :  { %431 = vmatpush.msra.mxu3 %v2835_v11  ;;  %468 = vmatpush.msra.mxu0 %v2879_v20  ;;  %v2939_v32 = vld [vmem:[%s5392_s2 + $0x268] sm:$0xff]  ;;  %v2954_v35 = vld [vmem:[%s5392_s2 + $0x250] sm:$0xff]  ;;  %5446 = vst [vmem:[#allocation2_spill] sm:$0xff] %v2962_v37  ;;  %v2969_v38 = vld [vmem:[%s5392_s2 + $0x238] sm:$0xff] }
   0xe   :  { %2466 = vmatpush.msra.mxu2 %v66_v12  ;;  %308 = vmatpush.msra.mxu1 %v66_v12  ;;  %v39_v39 = vld [vmem:[%s5392_s2] sm:$0xff]  ;;  %v2989_v42 = vld [vmem:[%s5392_s2 + $0x2f0] sm:$0xff]  ;;  %v86_v43 = vld [vmem:[%s5392_s2 + $0x178] sm:$0xff] }
   0xf   :  { %432 = vmatpush.msra.mxu3 %v2844_v13  ;;  %469 = vmatpush.msra.mxu0 %v2894_v23  ;;  %v2977_v40 = vld [vmem:[%s5392_s2 + $0x180] sm:$0xff]  ;;  %v3006_v46 = vld [vmem:[%s5392_s2 + $0x2d8] sm:$0xff]  ;;  %v85_v48 = vld [vmem:[%s5392_s2 + $0x170] sm:$0xff] }
  0x10   :  { %2467 = vmatpush.msra.mxu2 %v63_v14  ;;  %309 = vmatpush.msra.mxu1 %v63_v14  ;;  %5447 = vst [vmem:[#allocation3_spill] sm:$0xff] %v2977_v40  ;;  %v2984_v41 = vld [vmem:[%s5393_s0 + $0x20] sm:$0xff]  ;;  %v3029_v51 = vld [vmem:[%s5392_s2 + $0x208] sm:$0xff]  ;;  %v82_v52 = vld [vmem:[%s5392_s2 + $0x158] sm:$0xff] }
  0x11   :  { %433 = vmatpush.msra.mxu3 %v2853_v15  ;;  %470 = vmatpush.msra.mxu0 %v2909_v26  ;;  %v2999_v44 = vld [vmem:[%s5392_s2 + $0x220] sm:$0xff]  ;;  %v80_v53 = vld [vmem:[%s5392_s2 + $0x148] sm:$0xff]  ;;  %v3047_v55 = vld [vmem:[%s5392_s2 + $0x1f0] sm:$0xff] }
  0x12   :  { %2468 = vmatpush.msra.mxu2 %v60_v17  ;;  %310 = vmatpush.msra.mxu1 %v60_v17  ;;  %v3011_v47 = vld [vmem:[%s5393_s0] sm:$0xff]  ;;  %v3042_v54 = vld [vmem:[%s5392_s2 + $0x2a8] sm:$0xff]  ;;  %v77_v57 = vld [vmem:[%s5392_s2 + $0x130] sm:$0xff] }
  0x13   :  { %434 = vmatpush.msra.mxu3 %v2867_v18  ;;  %471 = vmatpush.msra.mxu0 %v2924_v29  ;;  %v83_v49 = vld [vmem:[%s5392_s2 + $0x160] sm:$0xff]  ;;  %v3060_v58 = vld [vmem:[%s5393_s0 + $0x28] sm:$0xff]  ;;  %v3065_v59 = vld [vmem:[%s5392_s2 + $0x290] sm:$0xff] }
  0x14   :  { %2469 = vmatpush.msra.mxu2 %v57_v21  ;;  %311 = vmatpush.msra.mxu1 %v57_v21  ;;  %v3023_v50 = vld [vmem:[%s5392_s2 + $0x2c0] sm:$0xff]  ;;  %v76_v60 = vld [vmem:[%s5392_s2 + $0x128] sm:$0xff]  ;;  %v74_v61 = vld [vmem:[%s5392_s2 + $0x118] sm:$0xff] }
  0x15   :  { %435 = vmatpush.msra.mxu3 %v2887_v22  ;;  %472 = vmatpush.msra.mxu0 %v2939_v32  ;;  %v79_v56 = vld [vmem:[%s5392_s2 + $0x140] sm:$0xff]  ;;  %v3078_v62 = vld [vmem:[%s5392_s2 + $0x278] sm:$0xff]  ;;  %v3083_v63 = vld [vmem:[%s5393_s0 + $0x8] sm:$0xff] }
  0x16   :  { %2470 = vmatpush.msra.mxu2 %v54_v24  ;;  %312 = vmatpush.msra.mxu1 %v54_v24  ;;  %v73_v0 = vld [vmem:[%s5392_s2 + $0x110] sm:$0xff]  ;;  %v71_v2 = vld [vmem:[%s5392_s2 + $0x100] sm:$0xff]  ;;  %v3101_v6 = vld [vmem:[%s5392_s2 + $0x1d8] sm:$0xff] }
  0x17   :  { %436 = vmatpush.msra.mxu3 %v2902_v25  ;;  %473 = vmatpush.msra.mxu0 %v2954_v35  ;;  %v3096_v4 = vld [vmem:[%s5392_s2 + $0x260] sm:$0xff]  ;;  %v70_v8 = vld [vmem:[%s5392_s2 + $0xf8] sm:$0xff]  ;;  %v68_v10 = vld [vmem:[%s5392_s2 + $0xe8] sm:$0xff] }
  0x18   :  { %2471 = vmatpush.msra.mxu2 %v51_v27  ;;  %313 = vmatpush.msra.mxu1 %v51_v27  ;;  %v3114_v12 = vld [vmem:[%s5392_s2 + $0x248] sm:$0xff]  ;;  %v3119_v14 = vld [vmem:[%s5392_s2 + $0x1c0] sm:$0xff]  ;;  %v65_v21 = vld [vmem:[%s5392_s2 + $0xd0] sm:$0xff] }
  0x19   :  { %437 = vmatpush.msra.mxu3 %v2917_v28  ;;  %474 = vmatpush.msra.mxu0 %v2969_v38  ;;  %v67_v17 = vld [vmem:[%s5392_s2 + $0xe0] sm:$0xff]  ;;  %v3132_v24 = vld [vmem:[%s5393_s0 + $0x30] sm:$0xff] }
  0x1a   :  { %2472 = vmatpush.msra.mxu2 %v48_v30  ;;  %314 = vmatpush.msra.mxu1 %v48_v30  ;;  %v3137_v27 = vld [vmem:[%s5392_s2 + $0x230] sm:$0xff]  ;;  %v64_v30 = vld [vmem:[%s5392_s2 + $0xc8] sm:$0xff] }
  0x1b   :  { %438 = vmatpush.msra.mxu3 %v2932_v31  ;;  %475 = vmatpush.msra.mxu0 %v2999_v44 }
  0x1c   :  { %2473 = vmatpush.msra.mxu2 %v45_v33  ;;  %315 = vmatpush.msra.mxu1 %v45_v33  ;;  %v62_v33 = vld [vmem:[%s5392_s2 + $0xb8] sm:$0xff] }
  0x1d   :  { %439 = vmatpush.msra.mxu3 %v2947_v34  ;;  %476 = vmatpush.msra.mxu0 %v3029_v51 }
  0x1e   :  { %2474 = vmatpush.msra.mxu2 %v42_v36  ;;  %316 = vmatpush.msra.mxu1 %v42_v36  ;;  %v3150_v36 = vld [vmem:[%s5392_s2 + $0x218] sm:$0xff] }
  0x1f   :  { %440 = vmatpush.msra.mxu3 %v2962_v37  ;;  %477 = vmatpush.msra.mxu0 %v3047_v55 }
  0x20   :  { %2475 = vmatpush.msra.mxu2 %v39_v39  ;;  %317 = vmatpush.msra.mxu1 %v39_v39  ;;  %v3155_v39 = vld [vmem:[%s5393_s0 + $0x10] sm:$0xff] }
  0x21   :  { %441 = vmatpush.msra.mxu3 %v2977_v40  ;;  %330 = vmatmul.f32.vlgmr.msra.gmra.mxu2 %v2984_v41 }
  0x22   :  { %442 = vmatmul.f32.vlgmr.msra.gmra.mxu3 %v5400_v45  ;;  %384 = vmatpush.msrb.mxu2 %v86_v43  ;;  %v61_v43 = vld [vmem:[%s5392_s2 + $0xb0] sm:$0xff] }
  0x23   :  { %446 = vmatpush.msrb.mxu3 %v2989_v42  ;;  %318 = vmatmul.f32.vlgmr.msra.gmra.mxu1 %v3011_v47 }
  0x24   :  { %343 = vmatpush.msrb.mxu1 %v85_v48  ;;  %385 = vmatpush.msrb.mxu2 %v83_v49  ;;  %v59_v48 = vld [vmem:[%s5392_s2 + $0xa0] sm:$0xff] }
  0x25   :  { %447 = vmatpush.msrb.mxu3 %v3006_v46  ;;  %478 = vmatpush.msra.mxu0 %v3101_v6  ;;  %v3168_v49 = vld [vmem:[%s5392_s2 + $0x200] sm:$0xff] }
  0x26   :  { %344 = vmatpush.msrb.mxu1 %v82_v52  ;;  %386 = vmatpush.msrb.mxu2 %v80_v53  ;;  %v3173_v52 = vld [vmem:[%s5392_s2 + $0x1a8] sm:$0xff]  ;;  %v58_v53 = vld [vmem:[%s5392_s2 + $0x98] sm:$0xff] }
  0x27   :  { %448 = vmatpush.msrb.mxu3 %v3023_v50  ;;  %479 = vmatpush.msra.mxu0 %v3119_v14  ;;  %5448 = vst [vmem:[#allocation4_spill] sm:$0xff] %v3173_v52 }
  0x28   :  { %345 = vmatpush.msrb.mxu1 %v79_v56  ;;  %387 = vmatpush.msrb.mxu2 %v77_v57  ;;  %v56_v56 = vld [vmem:[%s5392_s2 + $0x88] sm:$0xff] }
  0x29   :  { %449 = vmatpush.msrb.mxu3 %v3042_v54  ;;  %333 = vmatmul.f32.gmra.mxu2 %v3060_v58  ;;  %v3186_v57 = vld [vmem:[%s5392_s2 + $0x1e8] sm:$0xff] }
  0x2a   :  { %346 = vmatpush.msrb.mxu1 %v76_v60  ;;  %388 = vmatpush.msrb.mxu2 %v74_v61  ;;  %v3191_v60 = vld [vmem:[%s5392_s2 + $0x190] sm:$0xff]  ;;  %v55_v61 = vld [vmem:[%s5392_s2 + $0x80] sm:$0xff] }
  0x2b   :  { %450 = vmatpush.msrb.mxu3 %v3065_v59  ;;  %321 = vmatmul.f32.gmra.mxu1 %v3083_v63  ;;  %5449 = vst [vmem:[#allocation5_spill] sm:$0xff] %v3191_v60 }
  0x2c   :  { %347 = vmatpush.msrb.mxu1 %v73_v0  ;;  %389 = vmatpush.msrb.mxu2 %v71_v2  ;;  %v53_v0 = vld [vmem:[%s5392_s2 + $0x70] sm:$0xff]  ;;  %v3204_v2 = vld [vmem:[%s5393_s0 + $0x38] sm:$0xff] }
  0x2d   :  { %451 = vmatpush.msrb.mxu3 %v3078_v62  ;;  %480 = vmatpush.msra.mxu0 %v3173_v52 }
  0x2e   :  { %348 = vmatpush.msrb.mxu1 %v70_v8  ;;  %390 = vmatpush.msrb.mxu2 %v68_v10  ;;  %v3209_v8 = vld [vmem:[%s5392_s2 + $0x1d0] sm:$0xff]  ;;  %v52_v10 = vld [vmem:[%s5392_s2 + $0x68] sm:$0xff] }
  0x2f   :  { %452 = vmatpush.msrb.mxu3 %v3096_v4  ;;  %481 = vmatpush.msra.mxu0 %v3191_v60 }
  0x30   :  { %349 = vmatpush.msrb.mxu1 %v67_v17  ;;  %391 = vmatpush.msrb.mxu2 %v65_v21  ;;  %v50_v17 = vld [vmem:[%s5392_s2 + $0x58] sm:$0xff] }
  0x31   :  { %453 = vmatpush.msrb.mxu3 %v3114_v12  ;;  %336 = vmatmul.f32.gmra.mxu2 %v3132_v24  ;;  %v3222_v21 = vld [vmem:[%s5392_s2 + $0x1b8] sm:$0xff] }
  0x32   :  { %350 = vmatpush.msrb.mxu1 %v64_v30  ;;  %392 = vmatpush.msrb.mxu2 %v62_v33  ;;  %5450 = vst [vmem:[#allocation6_spill] sm:$0xff] %v3222_v21  ;;  %v3227_v30 = vld [vmem:[%s5393_s0 + $0x18] sm:$0xff]  ;;  %v49_v33 = vld [vmem:[%s5392_s2 + $0x50] sm:$0xff] }
  0x33   :  { %454 = vmatpush.msrb.mxu3 %v3137_v27  ;;  %324 = vmatmul.f32.gmra.mxu1 %v3155_v39 }
  0x34   :  { %351 = vmatpush.msrb.mxu1 %v61_v43  ;;  %393 = vmatpush.msrb.mxu2 %v59_v48  ;;  %v47_v43 = vld [vmem:[%s5392_s2 + $0x40] sm:$0xff] }
  0x35   :  { %455 = vmatpush.msrb.mxu3 %v3150_v36  ;;  %v3240_v48 = vld [vmem:[%s5392_s2 + $0x1a0] sm:$0xff]  ;;  %482 = vmatmul.f32.vlgmr.msra.gmra.mxu0 %v5400_v45 }
  0x36   :  { %352 = vmatpush.msrb.mxu1 %v58_v53  ;;  %394 = vmatpush.msrb.mxu2 %v56_v56  ;;  %5451 = vst [vmem:[#allocation7_spill] sm:$0xff] %v3240_v48  ;;  %v46_v53 = vld [vmem:[%s5392_s2 + $0x38] sm:$0xff]  ;;  %v44_v56 = vld [vmem:[%s5392_s2 + $0x28] sm:$0xff] }
  0x37   :  { %456 = vmatpush.msrb.mxu3 %v3168_v49  ;;  %646 = vmatpush.msrb.mxu0 %v2791_v1 }
  0x38   :  { %353 = vmatpush.msrb.mxu1 %v55_v61  ;;  %395 = vmatpush.msrb.mxu2 %v53_v0  ;;  %v3253_v61 = vld [vmem:[%s5392_s2 + $0x188] sm:$0xff]  ;;  %v43_v0 = vld [vmem:[%s5392_s2 + $0x20] sm:$0xff] }
  0x39   :  { %457 = vmatpush.msrb.mxu3 %v3186_v57  ;;  %339 = vmatmul.f32.gmra.mxu2 %v3204_v2  ;;  %5452 = vst [vmem:[#allocation8_spill] sm:$0xff] %v3253_v61 }
  0x3a   :  { %354 = vmatpush.msrb.mxu1 %v52_v10  ;;  %396 = vmatpush.msrb.mxu2 %v50_v17  ;;  %v41_v10 = vld [vmem:[%s5392_s2 + $0x10] sm:$0xff]  ;;  %v40_v17 = vld [vmem:[%s5392_s2 + $0x8] sm:$0xff] }
  0x3b   :  { %458 = vmatpush.msrb.mxu3 %v3209_v8  ;;  %327 = vmatmul.f32.gmra.mxu1 %v3227_v30 }
  0x3c   :  { %355 = vmatpush.msrb.mxu1 %v49_v33  ;;  %397 = vmatpush.msrb.mxu2 %v47_v43 }
  0x3d   :  { %459 = vmatpush.msrb.mxu3 %v3222_v21  ;;  %647 = vmatpush.msrb.mxu0 %v2800_v3 }
  0x3e   :  { %356 = vmatpush.msrb.mxu1 %v46_v53  ;;  %398 = vmatpush.msrb.mxu2 %v44_v56 }
  0x3f   :  { %460 = vmatpush.msrb.mxu3 %v3240_v48  ;;  %648 = vmatpush.msrb.mxu0 %v2808_v5 }
  0x40   :  { %357 = vmatpush.msrb.mxu1 %v43_v0  ;;  %399 = vmatpush.msrb.mxu2 %v41_v10 }
  0x41   :  { %461 = vmatpush.msrb.mxu3 %v3253_v61  ;;  %400 = vmatmul.f32.vlgmr.msrb.gmra.mxu2 %v3011_v47 }
  0x42   :  { %462 = vmatmul.f32.vlgmr.msrb.gmra.mxu3 %v5400_v45  ;;  %358 = vmatpush.msrb.mxu1 %v40_v17 }
  0x43   :  { %556 = vmatpush.msra.mxu2 %v2989_v42  ;;  %359 = vmatmul.f32.vlgmr.msrb.gmra.mxu1 %v3011_v47 }
  0x44   :  { %576 = vmatpush.msra.mxu3 %v2859_v16  ;;  %536 = vmatpush.msra.mxu1 %v2791_v1 }
  0x45   :  { %557 = vmatpush.msra.mxu2 %v3006_v46  ;;  %649 = vmatpush.msrb.mxu0 %v2817_v7 }
  0x46   :  { %577 = vmatpush.msra.mxu3 %v2873_v19  ;;  %537 = vmatpush.msra.mxu1 %v2800_v3 }
  0x47   :  { %558 = vmatpush.msra.mxu2 %v3023_v50  ;;  %650 = vmatpush.msrb.mxu0 %v2826_v9 }
  0x48   :  { %578 = vmatpush.msra.mxu3 %v2879_v20  ;;  %538 = vmatpush.msra.mxu1 %v2808_v5 }
  0x49   :  { %559 = vmatpush.msra.mxu2 %v3042_v54  ;;  %651 = vmatpush.msrb.mxu0 %v2835_v11 }
  0x4a   :  { %403 = vmatmul.f32.gmra.mxu2 %v3083_v63  ;;  %579 = vmatpush.msra.mxu3 %v2894_v23 }
  0x4b   :  { %539 = vmatpush.msra.mxu1 %v2817_v7  ;;  %560 = vmatpush.msra.mxu2 %v3065_v59 }
  0x4c   :  { %362 = vmatmul.f32.gmra.mxu1 %v3083_v63  ;;  %580 = vmatpush.msra.mxu3 %v2909_v26 }
  0x4d   :  { %540 = vmatpush.msra.mxu1 %v2826_v9  ;;  %561 = vmatpush.msra.mxu2 %v3078_v62 }
  0x4e   :  { %581 = vmatpush.msra.mxu3 %v2924_v29  ;;  %652 = vmatpush.msrb.mxu0 %v2844_v13 }
  0x4f   :  { %541 = vmatpush.msra.mxu1 %v2835_v11  ;;  %562 = vmatpush.msra.mxu2 %v3096_v4 }
  0x50   :  { %582 = vmatpush.msra.mxu3 %v2939_v32  ;;  %653 = vmatpush.msrb.mxu0 %v2853_v15 }
  0x51   :  { %542 = vmatpush.msra.mxu1 %v2844_v13  ;;  %563 = vmatpush.msra.mxu2 %v3114_v12 }
  0x52   :  { %406 = vmatmul.f32.gmra.mxu2 %v3155_v39  ;;  %583 = vmatpush.msra.mxu3 %v2954_v35 }
  0x53   :  { %543 = vmatpush.msra.mxu1 %v2853_v15  ;;  %564 = vmatpush.msra.mxu2 %v3137_v27 }
  0x54   :  { %365 = vmatmul.f32.gmra.mxu1 %v3155_v39  ;;  %584 = vmatpush.msra.mxu3 %v2969_v38 }
  0x55   :  { %544 = vmatpush.msra.mxu1 %v2867_v18  ;;  %565 = vmatpush.msra.mxu2 %v3150_v36 }
  0x56   :  { %585 = vmatpush.msra.mxu3 %v2999_v44  ;;  %654 = vmatpush.msrb.mxu0 %v2867_v18 }
  0x57   :  { %545 = vmatpush.msra.mxu1 %v2887_v22  ;;  %566 = vmatpush.msra.mxu2 %v3168_v49 }
  0x58   :  { %586 = vmatpush.msra.mxu3 %v3029_v51  ;;  %655 = vmatpush.msrb.mxu0 %v2887_v22 }
  0x59   :  { %546 = vmatpush.msra.mxu1 %v2902_v25  ;;  %567 = vmatpush.msra.mxu2 %v3186_v57 }
  0x5a   :  { %409 = vmatmul.f32.gmra.mxu2 %v3227_v30  ;;  %587 = vmatpush.msra.mxu3 %v3047_v55 }
  0x5b   :  { %547 = vmatpush.msra.mxu1 %v2917_v28  ;;  %568 = vmatpush.msra.mxu2 %v3209_v8 }
  0x5c   :  { %368 = vmatmul.f32.gmra.mxu1 %v3227_v30  ;;  %588 = vmatpush.msra.mxu3 %v3101_v6 }
  0x5d   :  { %548 = vmatpush.msra.mxu1 %v2932_v31  ;;  %569 = vmatpush.msra.mxu2 %v3222_v21 }
  0x5e   :  { %589 = vmatpush.msra.mxu3 %v3119_v14  ;;  %656 = vmatpush.msrb.mxu0 %v2902_v25 }
  0x5f   :  { %549 = vmatpush.msra.mxu1 %v2947_v34  ;;  %570 = vmatpush.msra.mxu2 %v3240_v48 }
  0x60   :  { %590 = vmatpush.msra.mxu3 %v3173_v52  ;;  %657 = vmatpush.msrb.mxu0 %v2917_v28 }
  0x61   :  { %550 = vmatpush.msra.mxu1 %v2962_v37  ;;  %571 = vmatpush.msra.mxu2 %v3253_v61 }
  0x62   :  { %412 = vmatmul.f32.gmra.mxu2 %v2984_v41  ;;  %591 = vmatpush.msra.mxu3 %v3191_v60 }
  0x63   :  { %551 = vmatpush.msra.mxu1 %v2977_v40  ;;  %686 = vmatpush.msrb.mxu2 %v2859_v16 }
  0x64   :  { %371 = vmatmul.f32.gmra.mxu1 %v2984_v41  ;;  %756 = vmatpush.msrb.mxu3 %v2791_v1  ;;  %v231_v41 = vld [vmem:[%s5394_s3] sm:$0xff] }
  0x65   :  { %666 = vmatpush.msrb.mxu1 %v2989_v42  ;;  %687 = vmatpush.msrb.mxu2 %v2873_v19  ;;  %v3415_v47 = vperm.slane %v231_v41, 0 }
  0x66   :  { %757 = vmatpush.msrb.mxu3 %v2800_v3  ;;  %658 = vmatpush.msrb.mxu0 %v2932_v31 }
  0x67   :  { %667 = vmatpush.msrb.mxu1 %v3006_v46  ;;  %688 = vmatpush.msrb.mxu2 %v2879_v20  ;;  %5453 = vst [vmem:[#allocation9_spill] sm:$0xff] %v3415_v47 }
  0x68   :  { %659 = vmatpush.msrb.mxu0 %v2947_v34  ;;  %758 = vmatpush.msrb.mxu3 %v2808_v5 }
  0x69   :  { %668 = vmatpush.msrb.mxu1 %v3023_v50  ;;  %689 = vmatpush.msrb.mxu2 %v2894_v23 }
  0x6a   :  { %415 = vmatmul.f32.gmra.mxu2 %v3060_v58  ;;  %660 = vmatpush.msrb.mxu0 %v2962_v37 }
  0x6b   :  { %669 = vmatpush.msrb.mxu1 %v3042_v54  ;;  %690 = vmatpush.msrb.mxu2 %v2909_v26 }
  0x6c   :  { %374 = vmatmul.f32.gmra.mxu1 %v3060_v58  ;;  %661 = vmatpush.msrb.mxu0 %v2977_v40 }
  0x6d   :  { %670 = vmatpush.msrb.mxu1 %v3065_v59  ;;  %691 = vmatpush.msrb.mxu2 %v2924_v29 }
  0x6e   :  { %759 = vmatpush.msrb.mxu3 %v2817_v7  ;;  %776 = vmatpush.msra.mxu0 %v2989_v42 }
  0x6f   :  { %671 = vmatpush.msrb.mxu1 %v3078_v62  ;;  %692 = vmatpush.msrb.mxu2 %v2939_v32 }
  0x70   :  { %777 = vmatpush.msra.mxu0 %v3006_v46  ;;  %760 = vmatpush.msrb.mxu3 %v2826_v9 }
  0x71   :  { %672 = vmatpush.msrb.mxu1 %v3096_v4  ;;  %693 = vmatpush.msrb.mxu2 %v2954_v35 }
  0x72   :  { %418 = vmatmul.f32.gmra.mxu2 %v3132_v24  ;;  %778 = vmatpush.msra.mxu0 %v3023_v50 }
  0x73   :  { %673 = vmatpush.msrb.mxu1 %v3114_v12  ;;  %694 = vmatpush.msrb.mxu2 %v2969_v38 }
  0x74   :  { %377 = vmatmul.f32.gmra.mxu1 %v3132_v24  ;;  %779 = vmatpush.msra.mxu0 %v3042_v54 }
  0x75   :  { %674 = vmatpush.msrb.mxu1 %v3137_v27  ;;  %695 = vmatpush.msrb.mxu2 %v2999_v44 }
  0x76   :  { %761 = vmatpush.msrb.mxu3 %v2835_v11  ;;  %780 = vmatpush.msra.mxu0 %v3065_v59 }
  0x77   :  { %675 = vmatpush.msrb.mxu1 %v3150_v36  ;;  %696 = vmatpush.msrb.mxu2 %v3029_v51 }
  0x78   :  { %781 = vmatpush.msra.mxu0 %v3078_v62  ;;  %762 = vmatpush.msrb.mxu3 %v2844_v13 }
  0x79   :  { %676 = vmatpush.msrb.mxu1 %v3168_v49  ;;  %697 = vmatpush.msrb.mxu2 %v3047_v55 }
  0x7a   :  { %421 = vmatmul.f32.gmra.mxu2 %v3204_v2  ;;  %782 = vmatpush.msra.mxu0 %v3096_v4 }
  0x7b   :  { %677 = vmatpush.msrb.mxu1 %v3186_v57  ;;  %698 = vmatpush.msrb.mxu2 %v3101_v6 }
  0x7c   :  { %380 = vmatmul.f32.gmra.mxu1 %v3204_v2  ;;  %763 = vmatpush.msrb.mxu3 %v2853_v15 }
  0x7d   :  { %678 = vmatpush.msrb.mxu1 %v3209_v8  ;;  %699 = vmatpush.msrb.mxu2 %v3119_v14 }
  0x7e   :  { %783 = vmatpush.msra.mxu0 %v3114_v12  ;;  %764 = vmatpush.msrb.mxu3 %v2867_v18 }
  0x7f   :  { %679 = vmatpush.msrb.mxu1 %v3222_v21  ;;  %700 = vmatpush.msrb.mxu2 %v3173_v52 }
  0x80   :  { %784 = vmatpush.msra.mxu0 %v3137_v27  ;;  %765 = vmatpush.msrb.mxu3 %v2887_v22 }
  0x81   :  { %680 = vmatpush.msrb.mxu1 %v3240_v48  ;;  %701 = vmatpush.msrb.mxu2 %v3191_v60 }
  0x82   :  { %785 = vmatpush.msra.mxu0 %v3150_v36  ;;  %766 = vmatpush.msrb.mxu3 %v2902_v25 }
  0x83   :  { %681 = vmatpush.msrb.mxu1 %v3253_v61 }
  0x84   :  { %786 = vmatpush.msra.mxu0 %v3168_v49  ;;  %767 = vmatpush.msrb.mxu3 %v2917_v28 }
  0x86   :  { %787 = vmatpush.msra.mxu0 %v3186_v57  ;;  %768 = vmatpush.msrb.mxu3 %v2932_v31 }
  0x88   :  { %788 = vmatpush.msra.mxu0 %v3209_v8  ;;  %769 = vmatpush.msrb.mxu3 %v2947_v34 }
  0x8a   :  { %789 = vmatpush.msra.mxu0 %v3222_v21  ;;  %770 = vmatpush.msrb.mxu3 %v2962_v37 }
  0x8c   :  { %790 = vmatpush.msra.mxu0 %v3240_v48  ;;  %771 = vmatpush.msrb.mxu3 %v2977_v40 }
  0x8e   :  { %791 = vmatpush.msra.mxu0 %v3253_v61  ;;  %v233_v61 = vld [vmem:[%s5394_s3 + $0x10] sm:$0xff] }
  0xa0   :  { %v319_v58 = vpop.f32.mrf.mxu1 }
  0xa1   :  { %v320_v63 = vadd.f32 %v319_v58, %v3415_v47 }
  0xa4   :  { %v3418_v24 = vpop.f32.mrf.mxu2 }
  0xa5   :  { %5454 = vst [vmem:[#allocation10_spill] sm:$0xff] %v3418_v24  ;;  %v443_v39 = vpop.f32.mrf.mxu3 }
  0xa6   :  { %v486_v2 = vadd.f32 %v443_v39, %v320_v63 }
  0xa8   :  { %v2424_v30 = vmul.f32 -1.442695, %v486_v2  ;;  %v322_v33 = vpop.f32.mrf.mxu1  ;;  %v232_v2 = vld [vmem:[%s5394_s3 + $0x8] sm:$0xff] }
  0xa9   :  { %v3421_v43 = vadd.f32 %v322_v33, %v3415_v47 }
  0xaa   :  { %2479 = vpow2.f32 %v2424_v30 }
  0xab   :  { %5455 = vst [vmem:[#allocation11_spill] sm:$0xff] %v3421_v43 }
  0xac   :  { %v334_v53 = vpop.f32.mrf.mxu2 }
  0xad   :  { %v3424_v56 = vadd.f32 %v334_v53, %v3415_v47  ;;  %v3441_v53 = vperm.slane %v232_v2, 0  ;;  %v3449_v2 = vperm.slane %v233_v61, 0 }
  0xaf   :  { %5456 = vst [vmem:[#allocation12_spill] sm:$0xff] %v3424_v56 }
  0xb0   :  { %v325_v0 = vpop.f32.mrf.mxu1  ;;  %v2480_v17 = vpop.eup %2479  ;;  %5461 = vst [vmem:[#allocation17_spill] sm:$0xff] %v3441_v53 }
  0xb1   :  { %v3427_v10 = vadd.f32 %v325_v0, %v3415_v47  ;;  %v490_v45 = vadd.f32 1.0, %v2480_v17  ;;  %5463 = vst [vmem:[#allocation19_spill] sm:$0xff] %v3449_v2 }
  0xb2   :  { %v483_v48 = vpop.f32.mrf.mxu0 }
  0xb3   :  { %5457 = vst [vmem:[#allocation13_spill] sm:$0xff] %v3427_v10  ;;  %2481 = vrcp.f32 %v490_v45  ;;  %vm496_vm1 = vweird.f32 %v490_v45 }
  0xb4   :  { %v337_v58 = vpop.f32.mrf.mxu2 }
  0xb5   :  { %v3430_v24 = vadd.f32 %v337_v58, %v3415_v47 }
  0xb7   :  { %5458 = vst [vmem:[#allocation14_spill] sm:$0xff] %v3430_v24 }
  0xb8   :  { %v328_v63 = vpop.f32.mrf.mxu1 }
  0xb9   :  { %v3433_v39 = vadd.f32 %v328_v63, %v3415_v47  ;;  %v2482_v0 = vpop.eup %2481 }
  0xba   :  { %v492_v24 = vmul.f32 %v2482_v0, %v490_v45  ;;  %vm497_vm0 = vweird.f32 %v2482_v0 }
  0xbb   :  { %5459 = vst [vmem:[#allocation15_spill] sm:$0xff] %v3433_v39  ;;  %vm498_vm2 = vmor %vm496_vm1, %vm497_vm0 }
  0xbc   :  { %v340_v30 = vpop.f32.mrf.mxu2  ;;  %v493_v63 = vsub.f32 1.0, %v492_v24  ;;  %v3454_v24 = vperm.slane %v231_v41, 1 }
  0xbd   :  { %v3439_v33 = vadd.f32 %v340_v30, %v3415_v47 }
  0xbe   :  { %v494_v40 = vmul.f32 %v2482_v0, %v493_v63 }
  0xbf   :  { %5460 = vst [vmem:[#allocation16_spill] sm:$0xff] %v3439_v33 }
  0xc0   :  { %v360_v17 = vpop.f32.mrf.mxu1 }
  0xc1   :  { %v361_v58 = vadd.f32 %v360_v17, %v3441_v53  ;;  %v495_v17 = vadd.f32 %v2482_v0, %v494_v40  ;;  %v526_v40 = vadd.f32 %v483_v48, %v3454_v24 }
  0xc4   :  { %v401_v10 = vpop.f32.mrf.mxu2 }
  0xc5   :  { %v463_v56 = vpop.f32.mrf.mxu3 }
  0xc6   :  { %v506_v43 = vadd.f32 %v463_v56, %v361_v58  ;;  %v502_v56 = vand.u32 2147483648, %v490_v45 }
  0xc8   :  { %v2425_v39 = vmul.f32 -1.442695, %v506_v43  ;;  %v500_v43 = vand.u32 2147483647, %v490_v45  ;;  %v503_v61 = vor.u32 1.1754944e-38, %v502_v56  ;;  %v402_v45 = vadd.f32 %v401_v10, %v3449_v2 }
  0xc9   :  { %v3447_v30 = vpop.f32.mrf.mxu1 }
  0xca   :  { %2483 = vpow2.f32 %v2425_v39  ;;  %5462 = vst [vmem:[#allocation18_spill] sm:$0xff] %v3447_v30  ;;  %v499_v39 = vsel %vm498_vm2, %v2482_v0, %v495_v17  ;;  %vm501_vm3 = vcmp.eq.f32.partialorder %v500_v43, 8.507059e+37 }
  0xcd   :  { %v404_v33 = vpop.f32.mrf.mxu2 }
  0xce   :  { %v3452_v47 = vadd.f32 %v404_v33, %v3449_v2 }
  0xd0   :  { %5464 = vst [vmem:[#allocation20_spill] sm:$0xff] %v3452_v47  ;;  %v2484_v60 = vpop.eup %2483  ;;  %v504_v47 = vsel %vm501_vm3, %v503_v61, %v499_v39 }
  0xd1   :  { %v510_v58 = vadd.f32 1.0, %v2484_v60  ;;  %v366_v63 = vpop.f32.mrf.mxu1  ;;  %v527_v37 = vmul.f32 %v526_v40, %v504_v47 }
  0xd2   :  { %v3457_v30 = vadd.f32 %v366_v63, %v3441_v53 }
  0xd3   :  { %2485 = vrcp.f32 %v510_v58  ;;  %v528_v0 = vadd.f32 %v527_v37, %v402_v45  ;;  %v522_v63 = vand.u32 2147483648, %v510_v58  ;;  %v520_v48 = vand.u32 2147483647, %v510_v58 }
  0xd4   :  { %5465 = vst [vmem:[#allocation21_spill] sm:$0xff] %v3457_v30  ;;  %vm516_vm5 = vweird.f32 %v510_v58 }
  0xd5   :  { %v407_v33 = vpop.f32.mrf.mxu2  ;;  %2487 = vtanh.f32 %v528_v0  ;;  %v523_v47 = vor.u32 1.1754944e-38, %v522_v63  ;;  %vm521_vm7 = vcmp.eq.f32.partialorder %v520_v48, 8.507059e+37 }
  0xd6   :  { %v3461_v41 = vadd.f32 %v407_v33, %v3449_v2  ;;  %v31_v33 = vld [vmem:[%s5395_s1] sm:$0xff] }
  0xd7   :  { %vm534_vm8 = vcmp.gt.f32.partialorder %v31_v33, 0.5 }
  0xd9   :  { %v2486_v60 = vpop.eup %2485  ;;  %v369_v17 = vpop.f32.mrf.mxu1 }
  0xda   :  { %v512_v52 = vmul.f32 %v2486_v60, %v510_v58  ;;  %v3465_v56 = vadd.f32 %v369_v17, %v3441_v53  ;;  %vm517_vm4 = vweird.f32 %v2486_v60 }
  0xdb   :  { %vm518_vm6 = vmor %vm516_vm5, %vm517_vm4  ;;  %v2488_v45 = vpop.eup %2487 }
  0xdc   :  { %v513_v21 = vsub.f32 1.0, %v512_v52 }
  0xdd   :  { %v410_v43 = vpop.f32.mrf.mxu2 }
  0xde   :  { %v514_v30 = vmul.f32 %v2486_v60, %v513_v21  ;;  %v3468_v39 = vadd.f32 %v410_v43, %v3449_v2 }
  0xe0   :  { %v515_v10 = vadd.f32 %v2486_v60, %v514_v30 }
  0xe1   :  { %v372_v52 = vpop.f32.mrf.mxu1 }
  0xe2   :  { %v519_v61 = vsel %vm518_vm6, %v2486_v60, %v515_v10  ;;  %v3474_v21 = vadd.f32 %v372_v52, %v3441_v53 }
  0xe3   :  { %v524_v37 = vsel %vm521_vm7, %v523_v47, %v519_v61 }
  0xe4   :  { %v530_v40 = vsub.f32 1.0, %v524_v37  ;;  %5466 = vst [vmem:[#allocation22_spill] sm:$0xff] %v3474_v21  ;;  %v532_v0 = vmul.f32 0.0, %v524_v37 }
  0xe5   :  { %v413_v17 = vpop.f32.mrf.mxu2 }
  0xe6   :  { %v531_v43 = vmul.f32 %v2488_v45, %v530_v40  ;;  %v3477_v30 = vadd.f32 %v413_v17, %v3449_v2 }
  0xe8   :  { %5467 = vst [vmem:[#allocation23_spill] sm:$0xff] %v3477_v30  ;;  %v533_v58 = vadd.f32 %v532_v0, %v531_v43 }
  0xe9   :  { %v375_v63 = vpop.f32.mrf.mxu1 }
  0xea   :  { %2426 = vmatmul.msk.f32.vlgmr.msra.gmra.mxu1 %vm534_vm8, %v533_v58  ;;  %2427 = vmatmul.msk.f32.vlgmr.msra.gmra.mxu2 %vm534_vm8, %v533_v58  ;;  %v3479_v60 = vsel %vm534_vm8, %v533_v58, 0.0  ;;  %v3483_v48 = vadd.f32 %v375_v63, %v3441_v53 }
  0xeb   :  { %2428 = vmatmul.msk.f32.vlgmr.msra.gmra.mxu3 %vm534_vm8, %v533_v58  ;;  %796 = vmatpush.msra.mxu1 %v2859_v16 }
  0xec   :  { %5468 = vst [vmem:[#allocation24_spill] sm:$0xff] %v3483_v48  ;;  %866 = vmatpush.msra.mxu2 %v2791_v1  ;;  %886 = vmatpush.msra.mxu3 %v2989_v42 }
  0xed   :  { %v416_v10 = vpop.f32.mrf.mxu2  ;;  %797 = vmatpush.msra.mxu1 %v2873_v19  ;;  %v5478_v19 = vld [vmem:[#allocation8_spill] sm:$0xff] }
  0xee   :  { %v3489_v47 = vadd.f32 %v416_v10, %v3449_v2  ;;  %867 = vmatpush.msra.mxu2 %v2800_v3  ;;  %887 = vmatpush.msra.mxu3 %v3006_v46 }
  0xef   :  { %798 = vmatpush.msra.mxu1 %v2879_v20 }
  0xf0   :  { %5469 = vst [vmem:[#allocation25_spill] sm:$0xff] %v3489_v47  ;;  %868 = vmatpush.msra.mxu2 %v2808_v5  ;;  %888 = vmatpush.msra.mxu3 %v3023_v50 }
  0xf1   :  { %799 = vmatpush.msra.mxu1 %v2894_v23  ;;  %v378_v1 = vpop.f32.mrf.mxu1 }
  0xf2   :  { %869 = vmatpush.msra.mxu2 %v2817_v7  ;;  %889 = vmatpush.msra.mxu3 %v3042_v54  ;;  %v3501_v16 = vadd.f32 %v378_v1, %v3441_v53  ;;  %v5472_v7 = vld [vmem:[#allocation6_spill] sm:$0xff] }
  0xf3   :  { %800 = vmatpush.msra.mxu1 %v2909_v26 }
  0xf4   :  { %5470 = vst [vmem:[#allocation26_spill] sm:$0xff] %v3501_v16  ;;  %870 = vmatpush.msra.mxu2 %v2826_v9  ;;  %890 = vmatpush.msra.mxu3 %v3065_v59  ;;  %v5473_v9 = vld [vmem:[#allocation4_spill] sm:$0xff] }
  0xf5   :  { %v419_v3 = vpop.f32.mrf.mxu2  ;;  %801 = vmatpush.msra.mxu1 %v2924_v29  ;;  %v5482_v29 = vld [vmem:[#allocation18_spill] sm:$0xff] }
  0xf6   :  { %v3507_v5 = vadd.f32 %v419_v3, %v3449_v2  ;;  %871 = vmatpush.msra.mxu2 %v2835_v11  ;;  %891 = vmatpush.msra.mxu3 %v3078_v62  ;;  %v5474_v11 = vld [vmem:[#allocation2_spill] sm:$0xff] }
  0xf7   :  { %802 = vmatpush.msra.mxu1 %v2939_v32 }
  0xf8   :  { %5471 = vst [vmem:[#allocation27_spill] sm:$0xff] %v3507_v5  ;;  %872 = vmatpush.msra.mxu2 %v2844_v13  ;;  %892 = vmatpush.msra.mxu3 %v3096_v4  ;;  %v5475_v13 = vld [vmem:[#allocation7_spill] sm:$0xff] }
  0xf9   :  { %803 = vmatpush.msra.mxu1 %v2954_v35  ;;  %v3541_v20 = vpop.f32.mrf.mxu1 }
  0xfa   :  { %873 = vmatpush.msra.mxu2 %v2853_v15  ;;  %893 = vmatpush.msra.mxu3 %v3114_v12  ;;  %v5476_v15 = vld [vmem:[#allocation5_spill] sm:$0xff]  ;;  %5479 = vst [vmem:[#allocation6_spill] sm:$0xff] %v3541_v20  ;;  %v5494_v20 = vld [vmem:[#allocation15_spill] sm:$0xff] }
  0xfb   :  { %804 = vmatpush.msra.mxu1 %v2969_v38 }
  0xfc   :  { %874 = vmatpush.msra.mxu2 %v2867_v18  ;;  %894 = vmatpush.msra.mxu3 %v3137_v27  ;;  %v5477_v18 = vld [vmem:[#allocation3_spill] sm:$0xff] }
  0xfd   :  { %805 = vmatpush.msra.mxu1 %v2999_v44 }
  0xfe   :  { %875 = vmatpush.msra.mxu2 %v2887_v22  ;;  %895 = vmatpush.msra.mxu3 %v3150_v36  ;;  %v3543_v22 = vpop.f32.mrf.mxu2 }
  0xff   :  { %806 = vmatpush.msra.mxu1 %v3029_v51  ;;  %5480 = vst [vmem:[#allocation4_spill] sm:$0xff] %v3543_v22 }
 0x100   :  { %876 = vmatpush.msra.mxu2 %v2902_v25  ;;  %896 = vmatpush.msra.mxu3 %v3168_v49  ;;  %v5481_v25 = vld [vmem:[#allocation11_spill] sm:$0xff] }
 0x101   :  { %807 = vmatpush.msra.mxu1 %v3047_v55 }
 0x102   :  { %877 = vmatpush.msra.mxu2 %v2917_v28  ;;  %897 = vmatpush.msra.mxu3 %v3186_v57 }
 0x103   :  { %808 = vmatpush.msra.mxu1 %v3101_v6 }
 0x104   :  { %878 = vmatpush.msra.mxu2 %v2932_v31  ;;  %898 = vmatpush.msra.mxu3 %v3209_v8  ;;  %v364_v31 = vadd.f32 %v5482_v29, %v3441_v53 }
 0x105   :  { %809 = vmatpush.msra.mxu1 %v3119_v14 }
 0x106   :  { %879 = vmatpush.msra.mxu2 %v2947_v34  ;;  %899 = vmatpush.msra.mxu3 %v5472_v7 }
 0x107   :  { %810 = vmatpush.msra.mxu1 %v5473_v9 }
 0x108   :  { %880 = vmatpush.msra.mxu2 %v5474_v11  ;;  %900 = vmatpush.msra.mxu3 %v5475_v13 }
 0x109   :  { %811 = vmatpush.msra.mxu1 %v5476_v15 }
 0x10a   :  { %881 = vmatpush.msra.mxu2 %v5477_v18  ;;  %901 = vmatpush.msra.mxu3 %v5478_v19 }
 0x167   :  { %v553_v23 = vpop.f32.mrf.mxu1 }
 0x168   :  { %v596_v26 = vadd.f32 %v553_v23, %v5481_v25 }
 0x16a   :  { %v2429_v28 = vmul.f32 -1.442695, %v596_v26 }
 0x16c   :  { %2489 = vpow2.f32 %v2429_v28 }
 0x16d   :  { %v573_v32 = vpop.f32.mrf.mxu2 }
 0x16e   :  { %v616_v34 = vadd.f32 %v573_v32, %v364_v31  ;;  %v593_v58 = vpop.f32.mrf.mxu3  ;;  %v5483_v31 = vld [vmem:[#allocation20_spill] sm:$0xff] }
 0x16f   :  { %v636_v18 = vadd.f32 %v593_v58, %v3454_v24  ;;  %v3582_v58 = vld [vmem:[%s5392_s2 + $0x2d0] sm:$0xff] }
 0x170   :  { %v2430_v35 = vmul.f32 -1.442695, %v616_v34 }
 0x172   :  { %v2490_v38 = vpop.eup %2489  ;;  %2491 = vpow2.f32 %v2430_v35 }
 0x173   :  { %v600_v44 = vadd.f32 1.0, %v2490_v38 }
 0x175   :  { %2493 = vrcp.f32 %v600_v44  ;;  %v612_v45 = vand.u32 2147483648, %v600_v44  ;;  %v610_v43 = vand.u32 2147483647, %v600_v44  ;;  %vm606_vm10 = vweird.f32 %v600_v44 }
 0x177   :  { %v613_v1 = vor.u32 1.1754944e-38, %v612_v45  ;;  %vm611_vm12 = vcmp.eq.f32.partialorder %v610_v43, 8.507059e+37 }
 0x178   :  { %v2492_v61 = vpop.eup %2491 }
 0x179   :  { %v620_v37 = vadd.f32 1.0, %v2492_v61 }
 0x17b   :  { %v2494_v52 = vpop.eup %2493  ;;  %2495 = vrcp.f32 %v620_v37  ;;  %v632_v25 = vand.u32 2147483648, %v620_v37  ;;  %v630_v29 = vand.u32 2147483647, %v620_v37  ;;  %vm626_vm14 = vweird.f32 %v620_v37 }
 0x17c   :  { %v602_v40 = vmul.f32 %v2494_v52, %v600_v44  ;;  %vm607_vm9 = vweird.f32 %v2494_v52 }
 0x17d   :  { %vm608_vm11 = vmor %vm606_vm10, %vm607_vm9  ;;  %v633_v35 = vor.u32 1.1754944e-38, %v632_v25  ;;  %vm631_vm0 = vcmp.eq.f32.partialorder %v630_v29, 8.507059e+37  ;;  %v3686_v25 = vld [vmem:[%s5392_s2 + $0x210] sm:$0xff] }
 0x17e   :  { %v603_v33 = vsub.f32 1.0, %v602_v40 }
 0x180   :  { %v604_v17 = vmul.f32 %v2494_v52, %v603_v33 }
 0x181   :  { %v2496_v0 = vpop.eup %2495 }
 0x182   :  { %v622_v63 = vmul.f32 %v2496_v0, %v620_v37  ;;  %v605_v10 = vadd.f32 %v2494_v52, %v604_v17  ;;  %vm627_vm13 = vweird.f32 %v2496_v0  ;;  %v3563_v37 = vld [vmem:[%s5392_s2 + $0x2f8] sm:$0xff] }
 0x183   :  { %vm628_vm15 = vmor %vm626_vm14, %vm627_vm13 }
 0x184   :  { %v623_v3 = vsub.f32 1.0, %v622_v63  ;;  %v609_v11 = vsel %vm608_vm11, %v2494_v52, %v605_v10  ;;  %v32_v52 = vld [vmem:[%s5395_s1 + $0x8] sm:$0xff]  ;;  %v3595_v63 = vld [vmem:[%s5392_s2 + $0x2b8] sm:$0xff]  ;;  %v3608_v10 = vld [vmem:[%s5392_s2 + $0x2a0] sm:$0xff] }
 0x185   :  { %v614_v23 = vsel %vm611_vm12, %v613_v1, %v609_v11  ;;  %vm644_vm1 = vcmp.gt.f32.partialorder %v32_v52, 0.5  ;;  %v3621_v1 = vld [vmem:[%s5392_s2 + $0x288] sm:$0xff]  ;;  %v3647_v11 = vld [vmem:[%s5392_s2 + $0x258] sm:$0xff] }
 0x186   :  { %v624_v26 = vmul.f32 %v2496_v0, %v623_v3  ;;  %v637_v28 = vmul.f32 %v636_v18, %v614_v23  ;;  %v3634_v3 = vld [vmem:[%s5392_s2 + $0x270] sm:$0xff]  ;;  %v3660_v18 = vld [vmem:[%s5392_s2 + $0x240] sm:$0xff]  ;;  %v3673_v23 = vld [vmem:[%s5392_s2 + $0x228] sm:$0xff] }
 0x188   :  { %v638_v32 = vadd.f32 %v637_v28, %v5483_v31  ;;  %v625_v34 = vadd.f32 %v2496_v0, %v624_v26  ;;  %v3702_v26 = vld [vmem:[%s5392_s2 + $0x1e0] sm:$0xff] }
 0x18a   :  { %2497 = vtanh.f32 %v638_v32  ;;  %v629_v38 = vsel %vm628_vm15, %v2496_v0, %v625_v34  ;;  %v3569_v0 = vld [vmem:[%s5392_s2 + $0x2e8] sm:$0xff] }
 0x18b   :  { %v634_v44 = vsel %vm631_vm0, %v633_v35, %v629_v38 }
 0x18c   :  { %v642_v61 = vmul.f32 %v634_v44, %v3479_v60  ;;  %v640_v40 = vsub.f32 1.0, %v634_v44 }
 0x190   :  { %v2498_v33 = vpop.eup %2497 }
 0x191   :  { %v641_v45 = vmul.f32 %v2498_v33, %v640_v40 }
 0x193   :  { %v643_v17 = vadd.f32 %v642_v61, %v641_v45 }
 0x195   :  { %v3555_v43 = vsel %vm644_vm1, %v643_v17, %v3479_v60  ;;  %v3576_v60 = vld [vmem:[%s5392_s2 + $0x2e0] sm:$0xff] }
 0x196   :  { %662 = vmatmul.f32.vlgmr.msrb.gmra.mxu0 %v3555_v43  ;;  %682 = vmatmul.f32.vlgmr.msrb.gmra.mxu1 %v3555_v43 }
 0x197   :  { %702 = vmatmul.f32.vlgmr.msrb.gmra.mxu2 %v3555_v43  ;;  %906 = vmatpush.msrb.mxu0 %v3563_v37 }
 0x198   :  { %976 = vmatpush.msrb.mxu1 %v3569_v0  ;;  %996 = vmatpush.msrb.mxu2 %v2989_v42  ;;  %v3589_v42 = vld [vmem:[%s5392_s2 + $0x2c8] sm:$0xff] }
 0x199   :  { %907 = vmatpush.msrb.mxu0 %v3576_v60 }
 0x19a   :  { %977 = vmatpush.msrb.mxu1 %v3582_v58  ;;  %997 = vmatpush.msrb.mxu2 %v3006_v46  ;;  %v3602_v46 = vld [vmem:[%s5392_s2 + $0x2b0] sm:$0xff] }
 0x19b   :  { %908 = vmatpush.msrb.mxu0 %v3589_v42 }
 0x19c   :  { %978 = vmatpush.msrb.mxu1 %v3595_v63  ;;  %998 = vmatpush.msrb.mxu2 %v3023_v50  ;;  %v3615_v50 = vld [vmem:[%s5392_s2 + $0x298] sm:$0xff] }
 0x19d   :  { %909 = vmatpush.msrb.mxu0 %v3602_v46 }
 0x19e   :  { %979 = vmatpush.msrb.mxu1 %v3608_v10  ;;  %999 = vmatpush.msrb.mxu2 %v3042_v54  ;;  %v3628_v54 = vld [vmem:[%s5392_s2 + $0x280] sm:$0xff] }
 0x19f   :  { %910 = vmatpush.msrb.mxu0 %v3615_v50 }
 0x1a0   :  { %980 = vmatpush.msrb.mxu1 %v3621_v1  ;;  %1000 = vmatpush.msrb.mxu2 %v3065_v59  ;;  %v3641_v59 = vld [vmem:[%s5392_s2 + $0x268] sm:$0xff] }
 0x1a1   :  { %911 = vmatpush.msrb.mxu0 %v3628_v54 }
 0x1a2   :  { %981 = vmatpush.msrb.mxu1 %v3634_v3  ;;  %1001 = vmatpush.msrb.mxu2 %v3078_v62  ;;  %v3654_v62 = vld [vmem:[%s5392_s2 + $0x250] sm:$0xff] }
 0x1a3   :  { %912 = vmatpush.msrb.mxu0 %v3641_v59 }
 0x1a4   :  { %982 = vmatpush.msrb.mxu1 %v3647_v11  ;;  %1002 = vmatpush.msrb.mxu2 %v3096_v4  ;;  %v3667_v4 = vld [vmem:[%s5392_s2 + $0x238] sm:$0xff] }
 0x1a5   :  { %913 = vmatpush.msrb.mxu0 %v3654_v62 }
 0x1a6   :  { %983 = vmatpush.msrb.mxu1 %v3660_v18  ;;  %1003 = vmatpush.msrb.mxu2 %v3114_v12  ;;  %v3680_v12 = vld [vmem:[%s5392_s2 + $0x220] sm:$0xff] }
 0x1a7   :  { %914 = vmatpush.msrb.mxu0 %v3667_v4 }
 0x1a8   :  { %984 = vmatpush.msrb.mxu1 %v3673_v23  ;;  %1004 = vmatpush.msrb.mxu2 %v3137_v27  ;;  %v3694_v27 = vld [vmem:[%s5392_s2 + $0x1f8] sm:$0xff] }
 0x1a9   :  { %915 = vmatpush.msrb.mxu0 %v3680_v12 }
 0x1aa   :  { %985 = vmatpush.msrb.mxu1 %v3686_v25  ;;  %1005 = vmatpush.msrb.mxu2 %v3150_v36 }
 0x1ab   :  { %916 = vmatpush.msrb.mxu0 %v3029_v51  ;;  %v3710_v51 = vld [vmem:[%s5392_s2 + $0x1c8] sm:$0xff] }
 0x1ac   :  { %986 = vmatpush.msrb.mxu1 %v3694_v27  ;;  %1006 = vmatpush.msrb.mxu2 %v3168_v49 }
 0x1ad   :  { %917 = vmatpush.msrb.mxu0 %v3047_v55  ;;  %v3718_v55 = vld [vmem:[%s5392_s2 + $0x1b0] sm:$0xff] }
 0x1ae   :  { %987 = vmatpush.msrb.mxu1 %v3702_v26  ;;  %1007 = vmatpush.msrb.mxu2 %v3186_v57  ;;  %5484 = vst [vmem:[#allocation2_spill] sm:$0xff] %v3718_v55  ;;  %v5487_v57 = vld [vmem:[#allocation13_spill] sm:$0xff] }
 0x1af   :  { %918 = vmatpush.msrb.mxu0 %v3101_v6  ;;  %v3726_v6 = vld [vmem:[%s5392_s2 + $0x198] sm:$0xff] }
 0x1b0   :  { %988 = vmatpush.msrb.mxu1 %v3710_v51  ;;  %1008 = vmatpush.msrb.mxu2 %v3209_v8  ;;  %5485 = vst [vmem:[#allocation7_spill] sm:$0xff] %v3726_v6 }
 0x1b1   :  { %919 = vmatpush.msrb.mxu0 %v3119_v14  ;;  %v3734_v14 = vld [vmem:[%s5392_s2 + $0x180] sm:$0xff] }
 0x1b2   :  { %989 = vmatpush.msrb.mxu1 %v3718_v55  ;;  %1009 = vmatpush.msrb.mxu2 %v5472_v7  ;;  %5486 = vst [vmem:[#allocation5_spill] sm:$0xff] %v3734_v14  ;;  %v5488_v7 = vld [vmem:[#allocation21_spill] sm:$0xff] }
 0x1b3   :  { %920 = vmatpush.msrb.mxu0 %v5473_v9 }
 0x1b4   :  { %990 = vmatpush.msrb.mxu1 %v3726_v6  ;;  %1010 = vmatpush.msrb.mxu2 %v5475_v13 }
 0x1b5   :  { %921 = vmatpush.msrb.mxu0 %v5476_v15 }
 0x1b6   :  { %991 = vmatpush.msrb.mxu1 %v3734_v14  ;;  %1011 = vmatpush.msrb.mxu2 %v5478_v19 }
 0x213   :  { %v663_v36 = vpop.f32.mrf.mxu0  ;;  %v683_v49 = vpop.f32.mrf.mxu1 }
 0x214   :  { %v706_v8 = vadd.f32 %v663_v36, %v5487_v57  ;;  %v726_v9 = vadd.f32 %v683_v49, %v5488_v7 }
 0x216   :  { %v2431_v28 = vmul.f32 -1.442695, %v706_v8  ;;  %v2432_v29 = vmul.f32 -1.442695, %v726_v9 }
 0x218   :  { %2499 = vpow2.f32 %v2431_v28 }
 0x219   :  { %2501 = vpow2.f32 %v2432_v29 }
 0x21a   :  { %v703_v17 = vpop.f32.mrf.mxu2 }
 0x21b   :  { %v746_v8 = vadd.f32 %v703_v17, %v3454_v24  ;;  %v3789_v17 = vld [vmem:[%s5392_s2 + $0x290] sm:$0xff] }
 0x21e   :  { %v2500_v13 = vpop.eup %2499 }
 0x21f   :  { %v2502_v15 = vpop.eup %2501  ;;  %v710_v31 = vadd.f32 1.0, %v2500_v13 }
 0x220   :  { %v730_v32 = vadd.f32 1.0, %v2502_v15 }
 0x221   :  { %2503 = vrcp.f32 %v710_v31  ;;  %v722_v52 = vand.u32 2147483648, %v710_v31  ;;  %v720_v33 = vand.u32 2147483647, %v710_v31  ;;  %vm716_vm3 = vweird.f32 %v710_v31 }
 0x222   :  { %2505 = vrcp.f32 %v730_v32  ;;  %v742_v28 = vand.u32 2147483648, %v730_v32  ;;  %vm736_vm7 = vweird.f32 %v730_v32  ;;  %v740_v13 = vand.u32 2147483647, %v730_v32 }
 0x223   :  { %v723_v49 = vor.u32 1.1754944e-38, %v722_v52  ;;  %vm721_vm5 = vcmp.eq.f32.partialorder %v720_v33, 8.507059e+37 }
 0x224   :  { %vm741_vm9 = vcmp.eq.f32.partialorder %v740_v13, 8.507059e+37  ;;  %v3855_v13 = vld [vmem:[%s5392_s2 + $0x1e8] sm:$0xff] }
 0x227   :  { %v2504_v34 = vpop.eup %2503 }
 0x228   :  { %v2506_v35 = vpop.eup %2505  ;;  %v712_v38 = vmul.f32 %v2504_v34, %v710_v31  ;;  %vm717_vm2 = vweird.f32 %v2504_v34 }
 0x229   :  { %v732_v19 = vmul.f32 %v2506_v35, %v730_v32  ;;  %vm718_vm4 = vmor %vm716_vm3, %vm717_vm2  ;;  %vm737_vm6 = vweird.f32 %v2506_v35 }
 0x22a   :  { %v713_v44 = vsub.f32 1.0, %v712_v38  ;;  %vm738_vm8 = vmor %vm736_vm7, %vm737_vm6 }
 0x22b   :  { %v733_v61 = vsub.f32 1.0, %v732_v19  ;;  %v743_v19 = vor.u32 1.1754944e-38, %v742_v28  ;;  %v3842_v28 = vld [vmem:[%s5392_s2 + $0x200] sm:$0xff] }
 0x22c   :  { %v714_v40 = vmul.f32 %v2504_v34, %v713_v44 }
 0x22d   :  { %v734_v45 = vmul.f32 %v2506_v35, %v733_v61 }
 0x22e   :  { %v715_v36 = vadd.f32 %v2504_v34, %v714_v40 }
 0x22f   :  { %v735_v7 = vadd.f32 %v2506_v35, %v734_v45  ;;  %v3781_v45 = vld [vmem:[%s5392_s2 + $0x2a8] sm:$0xff] }
 0x230   :  { %v719_v57 = vsel %vm718_vm4, %v2504_v34, %v715_v36  ;;  %v33_v34 = vld [vmem:[%s5395_s1 + $0x10] sm:$0xff]  ;;  %v3797_v36 = vld [vmem:[%s5392_s2 + $0x278] sm:$0xff] }
 0x231   :  { %v724_v9 = vsel %vm721_vm5, %v723_v49, %v719_v57  ;;  %v739_v38 = vsel %vm738_vm8, %v2506_v35, %v735_v7  ;;  %vm754_vm10 = vcmp.gt.f32.partialorder %v33_v34, 0.5  ;;  %v3773_v35 = vld [vmem:[%s5392_s2 + $0x2c0] sm:$0xff]  ;;  %v3813_v57 = vld [vmem:[%s5392_s2 + $0x248] sm:$0xff]  ;;  %v3829_v7 = vld [vmem:[%s5392_s2 + $0x218] sm:$0xff] }
 0x232   :  { %v747_v29 = vmul.f32 %v746_v8, %v724_v9  ;;  %v744_v31 = vsel %vm741_vm9, %v743_v19, %v739_v38  ;;  %v3805_v49 = vld [vmem:[%s5392_s2 + $0x260] sm:$0xff]  ;;  %v3821_v8 = vld [vmem:[%s5392_s2 + $0x230] sm:$0xff]  ;;  %v3835_v9 = vld [vmem:[%s5392_s2 + $0x208] sm:$0xff] }
 0x233   :  { %v750_v44 = vsub.f32 1.0, %v744_v31  ;;  %v752_v40 = vmul.f32 %v744_v31, %v3555_v43  ;;  %v3868_v38 = vld [vmem:[%s5392_s2 + $0x1d0] sm:$0xff]  ;;  %v3874_v19 = vld [vmem:[%s5392_s2 + $0x1c0] sm:$0xff]  ;;  %v3881_v31 = vld [vmem:[%s5392_s2 + $0x1b8] sm:$0xff] }
 0x234   :  { %v748_v15 = vadd.f32 %v747_v29, %v3461_v41  ;;  %v3757_v41 = vld [vmem:[%s5392_s2 + $0x2f0] sm:$0xff]  ;;  %5489 = vst [vmem:[#allocation3_spill] sm:$0xff] %v3881_v31  ;;  %v3894_v34 = vld [vmem:[%s5392_s2 + $0x1a0] sm:$0xff] }
 0x235   :  { %v3848_v29 = vld [vmem:[%s5392_s2 + $0x1f0] sm:$0xff]  ;;  %5491 = vst [vmem:[#allocation11_spill] sm:$0xff] %v3894_v34 }
 0x236   :  { %2507 = vtanh.f32 %v748_v15  ;;  %v3861_v15 = vld [vmem:[%s5392_s2 + $0x1d8] sm:$0xff] }
 0x23c   :  { %v2508_v61 = vpop.eup %2507 }
 0x23d   :  { %v751_v52 = vmul.f32 %v2508_v61, %v750_v44  ;;  %v3887_v44 = vld [vmem:[%s5392_s2 + $0x1a8] sm:$0xff]  ;;  %v3900_v61 = vld [vmem:[%s5392_s2 + $0x190] sm:$0xff] }
 0x23e   :  { %5490 = vst [vmem:[#allocation8_spill] sm:$0xff] %v3887_v44 }
 0x23f   :  { %v753_v33 = vadd.f32 %v752_v40, %v751_v52  ;;  %5492 = vst [vmem:[#allocation18_spill] sm:$0xff] %v3900_v61  ;;  %v3907_v52 = vld [vmem:[%s5392_s2 + $0x188] sm:$0xff] }
 0x240   :  { %5493 = vst [vmem:[#allocation20_spill] sm:$0xff] %v3907_v52 }
 0x241   :  { %v3747_v32 = vsel %vm754_vm10, %v753_v33, %v3555_v43  ;;  %v3765_v43 = vld [vmem:[%s5392_s2 + $0x2d8] sm:$0xff] }
 0x242   :  { %772 = vmatmul.f32.vlgmr.msrb.gmra.mxu3 %v3747_v32  ;;  %792 = vmatmul.f32.vlgmr.msra.gmra.mxu0 %v3747_v32 }
 0x243   :  { %812 = vmatmul.f32.vlgmr.msra.gmra.mxu1 %v3747_v32  ;;  %1016 = vmatpush.msrb.mxu3 %v3563_v37 }
 0x244   :  { %1086 = vmatpush.msra.mxu0 %v3569_v0  ;;  %1106 = vmatpush.msra.mxu1 %v3757_v41 }
 0x245   :  { %1017 = vmatpush.msrb.mxu3 %v3576_v60 }
 0x246   :  { %1087 = vmatpush.msra.mxu0 %v3582_v58  ;;  %1107 = vmatpush.msra.mxu1 %v3765_v43 }
 0x247   :  { %1018 = vmatpush.msrb.mxu3 %v3589_v42 }
 0x248   :  { %1088 = vmatpush.msra.mxu0 %v3595_v63  ;;  %1108 = vmatpush.msra.mxu1 %v3773_v35 }
 0x249   :  { %1019 = vmatpush.msrb.mxu3 %v3602_v46 }
 0x24a   :  { %1089 = vmatpush.msra.mxu0 %v3608_v10  ;;  %1109 = vmatpush.msra.mxu1 %v3781_v45 }
 0x24b   :  { %1020 = vmatpush.msrb.mxu3 %v3615_v50 }
 0x24c   :  { %1090 = vmatpush.msra.mxu0 %v3621_v1  ;;  %1110 = vmatpush.msra.mxu1 %v3789_v17 }
 0x24d   :  { %1021 = vmatpush.msrb.mxu3 %v3628_v54 }
 0x24e   :  { %1091 = vmatpush.msra.mxu0 %v3634_v3  ;;  %1111 = vmatpush.msra.mxu1 %v3797_v36 }
 0x24f   :  { %1022 = vmatpush.msrb.mxu3 %v3641_v59 }
 0x250   :  { %1092 = vmatpush.msra.mxu0 %v3647_v11  ;;  %1112 = vmatpush.msra.mxu1 %v3805_v49 }
 0x251   :  { %1023 = vmatpush.msrb.mxu3 %v3654_v62 }
 0x252   :  { %1093 = vmatpush.msra.mxu0 %v3660_v18  ;;  %1113 = vmatpush.msra.mxu1 %v3813_v57 }
 0x253   :  { %1024 = vmatpush.msrb.mxu3 %v3667_v4 }
 0x254   :  { %1094 = vmatpush.msra.mxu0 %v3673_v23  ;;  %1114 = vmatpush.msra.mxu1 %v3821_v8 }
 0x255   :  { %1025 = vmatpush.msrb.mxu3 %v3680_v12 }
 0x256   :  { %1095 = vmatpush.msra.mxu0 %v3686_v25  ;;  %1115 = vmatpush.msra.mxu1 %v3829_v7 }
 0x257   :  { %1026 = vmatpush.msrb.mxu3 %v3835_v9 }
 0x258   :  { %1096 = vmatpush.msra.mxu0 %v3694_v27  ;;  %1116 = vmatpush.msra.mxu1 %v3842_v28 }
 0x259   :  { %1027 = vmatpush.msrb.mxu3 %v3848_v29 }
 0x25a   :  { %1097 = vmatpush.msra.mxu0 %v3702_v26  ;;  %1117 = vmatpush.msra.mxu1 %v3855_v13 }
 0x25b   :  { %1028 = vmatpush.msrb.mxu3 %v3861_v15 }
 0x25c   :  { %1098 = vmatpush.msra.mxu0 %v3710_v51  ;;  %1118 = vmatpush.msra.mxu1 %v3868_v38 }
 0x25d   :  { %1029 = vmatpush.msrb.mxu3 %v3874_v19 }
 0x25e   :  { %1099 = vmatpush.msra.mxu0 %v3718_v55  ;;  %1119 = vmatpush.msra.mxu1 %v3881_v31 }
 0x25f   :  { %1030 = vmatpush.msrb.mxu3 %v3887_v44 }
 0x260   :  { %1100 = vmatpush.msra.mxu0 %v3726_v6  ;;  %1120 = vmatpush.msra.mxu1 %v3894_v34 }
 0x261   :  { %1031 = vmatpush.msrb.mxu3 %v3900_v61 }
 0x262   :  { %1101 = vmatpush.msra.mxu0 %v3734_v14  ;;  %1121 = vmatpush.msra.mxu1 %v3907_v52 }
 0x2bf   :  { %v793_v40 = vpop.f32.mrf.mxu0 }
 0x2c0   :  { %v836_v33 = vadd.f32 %v793_v40, %v3465_v56 }
 0x2c2   :  { %v2434_v22 = vmul.f32 -1.442695, %v836_v33 }
 0x2c4   :  { %2509 = vpow2.f32 %v2434_v22 }
 0x2c5   :  { %v773_v2 = vpop.f32.mrf.mxu3 }
 0x2c6   :  { %v816_v53 = vadd.f32 %v773_v2, %v5494_v20  ;;  %v813_v2 = vpop.f32.mrf.mxu1 }
 0x2c8   :  { %v2433_v5 = vmul.f32 -1.442695, %v816_v53 }
 0x2ca   :  { %v2510_v16 = vpop.eup %2509  ;;  %2511 = vpow2.f32 %v2433_v5  ;;  %v856_v5 = vadd.f32 %v813_v2, %v3454_v24 }
 0x2cb   :  { %v840_v47 = vadd.f32 1.0, %v2510_v16 }
 0x2cd   :  { %2513 = vrcp.f32 %v840_v47  ;;  %v852_v31 = vand.u32 2147483648, %v840_v47  ;;  %vm846_vm0 = vweird.f32 %v840_v47 }
 0x2cf   :  { %v853_v55 = vor.u32 1.1754944e-38, %v852_v31 }
 0x2d0   :  { %v2512_v48 = vpop.eup %2511 }
 0x2d1   :  { %v820_v30 = vadd.f32 1.0, %v2512_v48 }
 0x2d3   :  { %2515 = vrcp.f32 %v820_v30  ;;  %v2514_v21 = vpop.eup %2513  ;;  %v832_v56 = vand.u32 2147483648, %v820_v30  ;;  %v830_v22 = vand.u32 2147483647, %v820_v30  ;;  %vm826_vm12 = vweird.f32 %v820_v30 }
 0x2d4   :  { %v842_v14 = vmul.f32 %v2514_v21, %v840_v47  ;;  %vm847_vm15 = vweird.f32 %v2514_v21 }
 0x2d5   :  { %v833_v16 = vor.u32 1.1754944e-38, %v832_v56  ;;  %vm831_vm14 = vcmp.eq.f32.partialorder %v830_v22, 8.507059e+37  ;;  %vm848_vm1 = vmor %vm846_vm0, %vm847_vm15 }
 0x2d6   :  { %v843_v34 = vsub.f32 1.0, %v842_v14 }
 0x2d8   :  { %v844_v33 = vmul.f32 %v2514_v21, %v843_v34 }
 0x2d9   :  { %v2516_v61 = vpop.eup %2515 }
 0x2da   :  { %v822_v52 = vmul.f32 %v2516_v61, %v820_v30  ;;  %vm827_vm11 = vweird.f32 %v2516_v61  ;;  %v845_v44 = vadd.f32 %v2514_v21, %v844_v33 }
 0x2db   :  { %vm828_vm13 = vmor %vm826_vm12, %vm827_vm11 }
 0x2dc   :  { %v823_v6 = vsub.f32 1.0, %v822_v52  ;;  %v850_v52 = vand.u32 2147483647, %v840_v47  ;;  %v849_v34 = vsel %vm848_vm1, %v2514_v21, %v845_v44  ;;  %v5496_v21 = vld [vmem:[#allocation3_spill] sm:$0xff] }
 0x2de   :  { %v824_v40 = vmul.f32 %v2516_v61, %v823_v6  ;;  %vm851_vm2 = vcmp.eq.f32.partialorder %v850_v52, 8.507059e+37 }
 0x2df   :  { %v854_v30 = vsel %vm851_vm2, %v853_v55, %v849_v34 }
 0x2e0   :  { %v825_v53 = vadd.f32 %v2516_v61, %v824_v40  ;;  %v860_v56 = vsub.f32 1.0, %v854_v30  ;;  %v862_v33 = vmul.f32 %v854_v30, %v3747_v32 }
 0x2e2   :  { %v829_v48 = vsel %vm828_vm13, %v2516_v61, %v825_v53  ;;  %v34_v61 = vld [vmem:[%s5395_s1 + $0x18] sm:$0xff] }
 0x2e3   :  { %v834_v20 = vsel %vm831_vm14, %v833_v16, %v829_v48  ;;  %vm864_vm3 = vcmp.gt.f32.partialorder %v34_v61, 0.5  ;;  %v5506_v61 = vld [vmem:[#allocation23_spill] sm:$0xff] }
 0x2e4   :  { %v857_v14 = vmul.f32 %v856_v5, %v834_v20 }
 0x2e6   :  { %v858_v6 = vadd.f32 %v857_v14, %v3468_v39  ;;  %v5495_v39 = vld [vmem:[#allocation2_spill] sm:$0xff] }
 0x2e8   :  { %2517 = vtanh.f32 %v858_v6 }
 0x2ee   :  { %v2518_v40 = vpop.eup %2517 }
 0x2ef   :  { %v861_v22 = vmul.f32 %v2518_v40, %v860_v56 }
 0x2f1   :  { %v863_v2 = vadd.f32 %v862_v33, %v861_v22 }
 0x2f3   :  { %v3919_v47 = vsel %vm864_vm3, %v863_v2, %v3747_v32  ;;  %v35_v2 = vld [vmem:[%s5395_s1 + $0x20] sm:$0xff] }
 0x2f4   :  { %882 = vmatmul.f32.vlgmr.msra.gmra.mxu2 %v3919_v47  ;;  %902 = vmatmul.f32.vlgmr.msra.gmra.mxu3 %v3919_v47  ;;  %vm974_vm12 = vcmp.gt.f32.partialorder %v35_v2, 0.5 }
 0x2f5   :  { %922 = vmatmul.f32.vlgmr.msrb.gmra.mxu0 %v3919_v47  ;;  %1126 = vmatpush.msra.mxu2 %v3563_v37 }
 0x2f6   :  { %1196 = vmatpush.msra.mxu3 %v3569_v0  ;;  %1216 = vmatpush.msrb.mxu0 %v3757_v41  ;;  %v5497_v0 = vld [vmem:[#allocation8_spill] sm:$0xff] }
 0x2f7   :  { %1127 = vmatpush.msra.mxu2 %v3576_v60 }
 0x2f8   :  { %1197 = vmatpush.msra.mxu3 %v3582_v58  ;;  %1217 = vmatpush.msrb.mxu0 %v3765_v43  ;;  %v5498_v58 = vld [vmem:[#allocation7_spill] sm:$0xff] }
 0x2f9   :  { %1128 = vmatpush.msra.mxu2 %v3589_v42 }
 0x2fa   :  { %1198 = vmatpush.msra.mxu3 %v3595_v63  ;;  %1218 = vmatpush.msrb.mxu0 %v3773_v35  ;;  %v5499_v63 = vld [vmem:[#allocation11_spill] sm:$0xff] }
 0x2fb   :  { %1129 = vmatpush.msra.mxu2 %v3602_v46 }
 0x2fc   :  { %1199 = vmatpush.msra.mxu3 %v3608_v10  ;;  %1219 = vmatpush.msrb.mxu0 %v3781_v45  ;;  %v5500_v10 = vld [vmem:[#allocation18_spill] sm:$0xff] }
 0x2fd   :  { %1130 = vmatpush.msra.mxu2 %v3615_v50 }
 0x2fe   :  { %1200 = vmatpush.msra.mxu3 %v3621_v1  ;;  %1220 = vmatpush.msrb.mxu0 %v3789_v17  ;;  %v5501_v1 = vld [vmem:[#allocation5_spill] sm:$0xff] }
 0x2ff   :  { %1131 = vmatpush.msra.mxu2 %v3628_v54 }
 0x300   :  { %1201 = vmatpush.msra.mxu3 %v3634_v3  ;;  %1221 = vmatpush.msrb.mxu0 %v3797_v36  ;;  %v5502_v3 = vld [vmem:[#allocation20_spill] sm:$0xff] }
 0x301   :  { %1132 = vmatpush.msra.mxu2 %v3641_v59 }
 0x302   :  { %1202 = vmatpush.msra.mxu3 %v3647_v11  ;;  %1222 = vmatpush.msrb.mxu0 %v3805_v49  ;;  %v5503_v11 = vld [vmem:[#allocation9_spill] sm:$0xff] }
 0x303   :  { %1133 = vmatpush.msra.mxu2 %v3654_v62 }
 0x304   :  { %1203 = vmatpush.msra.mxu3 %v3660_v18  ;;  %1223 = vmatpush.msrb.mxu0 %v3813_v57  ;;  %v5504_v18 = vld [vmem:[#allocation10_spill] sm:$0xff] }
 0x305   :  { %1134 = vmatpush.msra.mxu2 %v3667_v4 }
 0x306   :  { %1204 = vmatpush.msra.mxu3 %v3673_v23  ;;  %1224 = vmatpush.msrb.mxu0 %v3821_v8  ;;  %v332_v23 = vadd.f32 %v5504_v18, %v5503_v11 }
 0x307   :  { %1135 = vmatpush.msra.mxu2 %v3680_v12 }
 0x308   :  { %1205 = vmatpush.msra.mxu3 %v3686_v25  ;;  %1225 = vmatpush.msrb.mxu0 %v3829_v7 }
 0x309   :  { %1136 = vmatpush.msra.mxu2 %v3835_v9 }
 0x30a   :  { %1206 = vmatpush.msra.mxu3 %v3694_v27  ;;  %1226 = vmatpush.msrb.mxu0 %v3842_v28 }
 0x30b   :  { %1137 = vmatpush.msra.mxu2 %v3848_v29 }
 0x30c   :  { %1207 = vmatpush.msra.mxu3 %v3702_v26  ;;  %1227 = vmatpush.msrb.mxu0 %v3855_v13 }
 0x30d   :  { %1138 = vmatpush.msra.mxu2 %v3861_v15 }
 0x30e   :  { %1208 = vmatpush.msra.mxu3 %v3710_v51  ;;  %1228 = vmatpush.msrb.mxu0 %v3868_v38  ;;  %v5505_v51 = vld [vmem:[#allocation22_spill] sm:$0xff] }
 0x30f   :  { %1139 = vmatpush.msra.mxu2 %v3874_v19 }
 0x310   :  { %1209 = vmatpush.msra.mxu3 %v5495_v39  ;;  %1229 = vmatpush.msrb.mxu0 %v5496_v21 }
 0x311   :  { %1140 = vmatpush.msra.mxu2 %v5497_v0 }
 0x312   :  { %1210 = vmatpush.msra.mxu3 %v5498_v58  ;;  %1230 = vmatpush.msrb.mxu0 %v5499_v63 }
 0x313   :  { %1141 = vmatpush.msra.mxu2 %v5500_v10 }
 0x314   :  { %1211 = vmatpush.msra.mxu3 %v5501_v1  ;;  %1231 = vmatpush.msrb.mxu0 %v5502_v3 }
 0x372   :  { %v923_v44 = vpop.f32.mrf.mxu0 }
 0x373   :  { %v966_v48 = vadd.f32 %v923_v44, %v3454_v24 }
 0x377   :  { %v883_v25 = vpop.f32.mrf.mxu2  ;;  %v903_v27 = vpop.f32.mrf.mxu3 }
 0x378   :  { %v926_v26 = vadd.f32 %v883_v25, %v332_v23  ;;  %v946_v55 = vadd.f32 %v903_v27, %v5505_v51 }
 0x37a   :  { %v2435_v32 = vmul.f32 -1.442695, %v926_v26  ;;  %v2436_v41 = vmul.f32 -1.442695, %v946_v55 }
 0x37c   :  { %2519 = vpow2.f32 %v2435_v32 }
 0x37d   :  { %2521 = vpow2.f32 %v2436_v41 }
 0x382   :  { %v2520_v43 = vpop.eup %2519 }
 0x383   :  { %v2522_v35 = vpop.eup %2521  ;;  %v930_v45 = vadd.f32 1.0, %v2520_v43 }
 0x384   :  { %v950_v17 = vadd.f32 1.0, %v2522_v35 }
 0x385   :  { %2523 = vrcp.f32 %v930_v45  ;;  %v942_v28 = vand.u32 2147483648, %v930_v45  ;;  %v940_v31 = vand.u32 2147483647, %v930_v45  ;;  %vm936_vm5 = vweird.f32 %v930_v45 }
 0x386   :  { %2525 = vrcp.f32 %v950_v17  ;;  %v962_v34 = vand.u32 2147483648, %v950_v17  ;;  %vm956_vm9 = vweird.f32 %v950_v17  ;;  %v960_v30 = vand.u32 2147483647, %v950_v17 }
 0x387   :  { %v943_v5 = vor.u32 1.1754944e-38, %v942_v28  ;;  %vm941_vm7 = vcmp.eq.f32.partialorder %v940_v31, 8.507059e+37 }
 0x388   :  { %v963_v22 = vor.u32 1.1754944e-38, %v962_v34  ;;  %vm961_vm11 = vcmp.eq.f32.partialorder %v960_v30, 8.507059e+37 }
 0x38b   :  { %v2524_v36 = vpop.eup %2523 }
 0x38c   :  { %v2526_v49 = vpop.eup %2525  ;;  %v932_v57 = vmul.f32 %v2524_v36, %v930_v45  ;;  %vm937_vm4 = vweird.f32 %v2524_v36 }
 0x38d   :  { %v952_v8 = vmul.f32 %v2526_v49, %v950_v17  ;;  %vm938_vm6 = vmor %vm936_vm5, %vm937_vm4  ;;  %vm957_vm8 = vweird.f32 %v2526_v49 }
 0x38e   :  { %v933_v7 = vsub.f32 1.0, %v932_v57  ;;  %vm958_vm10 = vmor %vm956_vm9, %vm957_vm8 }
 0x38f   :  { %v953_v13 = vsub.f32 1.0, %v952_v8 }
 0x390   :  { %v934_v38 = vmul.f32 %v2524_v36, %v933_v7 }
 0x391   :  { %v954_v53 = vmul.f32 %v2526_v49, %v953_v13 }
 0x392   :  { %v935_v16 = vadd.f32 %v2524_v36, %v934_v38  ;;  %v36_v38 = vld [vmem:[%s5395_s1 + $0x28] sm:$0xff] }
 0x393   :  { %v955_v52 = vadd.f32 %v2526_v49, %v954_v53  ;;  %vm1084_vm5 = vcmp.gt.f32.partialorder %v36_v38, 0.5  ;;  %v243_v38 = vld [vmem:[%s5396_s4 + $0x40] sm:$0xff] }
 0x394   :  { %v939_v20 = vsel %vm938_vm6, %v2524_v36, %v935_v16 }
 0x395   :  { %v944_v14 = vsel %vm941_vm7, %v943_v5, %v939_v20  ;;  %v959_v40 = vsel %vm958_vm10, %v2526_v49, %v955_v52  ;;  %v5509_v49 = vld [vmem:[#allocation25_spill] sm:$0xff] }
 0x396   :  { %v967_v6 = vmul.f32 %v966_v48, %v944_v14  ;;  %v964_v33 = vsel %vm961_vm11, %v963_v22, %v959_v40  ;;  %v5510_v14 = vld [vmem:[#allocation14_spill] sm:$0xff] }
 0x397   :  { %v970_v39 = vsub.f32 1.0, %v964_v33  ;;  %v972_v63 = vmul.f32 %v964_v33, %v3919_v47 }
 0x398   :  { %v968_v56 = vadd.f32 %v967_v6, %v5506_v61  ;;  %v5511_v6 = vld [vmem:[#allocation26_spill] sm:$0xff] }
 0x39a   :  { %2527 = vtanh.f32 %v968_v56 }
 0x3a0   :  { %v2528_v21 = vpop.eup %2527 }
 0x3a1   :  { %v971_v58 = vmul.f32 %v2528_v21, %v970_v39 }
 0x3a3   :  { %v973_v1 = vadd.f32 %v972_v63, %v971_v58 }
 0x3a5   :  { %v3982_v3 = vsel %vm974_vm12, %v973_v1, %v3919_v47 }
 0x3a6   :  { %992 = vmatmul.f32.vlgmr.msrb.gmra.mxu1 %v3982_v3  ;;  %1012 = vmatmul.f32.vlgmr.msrb.gmra.mxu2 %v3982_v3 }
 0x3a7   :  { %1032 = vmatmul.f32.vlgmr.msrb.gmra.mxu3 %v3982_v3  ;;  %1236 = vmatpush.msrb.mxu1 %v3563_v37 }
 0x3a9   :  { %1237 = vmatpush.msrb.mxu1 %v3576_v60  ;;  %v5507_v60 = vld [vmem:[#allocation12_spill] sm:$0xff] }
 0x3ab   :  { %1238 = vmatpush.msrb.mxu1 %v3589_v42 }
 0x3ad   :  { %1239 = vmatpush.msrb.mxu1 %v3602_v46 }
 0x3af   :  { %1240 = vmatpush.msrb.mxu1 %v3615_v50 }
 0x3b1   :  { %1241 = vmatpush.msrb.mxu1 %v3628_v54  ;;  %v5508_v54 = vld [vmem:[#allocation24_spill] sm:$0xff] }
 0x3b3   :  { %1242 = vmatpush.msrb.mxu1 %v3641_v59 }
 0x3b5   :  { %1243 = vmatpush.msrb.mxu1 %v3654_v62 }
 0x3b7   :  { %1244 = vmatpush.msrb.mxu1 %v3667_v4 }
 0x3b9   :  { %1245 = vmatpush.msrb.mxu1 %v3680_v12 }
 0x3bb   :  { %1246 = vmatpush.msrb.mxu1 %v3835_v9 }
 0x3bd   :  { %1247 = vmatpush.msrb.mxu1 %v3848_v29 }
 0x3bf   :  { %1248 = vmatpush.msrb.mxu1 %v3861_v15 }
 0x3c1   :  { %1249 = vmatpush.msrb.mxu1 %v3874_v19 }
 0x3c3   :  { %1250 = vmatpush.msrb.mxu1 %v5497_v0 }
 0x3c5   :  { %1251 = vmatpush.msrb.mxu1 %v5500_v10 }
 0x423   :  { %v993_v37 = vpop.f32.mrf.mxu1 }
 0x424   :  { %v1036_v42 = vadd.f32 %v993_v37, %v5507_v60 }
 0x426   :  { %v2437_v46 = vmul.f32 -1.442695, %v1036_v42 }
 0x428   :  { %2529 = vpow2.f32 %v2437_v46 }
 0x429   :  { %v1013_v50 = vpop.f32.mrf.mxu2 }
 0x42a   :  { %v1056_v59 = vadd.f32 %v1013_v50, %v5508_v54  ;;  %v1033_v23 = vpop.f32.mrf.mxu3 }
 0x42b   :  { %v1076_v32 = vadd.f32 %v1033_v23, %v3454_v24  ;;  %v37_v23 = vld [vmem:[%s5395_s1 + $0x30] sm:$0xff] }
 0x42c   :  { %v2438_v62 = vmul.f32 -1.442695, %v1056_v59 }
 0x42e   :  { %v2530_v4 = vpop.eup %2529  ;;  %2531 = vpow2.f32 %v2438_v62 }
 0x42f   :  { %v1040_v12 = vadd.f32 1.0, %v2530_v4 }
 0x431   :  { %2533 = vrcp.f32 %v1040_v12  ;;  %v1052_v0 = vand.u32 2147483648, %v1040_v12  ;;  %v1050_v11 = vand.u32 2147483647, %v1040_v12  ;;  %vm1046_vm14 = vweird.f32 %v1040_v12 }
 0x433   :  { %v1053_v26 = vor.u32 1.1754944e-38, %v1052_v0  ;;  %vm1051_vm0 = vcmp.eq.f32.partialorder %v1050_v11, 8.507059e+37 }
 0x434   :  { %v2532_v9 = vpop.eup %2531 }
 0x435   :  { %v1060_v29 = vadd.f32 1.0, %v2532_v9 }
 0x437   :  { %v2534_v15 = vpop.eup %2533  ;;  %2535 = vrcp.f32 %v1060_v29  ;;  %v1072_v35 = vand.u32 2147483648, %v1060_v29  ;;  %v1070_v17 = vand.u32 2147483647, %v1060_v29  ;;  %vm1066_vm2 = vweird.f32 %v1060_v29 }
 0x438   :  { %v1042_v19 = vmul.f32 %v2534_v15, %v1040_v12  ;;  %vm1047_vm13 = vweird.f32 %v2534_v15 }
 0x439   :  { %vm1048_vm15 = vmor %vm1046_vm14, %vm1047_vm13  ;;  %v1073_v8 = vor.u32 1.1754944e-38, %v1072_v35  ;;  %vm1071_vm4 = vcmp.eq.f32.partialorder %v1070_v17, 8.507059e+37  ;;  %vm1194_vm14 = vcmp.gt.f32.partialorder %v37_v23, 0.5  ;;  %v247_v35 = vld [vmem:[%s5396_s4 + $0x60] sm:$0xff]  ;;  %v5513_v17 = vld [vmem:[#allocation17_spill] sm:$0xff] }
 0x43a   :  { %v1043_v47 = vsub.f32 1.0, %v1042_v19  ;;  %v5512_v19 = vld [vmem:[#allocation27_spill] sm:$0xff]  ;;  %v175_v23 = vld [vmem:[%s5392_s2 + $0x440] sm:$0xff] }
 0x43c   :  { %v1044_v10 = vmul.f32 %v2534_v15, %v1043_v47 }
 0x43d   :  { %v2536_v18 = vpop.eup %2535 }
 0x43e   :  { %v1062_v25 = vmul.f32 %v2536_v18, %v1060_v29  ;;  %v1045_v27 = vadd.f32 %v2534_v15, %v1044_v10  ;;  %vm1067_vm1 = vweird.f32 %v2536_v18 }
 0x43f   :  { %vm1068_vm3 = vmor %vm1066_vm2, %vm1067_vm1 }
 0x440   :  { %v1063_v51 = vsub.f32 1.0, %v1062_v25  ;;  %v1049_v55 = vsel %vm1048_vm15, %v2534_v15, %v1045_v27 }
 0x441   :  { %v1054_v41 = vsel %vm1051_vm0, %v1053_v26, %v1049_v55 }
 0x442   :  { %v1064_v43 = vmul.f32 %v2536_v18, %v1063_v51  ;;  %v1077_v45 = vmul.f32 %v1076_v32, %v1054_v41  ;;  %v250_v32 = vld [vmem:[%s5396_s4 + $0x78] sm:$0xff]  ;;  %v249_v41 = vld [vmem:[%s5396_s4 + $0x70] sm:$0xff] }
 0x443   :  { %1307 = vmatpush.msrb.mxu2 %v250_v32  ;;  %v172_v32 = vld [vmem:[%s5392_s2 + $0x428] sm:$0xff] }
 0x444   :  { %v1065_v36 = vadd.f32 %v2536_v18, %v1064_v43  ;;  %v1078_v57 = vadd.f32 %v1077_v45, %v5509_v49  ;;  %v248_v43 = vld [vmem:[%s5396_s4 + $0x68] sm:$0xff]  ;;  %v246_v45 = vld [vmem:[%s5396_s4 + $0x58] sm:$0xff] }
 0x445   :  { %1308 = vmatpush.msrb.mxu2 %v249_v41 }
 0x446   :  { %v1069_v7 = vsel %vm1068_vm3, %v2536_v18, %v1065_v36  ;;  %2537 = vtanh.f32 %v1078_v57  ;;  %v5514_v36 = vld [vmem:[#allocation6_spill] sm:$0xff] }
 0x447   :  { %v1074_v28 = vsel %vm1071_vm4, %v1073_v8, %v1069_v7  ;;  %1309 = vmatpush.msrb.mxu2 %v248_v43  ;;  %v382_v49 = vadd.f32 %v5514_v36, %v5513_v17  ;;  %v245_v8 = vld [vmem:[%s5396_s4 + $0x50] sm:$0xff] }
 0x448   :  { %v1080_v13 = vsub.f32 1.0, %v1074_v28  ;;  %v1082_v53 = vmul.f32 %v1074_v28, %v3982_v3  ;;  %v244_v28 = vld [vmem:[%s5396_s4 + $0x48] sm:$0xff] }
 0x449   :  { %1310 = vmatpush.msrb.mxu2 %v247_v35  ;;  %v274_v35 = vld [vmem:[%s5396_s4 + $0x138] sm:$0xff] }
 0x44b   :  { %1311 = vmatpush.msrb.mxu2 %v246_v45  ;;  %v156_v45 = vld [vmem:[%s5392_s2 + $0x3a8] sm:$0xff] }
 0x44c   :  { %v2538_v31 = vpop.eup %2537 }
 0x44d   :  { %v1081_v44 = vmul.f32 %v2538_v31, %v1080_v13  ;;  %1312 = vmatpush.msrb.mxu2 %v245_v8  ;;  %v242_v31 = vld [vmem:[%s5396_s4 + $0x38] sm:$0xff] }
 0x44f   :  { %v1083_v16 = vadd.f32 %v1082_v53, %v1081_v44  ;;  %1313 = vmatpush.msrb.mxu2 %v244_v28  ;;  %v241_v53 = vld [vmem:[%s5396_s4 + $0x30] sm:$0xff] }
 0x451   :  { %v1085_v5 = vsel %vm1084_vm5, %v1083_v16, %v3982_v3  ;;  %1314 = vmatpush.msrb.mxu2 %v243_v38  ;;  %v5515_v16 = vld [vmem:[#allocation16_spill] sm:$0xff] }
 0x452   :  { %1102 = vmatmul.f32.vlgmr.msra.gmra.mxu0 %v1085_v5  ;;  %1122 = vmatmul.f32.vlgmr.msra.gmra.mxu1 %v1085_v5  ;;  %v153_v38 = vld [vmem:[%s5392_s2 + $0x390] sm:$0xff] }
 0x453   :  { %1142 = vmatmul.f32.vlgmr.msra.gmra.mxu2 %v1085_v5 }
 0x454   :  { %1315 = vmatpush.msrb.mxu2 %v242_v31 }
 0x456   :  { %1316 = vmatpush.msrb.mxu2 %v241_v53  ;;  %v137_v53 = vld [vmem:[%s5392_s2 + $0x310] sm:$0xff] }
 0x4cf   :  { %v1103_v48 = vpop.f32.mrf.mxu0  ;;  %v1123_v20 = vpop.f32.mrf.mxu1 }
 0x4d0   :  { %v1146_v52 = vadd.f32 %v1103_v48, %v5510_v14  ;;  %v1166_v34 = vadd.f32 %v1123_v20, %v5511_v6  ;;  %v240_v48 = vld [vmem:[%s5396_s4 + $0x28] sm:$0xff]  ;;  %v239_v14 = vld [vmem:[%s5396_s4 + $0x20] sm:$0xff] }
 0x4d1   :  { %1317 = vmatpush.msrb.mxu2 %v240_v48  ;;  %v150_v48 = vld [vmem:[%s5392_s2 + $0x378] sm:$0xff] }
 0x4d2   :  { %v2439_v30 = vmul.f32 -1.442695, %v1146_v52  ;;  %v2440_v61 = vmul.f32 -1.442695, %v1166_v34  ;;  %v238_v34 = vld [vmem:[%s5396_s4 + $0x18] sm:$0xff] }
 0x4d3   :  { %1318 = vmatpush.msrb.mxu2 %v239_v14  ;;  %v163_v14 = vld [vmem:[%s5392_s2 + $0x3e0] sm:$0xff] }
 0x4d4   :  { %2539 = vpow2.f32 %v2439_v30  ;;  %v237_v30 = vld [vmem:[%s5396_s4 + $0x10] sm:$0xff] }
 0x4d5   :  { %2541 = vpow2.f32 %v2440_v61  ;;  %1319 = vmatpush.msrb.mxu2 %v238_v34  ;;  %v236_v61 = vld [vmem:[%s5396_s4 + $0x8] sm:$0xff]  ;;  %v147_v34 = vld [vmem:[%s5392_s2 + $0x360] sm:$0xff] }
 0x4d6   :  { %v1143_v46 = vpop.f32.mrf.mxu2 }
 0x4d7   :  { %v1186_v62 = vadd.f32 %v1143_v46, %v3454_v24  ;;  %1320 = vmatpush.msrb.mxu2 %v237_v30  ;;  %v160_v30 = vld [vmem:[%s5392_s2 + $0x3c8] sm:$0xff] }
 0x4d9   :  { %1321 = vmatpush.msrb.mxu2 %v236_v61 }
 0x4da   :  { %v2540_v56 = vpop.eup %2539 }
 0x4db   :  { %v2542_v40 = vpop.eup %2541  ;;  %v1150_v22 = vadd.f32 1.0, %v2540_v56 }
 0x4dc   :  { %v1170_v33 = vadd.f32 1.0, %v2542_v40 }
 0x4dd   :  { %2543 = vrcp.f32 %v1150_v22  ;;  %v1162_v3 = vand.u32 2147483648, %v1150_v22  ;;  %v1160_v60 = vand.u32 2147483647, %v1150_v22  ;;  %vm1156_vm7 = vweird.f32 %v1150_v22 }
 0x4de   :  { %2545 = vrcp.f32 %v1170_v33  ;;  %v1182_v9 = vand.u32 2147483648, %v1170_v33  ;;  %vm1176_vm11 = vweird.f32 %v1170_v33  ;;  %v1180_v15 = vand.u32 2147483647, %v1170_v33 }
 0x4df   :  { %v1163_v54 = vor.u32 1.1754944e-38, %v1162_v3  ;;  %vm1161_vm9 = vcmp.eq.f32.partialorder %v1160_v60, 8.507059e+37  ;;  %v171_v60 = vld [vmem:[%s5392_s2 + $0x420] sm:$0xff] }
 0x4e0   :  { %v1183_v10 = vor.u32 1.1754944e-38, %v1182_v9  ;;  %vm1181_vm13 = vcmp.eq.f32.partialorder %v1180_v15, 8.507059e+37  ;;  %v181_v9 = vld [vmem:[%s5392_s2 + $0x470] sm:$0xff]  ;;  %v178_v15 = vld [vmem:[%s5392_s2 + $0x458] sm:$0xff] }
 0x4e3   :  { %v2544_v2 = vpop.eup %2543 }
 0x4e4   :  { %v2546_v39 = vpop.eup %2545  ;;  %v1152_v21 = vmul.f32 %v2544_v2, %v1150_v22  ;;  %vm1157_vm6 = vweird.f32 %v2544_v2  ;;  %v235_v22 = vld [vmem:[%s5396_s4] sm:$0xff] }
 0x4e5   :  { %v1172_v58 = vmul.f32 %v2546_v39, %v1170_v33  ;;  %vm1158_vm8 = vmor %vm1156_vm7, %vm1157_vm6  ;;  %vm1177_vm10 = vweird.f32 %v2546_v39  ;;  %1322 = vmatpush.msrb.mxu2 %v235_v22  ;;  %v157_v22 = vld [vmem:[%s5392_s2 + $0x3b0] sm:$0xff] }
 0x4e6   :  { %v1153_v63 = vsub.f32 1.0, %v1152_v21  ;;  %vm1178_vm12 = vmor %vm1176_vm11, %vm1177_vm10  ;;  %v281_v21 = vld [vmem:[%s5396_s4 + $0x170] sm:$0xff] }
 0x4e7   :  { %v1173_v1 = vsub.f32 1.0, %v1172_v58  ;;  %v177_v58 = vld [vmem:[%s5392_s2 + $0x450] sm:$0xff]  ;;  %1433 = vmatpush.msra.mxu2 %v181_v9  ;;  %v179_v9 = vld [vmem:[%s5392_s2 + $0x460] sm:$0xff] }
 0x4e8   :  { %v1154_v37 = vmul.f32 %v2544_v2, %v1153_v63  ;;  %v280_v63 = vld [vmem:[%s5396_s4 + $0x168] sm:$0xff] }
 0x4e9   :  { %v1174_v42 = vmul.f32 %v2546_v39, %v1173_v1  ;;  %v174_v1 = vld [vmem:[%s5392_s2 + $0x438] sm:$0xff]  ;;  %1434 = vmatpush.msra.mxu2 %v178_v15  ;;  %v145_v15 = vld [vmem:[%s5392_s2 + $0x350] sm:$0xff] }
 0x4ea   :  { %v1155_v50 = vadd.f32 %v2544_v2, %v1154_v37  ;;  %v279_v37 = vld [vmem:[%s5396_s4 + $0x160] sm:$0xff] }
 0x4eb   :  { %v1175_v4 = vadd.f32 %v2546_v39, %v1174_v42  ;;  %1435 = vmatpush.msra.mxu2 %v175_v23  ;;  %v4291_v23 = vld [vmem:[%s5392_s2 + $0x578] sm:$0xff] }
 0x4ec   :  { %v1159_v59 = vsel %vm1158_vm8, %v2544_v2, %v1155_v50  ;;  %v282_v2 = vld [vmem:[%s5396_s4 + $0x178] sm:$0xff] }
 0x4ed   :  { %v1164_v12 = vsel %vm1161_vm9, %v1163_v54, %v1159_v59  ;;  %v1179_v0 = vsel %vm1178_vm12, %v2546_v39, %v1175_v4  ;;  %v180_v39 = vld [vmem:[%s5392_s2 + $0x468] sm:$0xff]  ;;  %1332 = vmatpush.msrb.mxu3 %v282_v2  ;;  %v278_v50 = vld [vmem:[%s5396_s4 + $0x158] sm:$0xff]  ;;  %v277_v4 = vld [vmem:[%s5396_s4 + $0x150] sm:$0xff]  ;;  %1436 = vmatpush.msra.mxu2 %v172_v32 }
 0x4ee   :  { %v1187_v29 = vmul.f32 %v1186_v62, %v1164_v12  ;;  %v1184_v11 = vsel %vm1181_vm13, %v1183_v10, %v1179_v0  ;;  %1413 = vmatpush.msra.mxu1 %v180_v39  ;;  %v168_v54 = vld [vmem:[%s5392_s2 + $0x408] sm:$0xff]  ;;  %v165_v12 = vld [vmem:[%s5392_s2 + $0x3f0] sm:$0xff]  ;;  %v162_v10 = vld [vmem:[%s5392_s2 + $0x3d8] sm:$0xff] }
 0x4ef   :  { %v1190_v18 = vsub.f32 1.0, %v1184_v11  ;;  %v1192_v26 = vmul.f32 %v1184_v11, %v1085_v5  ;;  %1333 = vmatpush.msrb.mxu3 %v281_v21  ;;  %v276_v0 = vld [vmem:[%s5396_s4 + $0x148] sm:$0xff]  ;;  %v141_v2 = vld [vmem:[%s5392_s2 + $0x330] sm:$0xff]  ;;  %v38_v39 = vld [vmem:[%s5395_s1 + $0x38] sm:$0xff] }
 0x4f0   :  { %v1188_v47 = vadd.f32 %v1187_v29, %v5512_v19  ;;  %1414 = vmatpush.msra.mxu1 %v177_v58  ;;  %v154_v58 = vld [vmem:[%s5392_s2 + $0x398] sm:$0xff]  ;;  %vm1304_vm7 = vcmp.gt.f32.partialorder %v38_v39, 0.5 }
 0x4f1   :  { %1334 = vmatpush.msrb.mxu3 %v280_v63  ;;  %v158_v32 = vld [vmem:[%s5392_s2 + $0x3b8] sm:$0xff] }
 0x4f2   :  { %2547 = vtanh.f32 %v1188_v47  ;;  %1415 = vmatpush.msra.mxu1 %v174_v1  ;;  %v268_v1 = vld [vmem:[%s5396_s4 + $0x108] sm:$0xff] }
 0x4f3   :  { %1335 = vmatpush.msrb.mxu3 %v279_v37 }
 0x4f4   :  { %1416 = vmatpush.msra.mxu1 %v171_v60 }
 0x4f5   :  { %1336 = vmatpush.msrb.mxu3 %v278_v50  ;;  %v135_v50 = vld [vmem:[%s5392_s2 + $0x300] sm:$0xff] }
 0x4f6   :  { %1417 = vmatpush.msra.mxu1 %v168_v54 }
 0x4f7   :  { %1337 = vmatpush.msrb.mxu3 %v277_v4  ;;  %v148_v4 = vld [vmem:[%s5392_s2 + $0x368] sm:$0xff] }
 0x4f8   :  { %v2548_v25 = vpop.eup %2547  ;;  %1418 = vmatpush.msra.mxu1 %v165_v12 }
 0x4f9   :  { %v1191_v27 = vmul.f32 %v2548_v25, %v1190_v18  ;;  %1338 = vmatpush.msrb.mxu3 %v276_v0  ;;  %v4273_v0 = vld [vmem:[%s5392_s2 + $0x5a8] sm:$0xff] }
 0x4fa   :  { %1419 = vmatpush.msra.mxu1 %v162_v10  ;;  %v170_v10 = vld [vmem:[%s5392_s2 + $0x418] sm:$0xff] }
 0x4fb   :  { %v1193_v51 = vadd.f32 %v1192_v26, %v1191_v27  ;;  %v275_v27 = vld [vmem:[%s5396_s4 + $0x140] sm:$0xff] }
 0x4fc   :  { %v159_v26 = vld [vmem:[%s5392_s2 + $0x3c0] sm:$0xff]  ;;  %1339 = vmatpush.msrb.mxu3 %v275_v27 }
 0x4fd   :  { %v4019_v55 = vsel %vm1194_vm14, %v1193_v51, %v1085_v5  ;;  %1420 = vmatpush.msra.mxu1 %v159_v26  ;;  %v4300_v27 = vld [vmem:[%s5392_s2 + $0x560] sm:$0xff]  ;;  %v161_v26 = vld [vmem:[%s5392_s2 + $0x3d0] sm:$0xff] }
 0x4fe   :  { %1212 = vmatmul.f32.vlgmr.msra.gmra.mxu3 %v4019_v55  ;;  %1232 = vmatmul.f32.vlgmr.msrb.gmra.mxu0 %v4019_v55 }
 0x4ff   :  { %1252 = vmatmul.f32.vlgmr.msrb.gmra.mxu1 %v4019_v55  ;;  %1340 = vmatpush.msrb.mxu3 %v274_v35  ;;  %v155_v35 = vld [vmem:[%s5392_s2 + $0x3a0] sm:$0xff] }
 0x500   :  { %1421 = vmatpush.msra.mxu1 %v156_v45  ;;  %v4331_v45 = vld [vmem:[%s5392_s2 + $0x518] sm:$0xff] }
 0x502   :  { %1422 = vmatpush.msra.mxu1 %v153_v38  ;;  %v4372_v38 = vld [vmem:[%s5392_s2 + $0x4b8] sm:$0xff] }
 0x503   :  { %5520 = vst [vmem:[#allocation13_spill] sm:$0xff] %v4372_v38 }
 0x504   :  { %1423 = vmatpush.msra.mxu1 %v150_v48  ;;  %v297_v48 = vld [vmem:[%s5396_s4 + $0x1f0] sm:$0xff] }
 0x506   :  { %1424 = vmatpush.msra.mxu1 %v147_v34  ;;  %v292_v34 = vld [vmem:[%s5396_s4 + $0x1c8] sm:$0xff] }
 0x57b   :  { %v1233_v57 = vpop.f32.mrf.mxu0 }
 0x57c   :  { %v1276_v7 = vadd.f32 %v1233_v57, %v382_v49  ;;  %v1253_v18 = vpop.f32.mrf.mxu1  ;;  %v5516_v49 = vld [vmem:[#allocation19_spill] sm:$0xff]  ;;  %v5517_v57 = vld [vmem:[#allocation4_spill] sm:$0xff] }
 0x57d   :  { %v1296_v41 = vadd.f32 %v1253_v18, %v3454_v24  ;;  %v169_v24 = vld [vmem:[%s5392_s2 + $0x410] sm:$0xff]  ;;  %v423_v8 = vadd.f32 %v5517_v57, %v5516_v49  ;;  %v167_v18 = vld [vmem:[%s5392_s2 + $0x400] sm:$0xff]  ;;  %v136_v49 = vld [vmem:[%s5392_s2 + $0x308] sm:$0xff] }
 0x57e   :  { %v2442_v13 = vmul.f32 -1.442695, %v1276_v7  ;;  %1437 = vmatpush.msra.mxu2 %v169_v24  ;;  %v4343_v24 = vld [vmem:[%s5392_s2 + $0x500] sm:$0xff]  ;;  %v149_v57 = vld [vmem:[%s5392_s2 + $0x370] sm:$0xff] }
 0x580   :  { %2549 = vpow2.f32 %v2442_v13  ;;  %v273_v13 = vld [vmem:[%s5396_s4 + $0x130] sm:$0xff] }
 0x581   :  { %v1213_v44 = vpop.f32.mrf.mxu3  ;;  %1341 = vmatpush.msrb.mxu3 %v273_v13  ;;  %v143_v13 = vld [vmem:[%s5392_s2 + $0x340] sm:$0xff] }
 0x582   :  { %v1256_v5 = vadd.f32 %v1213_v44, %v5515_v16  ;;  %v166_v44 = vld [vmem:[%s5392_s2 + $0x3f8] sm:$0xff] }
 0x583   :  { %1438 = vmatpush.msra.mxu2 %v166_v44  ;;  %v4381_v44 = vld [vmem:[%s5392_s2 + $0x4a0] sm:$0xff] }
 0x584   :  { %v2441_v20 = vmul.f32 -1.442695, %v1256_v5  ;;  %v272_v5 = vld [vmem:[%s5396_s4 + $0x128] sm:$0xff]  ;;  %5521 = vst [vmem:[#allocation21_spill] sm:$0xff] %v4381_v44 }
 0x585   :  { %1342 = vmatpush.msrb.mxu3 %v272_v5  ;;  %1439 = vmatpush.msra.mxu2 %v163_v14  ;;  %v298_v5 = vld [vmem:[%s5396_s4 + $0x1f8] sm:$0xff]  ;;  %v295_v14 = vld [vmem:[%s5396_s4 + $0x1e0] sm:$0xff] }
 0x586   :  { %v2550_v52 = vpop.eup %2549  ;;  %2551 = vpow2.f32 %v2441_v20  ;;  %1356 = vmatpush.msra.mxu0 %v298_v5  ;;  %v4633_v5 = vld [vmem:[%s5392_s2 + $0x520] sm:$0xff] }
 0x587   :  { %v4063_v6 = vadd.f32 1.0, %v2550_v52  ;;  %1440 = vmatpush.msra.mxu2 %v160_v30  ;;  %v291_v30 = vld [vmem:[%s5396_s4 + $0x1c0] sm:$0xff] }
 0x588   :  { %1357 = vmatpush.msra.mxu0 %v297_v48  ;;  %v4641_v48 = vld [vmem:[%s5392_s2 + $0x508] sm:$0xff] }
 0x589   :  { %2553 = vrcp.f32 %v4063_v6  ;;  %v1292_v7 = vand.u32 2147483648, %v4063_v6  ;;  %vm1286_vm4 = vweird.f32 %v4063_v6  ;;  %v1290_v31 = vand.u32 2147483647, %v4063_v6  ;;  %1441 = vmatpush.msra.mxu2 %v157_v22  ;;  %v289_v22 = vld [vmem:[%s5396_s4 + $0x1b0] sm:$0xff] }
 0x58b   :  { %v1293_v52 = vor.u32 1.1754944e-38, %v1292_v7  ;;  %vm1291_vm6 = vcmp.eq.f32.partialorder %v1290_v31, 8.507059e+37  ;;  %1442 = vmatpush.msra.mxu2 %v154_v58  ;;  %v146_v7 = vld [vmem:[%s5392_s2 + $0x358] sm:$0xff]  ;;  %v140_v31 = vld [vmem:[%s5392_s2 + $0x328] sm:$0xff] }
 0x58c   :  { %v2552_v56 = vpop.eup %2551 }
 0x58d   :  { %v1260_v40 = vadd.f32 1.0, %v2552_v56  ;;  %v270_v56 = vld [vmem:[%s5396_s4 + $0x118] sm:$0xff] }
 0x58f   :  { %2555 = vrcp.f32 %v1260_v40  ;;  %v4078_v33 = vpop.eup %2553  ;;  %v1272_v29 = vand.u32 2147483648, %v1260_v40  ;;  %v1270_v47 = vand.u32 2147483647, %v1260_v40  ;;  %vm1266_vm0 = vweird.f32 %v1260_v40 }
 0x590   :  { %v1282_v3 = vmul.f32 %v4078_v33, %v4063_v6  ;;  %vm1287_vm3 = vweird.f32 %v4078_v33  ;;  %v271_v6 = vld [vmem:[%s5396_s4 + $0x120] sm:$0xff] }
 0x591   :  { %v1273_v51 = vor.u32 1.1754944e-38, %v1272_v29  ;;  %vm1271_vm2 = vcmp.eq.f32.partialorder %v1270_v47, 8.507059e+37  ;;  %vm4172_vm5 = vmor %vm1286_vm4, %vm1287_vm3  ;;  %1343 = vmatpush.msrb.mxu3 %v271_v6  ;;  %v4252_v29 = vld [vmem:[%s5392_s2 + $0x5d8] sm:$0xff]  ;;  %v173_v47 = vld [vmem:[%s5392_s2 + $0x430] sm:$0xff] }
 0x592   :  { %v1283_v59 = vsub.f32 1.0, %v1282_v3  ;;  %v138_v3 = vld [vmem:[%s5392_s2 + $0x318] sm:$0xff]  ;;  %v293_v6 = vld [vmem:[%s5396_s4 + $0x1d0] sm:$0xff] }
 0x593   :  { %1344 = vmatpush.msrb.mxu3 %v270_v56  ;;  %v4424_v56 = vld [vmem:[%s5394_s3] sm:$0xff] }
 0x594   :  { %v1284_v11 = vmul.f32 %v4078_v33, %v1283_v59  ;;  %v182_v59 = vld [vmem:[%s5392_s2 + $0x478] sm:$0xff] }
 0x595   :  { %v2556_v42 = vpop.eup %2555 }
 0x596   :  { %v1262_v46 = vmul.f32 %v2556_v42, %v1260_v40  ;;  %vm1267_vm15 = vweird.f32 %v2556_v42  ;;  %v1285_v36 = vadd.f32 %v4078_v33, %v1284_v11  ;;  %v144_v40 = vld [vmem:[%s5392_s2 + $0x348] sm:$0xff]  ;;  %v4282_v11 = vld [vmem:[%s5392_s2 + $0x590] sm:$0xff] }
 0x597   :  { %vm1268_vm1 = vmor %vm1266_vm0, %vm1267_vm15  ;;  %1425 = vmatpush.msra.mxu1 %v144_v40  ;;  %v1306_v40 = vperm.slane %v4424_v56, 4 }
 0x598   :  { %v1263_v62 = vsub.f32 1.0, %v1262_v46  ;;  %v1289_v20 = vsel %vm4172_vm5, %v4078_v33, %v1285_v36  ;;  %v269_v33 = vld [vmem:[%s5396_s4 + $0x110] sm:$0xff]  ;;  %v267_v46 = vld [vmem:[%s5396_s4 + $0x100] sm:$0xff]  ;;  %v152_v36 = vld [vmem:[%s5392_s2 + $0x388] sm:$0xff] }
 0x599   :  { %v1294_v61 = vsel %vm1291_vm6, %v1293_v52, %v1289_v20  ;;  %1345 = vmatpush.msrb.mxu3 %v269_v33  ;;  %1426 = vmatpush.msra.mxu1 %v141_v2  ;;  %v296_v20 = vld [vmem:[%s5396_s4 + $0x1e8] sm:$0xff]  ;;  %v294_v52 = vld [vmem:[%s5396_s4 + $0x1d8] sm:$0xff] }
 0x59a   :  { %v1264_v19 = vmul.f32 %v2556_v42, %v1263_v62  ;;  %v1300_v21 = vsub.f32 1.0, %v1294_v61  ;;  %v1302_v60 = vmul.f32 %v1294_v61, %v4019_v55  ;;  %v4240_v62 = vld [vmem:[%s5392_s2 + $0x5f0] sm:$0xff]  ;;  %1358 = vmatpush.msra.mxu0 %v296_v20  ;;  %v290_v61 = vld [vmem:[%s5396_s4 + $0x1b8] sm:$0xff]  ;;  %v288_v2 = vld [vmem:[%s5396_s4 + $0x1a8] sm:$0xff] }
 0x59b   :  { %1346 = vmatpush.msrb.mxu3 %v268_v1  ;;  %1427 = vmatpush.msra.mxu1 %v138_v3  ;;  %v285_v3 = vld [vmem:[%s5396_s4 + $0x190] sm:$0xff] }
 0x59c   :  { %v1265_v25 = vadd.f32 %v2556_v42, %v1264_v19  ;;  %v4264_v19 = vld [vmem:[%s5392_s2 + $0x5c0] sm:$0xff]  ;;  %1359 = vmatpush.msra.mxu0 %v295_v14  ;;  %v4649_v20 = vld [vmem:[%s5392_s2 + $0x4f0] sm:$0xff]  ;;  %v1331_v14 = vperm.slane %v4424_v56, 6 }
 0x59d   :  { %1347 = vmatpush.msrb.mxu3 %v267_v46  ;;  %1428 = vmatpush.msra.mxu1 %v135_v50  ;;  %v283_v46 = vld [vmem:[%s5396_s4 + $0x180] sm:$0xff]  ;;  %v4466_v50 = vld [vmem:[%s5392_s2 + $0x5b8] sm:$0xff] }
 0x59e   :  { %v1269_v43 = vsel %vm1268_vm1, %v2556_v42, %v1265_v25  ;;  %v151_v42 = vld [vmem:[%s5392_s2 + $0x380] sm:$0xff]  ;;  %v164_v25 = vld [vmem:[%s5392_s2 + $0x3e8] sm:$0xff]  ;;  %1360 = vmatpush.msra.mxu0 %v294_v52  ;;  %v4658_v52 = vld [vmem:[%s5392_s2 + $0x4d8] sm:$0xff] }
 0x59f   :  { %v1274_v17 = vsel %vm1271_vm2, %v1273_v51, %v1269_v43  ;;  %1443 = vmatpush.msra.mxu2 %v151_v42  ;;  %1453 = vmatpush.msra.mxu3 %v182_v59  ;;  %v4309_v51 = vld [vmem:[%s5392_s2 + $0x548] sm:$0xff]  ;;  %v142_v43 = vld [vmem:[%s5392_s2 + $0x338] sm:$0xff]  ;;  %v4457_v42 = vld [vmem:[%s5392_s2 + $0x5d0] sm:$0xff] }
 0x5a0   :  { %v1297_v28 = vmul.f32 %v1296_v41, %v1274_v17  ;;  %1494 = vmatpush.msrb.mxu1 %v4240_v62  ;;  %v4318_v41 = vld [vmem:[%s5392_s2 + $0x530] sm:$0xff]  ;;  %v139_v17 = vld [vmem:[%s5392_s2 + $0x320] sm:$0xff]  ;;  %1361 = vmatpush.msra.mxu0 %v293_v6 }
 0x5a1   :  { %1444 = vmatpush.msra.mxu2 %v148_v4  ;;  %1454 = vmatpush.msra.mxu3 %v179_v9  ;;  %v4473_v59 = vld [vmem:[%s5392_s2 + $0x5a0] sm:$0xff]  ;;  %v4480_v4 = vld [vmem:[%s5392_s2 + $0x588] sm:$0xff]  ;;  %v4497_v9 = vld [vmem:[%s5392_s2 + $0x558] sm:$0xff] }
 0x5a2   :  { %v1298_v16 = vadd.f32 %v1297_v28, %v423_v8  ;;  %1495 = vmatpush.msrb.mxu1 %v4252_v29  ;;  %v4355_v8 = vld [vmem:[%s5392_s2 + $0x4e8] sm:$0xff]  ;;  %v4364_v28 = vld [vmem:[%s5392_s2 + $0x4d0] sm:$0xff]  ;;  %1362 = vmatpush.msra.mxu0 %v292_v34  ;;  %v4665_v6 = vld [vmem:[%s5392_s2 + $0x4c0] sm:$0xff] }
 0x5a3   :  { %1445 = vmatpush.msra.mxu2 %v145_v15  ;;  %v4502_v15 = vld [vmem:[%s5392_s2 + $0x540] sm:$0xff]  ;;  %v4671_v34 = vld [vmem:[%s5392_s2 + $0x4a8] sm:$0xff] }
 0x5a4   :  { %2557 = vtanh.f32 %v1298_v16  ;;  %1496 = vmatpush.msrb.mxu1 %v4264_v19  ;;  %v4390_v16 = vld [vmem:[%s5392_s2 + $0x488] sm:$0xff]  ;;  %1363 = vmatpush.msra.mxu0 %v291_v30  ;;  %5526 = vst [vmem:[#allocation8_spill] sm:$0xff] %v4671_v34 }
 0x5a5   :  { %1446 = vmatpush.msra.mxu2 %v142_v43  ;;  %5522 = vst [vmem:[#allocation15_spill] sm:$0xff] %v4390_v16  ;;  %v4558_v43 = vld [vmem:[%s5392_s2 + $0x4b0] sm:$0xff] }
 0x5a6   :  { %1497 = vmatpush.msrb.mxu1 %v4273_v0  ;;  %1364 = vmatpush.msra.mxu0 %v290_v61 }
 0x5a7   :  { %1447 = vmatpush.msra.mxu2 %v139_v17  ;;  %v4572_v17 = vld [vmem:[%s5392_s2 + $0x498] sm:$0xff] }
 0x5a8   :  { %1498 = vmatpush.msrb.mxu1 %v4282_v11  ;;  %1365 = vmatpush.msra.mxu0 %v289_v22  ;;  %5524 = vst [vmem:[#allocation2_spill] sm:$0xff] %v4572_v17 }
 0x5a9   :  { %1448 = vmatpush.msra.mxu2 %v136_v49  ;;  %v4586_v49 = vld [vmem:[%s5392_s2 + $0x480] sm:$0xff] }
 0x5aa   :  { %v2558_v63 = vpop.eup %2557  ;;  %1499 = vmatpush.msrb.mxu1 %v4291_v23  ;;  %1366 = vmatpush.msra.mxu0 %v288_v2  ;;  %5525 = vst [vmem:[#allocation3_spill] sm:$0xff] %v4586_v49 }
 0x5ab   :  { %v1301_v37 = vmul.f32 %v2558_v63, %v1300_v21  ;;  %v287_v21 = vld [vmem:[%s5396_s4 + $0x1a0] sm:$0xff]  ;;  %v286_v63 = vld [vmem:[%s5396_s4 + $0x198] sm:$0xff] }
 0x5ac   :  { %1500 = vmatpush.msrb.mxu1 %v4300_v27  ;;  %1367 = vmatpush.msra.mxu0 %v287_v21 }
 0x5ad   :  { %v1303_v54 = vadd.f32 %v1302_v60, %v1301_v37  ;;  %v4448_v37 = vld [vmem:[%s5392_s2 + $0x5e8] sm:$0xff] }
 0x5ae   :  { %1501 = vmatpush.msrb.mxu1 %v4309_v51  ;;  %1368 = vmatpush.msra.mxu0 %v286_v63  ;;  %v284_v60 = vld [vmem:[%s5396_s4 + $0x188] sm:$0xff] }
 0x5af   :  { %v1305_v12 = vsel %vm1304_vm7, %v1303_v54, %v4019_v55  ;;  %v176_v55 = vld [vmem:[%s5392_s2 + $0x448] sm:$0xff]  ;;  %v5523_v54 = vmov 0.0  }
 0x5b0   :  { %1323 = vmatmul.f32.vlgmr.msrb.gmra.mxu2 %v1305_v12  ;;  %1455 = vmatpush.msra.mxu3 %v176_v55  ;;  %v4487_v12 = vld [vmem:[%s5392_s2 + $0x570] sm:$0xff]  ;;  %v4509_v55 = vld [vmem:[%s5392_s2 + $0x528] sm:$0xff] }
 0x5b1   :  { %1502 = vmatpush.msrb.mxu1 %v4318_v41  ;;  %1369 = vmatpush.msra.mxu0 %v285_v3 }
 0x5b2   :  { %1456 = vmatpush.msra.mxu3 %v173_v47  ;;  %v4518_v47 = vld [vmem:[%s5392_s2 + $0x510] sm:$0xff] }
 0x5b3   :  { %1503 = vmatpush.msrb.mxu1 %v4331_v45  ;;  %1370 = vmatpush.msra.mxu0 %v284_v60  ;;  %v1355_v60 = vperm.slane %v4424_v56, 7 }
 0x5b4   :  { %1457 = vmatpush.msra.mxu3 %v170_v10  ;;  %v4525_v10 = vld [vmem:[%s5392_s2 + $0x4f8] sm:$0xff] }
 0x5b5   :  { %1504 = vmatpush.msrb.mxu1 %v4343_v24  ;;  %1371 = vmatpush.msra.mxu0 %v283_v46  ;;  %v4785_v46 = vld [vmem:[%s5394_s3 + $0x18] sm:$0xff] }
 0x5b6   :  { %1458 = vmatpush.msra.mxu3 %v167_v18  ;;  %v4532_v18 = vld [vmem:[%s5392_s2 + $0x4e0] sm:$0xff]  ;;  %5529 = vst [vmem:[#allocation18_spill] sm:$0xff] %v4785_v46 }
 0x5b7   :  { %1505 = vmatpush.msrb.mxu1 %v4355_v8  ;;  %1474 = vmatpush.msrb.mxu0 %v4448_v37 }
 0x5b8   :  { %1459 = vmatpush.msra.mxu3 %v164_v25  ;;  %v4537_v25 = vld [vmem:[%s5392_s2 + $0x5f8] sm:$0xff] }
 0x5b9   :  { %1506 = vmatpush.msrb.mxu1 %v4364_v28  ;;  %1475 = vmatpush.msrb.mxu0 %v4457_v42 }
 0x5ba   :  { %1460 = vmatpush.msra.mxu3 %v161_v26  ;;  %1514 = vmatpush.msrb.mxu2 %v4537_v25  ;;  %v4544_v26 = vld [vmem:[%s5392_s2 + $0x4c8] sm:$0xff] }
 0x5bb   :  { %1507 = vmatpush.msrb.mxu1 %v4372_v38  ;;  %1476 = vmatpush.msrb.mxu0 %v4466_v50 }
 0x5bc   :  { %1461 = vmatpush.msra.mxu3 %v158_v32  ;;  %v4549_v32 = vld [vmem:[%s5392_s2 + $0x5e0] sm:$0xff] }
 0x5bd   :  { %1508 = vmatpush.msrb.mxu1 %v4381_v44  ;;  %1477 = vmatpush.msrb.mxu0 %v4473_v59 }
 0x5be   :  { %1462 = vmatpush.msra.mxu3 %v155_v35  ;;  %1515 = vmatpush.msrb.mxu2 %v4549_v32  ;;  %v4563_v35 = vld [vmem:[%s5392_s2 + $0x5c8] sm:$0xff] }
 0x5bf   :  { %1509 = vmatpush.msrb.mxu1 %v4390_v16  ;;  %1478 = vmatpush.msrb.mxu0 %v4480_v4 }
 0x5c0   :  { %1463 = vmatpush.msra.mxu3 %v152_v36  ;;  %1516 = vmatpush.msrb.mxu2 %v4563_v35  ;;  %v4577_v36 = vld [vmem:[%s5392_s2 + $0x5b0] sm:$0xff] }
 0x5c1   :  { %1479 = vmatpush.msrb.mxu0 %v4487_v12 }
 0x5c2   :  { %1464 = vmatpush.msra.mxu3 %v149_v57  ;;  %1517 = vmatpush.msrb.mxu2 %v4577_v36  ;;  %v4591_v57 = vld [vmem:[%s5392_s2 + $0x598] sm:$0xff] }
 0x5c3   :  { %1480 = vmatpush.msrb.mxu0 %v4497_v9 }
 0x5c4   :  { %1465 = vmatpush.msra.mxu3 %v146_v7  ;;  %1518 = vmatpush.msrb.mxu2 %v4591_v57  ;;  %v4600_v7 = vld [vmem:[%s5392_s2 + $0x580] sm:$0xff] }
 0x5c5   :  { %1481 = vmatpush.msrb.mxu0 %v4502_v15 }
 0x5c6   :  { %1466 = vmatpush.msra.mxu3 %v143_v13  ;;  %1519 = vmatpush.msrb.mxu2 %v4600_v7  ;;  %v4609_v13 = vld [vmem:[%s5392_s2 + $0x568] sm:$0xff] }
 0x5c7   :  { %1482 = vmatpush.msrb.mxu0 %v4509_v55 }
 0x5c8   :  { %1467 = vmatpush.msra.mxu3 %v140_v31  ;;  %1520 = vmatpush.msrb.mxu2 %v4609_v13  ;;  %v4617_v31 = vld [vmem:[%s5392_s2 + $0x550] sm:$0xff] }
 0x5c9   :  { %1483 = vmatpush.msrb.mxu0 %v4518_v47 }
 0x5ca   :  { %1468 = vmatpush.msra.mxu3 %v137_v53  ;;  %1521 = vmatpush.msrb.mxu2 %v4617_v31  ;;  %v4625_v53 = vld [vmem:[%s5392_s2 + $0x538] sm:$0xff] }
 0x5cb   :  { %1484 = vmatpush.msrb.mxu0 %v4525_v10 }
 0x5cc   :  { %1522 = vmatpush.msrb.mxu2 %v4625_v53 }
 0x5cd   :  { %1485 = vmatpush.msrb.mxu0 %v4532_v18 }
 0x5ce   :  { %1523 = vmatpush.msrb.mxu2 %v4633_v5 }
 0x5cf   :  { %1486 = vmatpush.msrb.mxu0 %v4544_v26 }
 0x5d0   :  { %1524 = vmatpush.msrb.mxu2 %v4641_v48 }
 0x5d1   :  { %1487 = vmatpush.msrb.mxu0 %v4558_v43 }
 0x5d2   :  { %1525 = vmatpush.msrb.mxu2 %v4649_v20 }
 0x5d3   :  { %1488 = vmatpush.msrb.mxu0 %v4572_v17 }
 0x5d4   :  { %1526 = vmatpush.msrb.mxu2 %v4658_v52 }
 0x5d5   :  { %1489 = vmatpush.msrb.mxu0 %v4586_v49 }
 0x5d6   :  { %1527 = vmatpush.msrb.mxu2 %v4665_v6 }
 0x5d8   :  { %1528 = vmatpush.msrb.mxu2 %v4671_v34 }
 0x633   :  { %v1324_v33 = vpop.f32.mrf.mxu2 }
 0x634   :  { %v1325_v39 = vadd.f32 %v1324_v33, %v1306_v40  ;;  %v4679_v40 = vld [vmem:[%s5392_s2 + $0x490] sm:$0xff] }
 0x635   :  { %5527 = vst [vmem:[#allocation7_spill] sm:$0xff] %v4679_v40  ;;  %1529 = vmatpush.msrb.mxu2 %v4679_v40 }
 0x636   :  { %vm1327_vm8 = vcmp.gt.f32.partialorder %v1325_v39, 0.0  ;;  %v1328_v58 = vmul.f32 0.01, %v1325_v39 }
 0x638   :  { %v1329_v1 = vsel %vm1327_vm8, %v1325_v39, %v1328_v58  ;;  %v2692_v39 = vld [vmem:[%s5394_s3 + $0x8] sm:$0xff] }
 0x639   :  { %1330 = vst [vmem:[%s5397_s6] sm:$0xff] %v1329_v1  ;;  %1348 = vmatmul.f32.vlgmr.msrb.gmra.mxu3 %v1329_v1  ;;  %1429 = vmatmul.f32.vlgmr.msra.gmra.mxu1 %v1329_v1  ;;  %v1411_v21 = vperm.slane %v2692_v39, 2 }
 0x63a   :  { %1449 = vmatmul.f32.vlgmr.msra.gmra.mxu2 %v1329_v1  ;;  %1582 = vmatpush.msrb.mxu3 %v4448_v37 }
 0x63b   :  { %1622 = vmatpush.msra.mxu1 %v4537_v25  ;;  %1690 = vmatpush.msra.mxu2 %v4448_v37 }
 0x63c   :  { %1583 = vmatpush.msrb.mxu3 %v4457_v42 }
 0x63d   :  { %1623 = vmatpush.msra.mxu1 %v4549_v32  ;;  %1691 = vmatpush.msra.mxu2 %v4457_v42 }
 0x63e   :  { %1584 = vmatpush.msrb.mxu3 %v4466_v50 }
 0x63f   :  { %1624 = vmatpush.msra.mxu1 %v4563_v35  ;;  %1692 = vmatpush.msra.mxu2 %v4466_v50 }
 0x640   :  { %1585 = vmatpush.msrb.mxu3 %v4473_v59 }
 0x641   :  { %1469 = vmatmul.f32.vlgmr.msra.gmra.mxu3 %v1329_v1  ;;  %1510 = vmatmul.f32.vlgmr.msrb.gmra.mxu1 %v5523_v54 }
 0x642   :  { %1586 = vmatpush.msrb.mxu3 %v4480_v4  ;;  %1625 = vmatpush.msra.mxu1 %v4577_v36 }
 0x643   :  { %1530 = vmatmul.f32.vlgmr.msrb.gmra.mxu2 %v5523_v54 }
 0x644   :  { %1587 = vmatpush.msrb.mxu3 %v4487_v12  ;;  %1626 = vmatpush.msra.mxu1 %v4591_v57 }
 0x645   :  { %1693 = vmatpush.msra.mxu2 %v4473_v59 }
 0x646   :  { %1588 = vmatpush.msrb.mxu3 %v4497_v9  ;;  %1627 = vmatpush.msra.mxu1 %v4600_v7 }
 0x647   :  { %1694 = vmatpush.msra.mxu2 %v4480_v4 }
 0x648   :  { %1589 = vmatpush.msrb.mxu3 %v4502_v15  ;;  %1628 = vmatpush.msra.mxu1 %v4609_v13 }
 0x649   :  { %1695 = vmatpush.msra.mxu2 %v4487_v12 }
 0x64a   :  { %1590 = vmatpush.msrb.mxu3 %v4509_v55  ;;  %1629 = vmatpush.msra.mxu1 %v4617_v31 }
 0x64b   :  { %1696 = vmatpush.msra.mxu2 %v4497_v9 }
 0x64c   :  { %1591 = vmatpush.msrb.mxu3 %v4518_v47  ;;  %1630 = vmatpush.msra.mxu1 %v4625_v53 }
 0x64d   :  { %1697 = vmatpush.msra.mxu2 %v4502_v15 }
 0x64e   :  { %1592 = vmatpush.msrb.mxu3 %v4525_v10  ;;  %1631 = vmatpush.msra.mxu1 %v4633_v5 }
 0x64f   :  { %1698 = vmatpush.msra.mxu2 %v4509_v55 }
 0x650   :  { %1593 = vmatpush.msrb.mxu3 %v4532_v18  ;;  %1632 = vmatpush.msra.mxu1 %v4641_v48 }
 0x651   :  { %1699 = vmatpush.msra.mxu2 %v4518_v47 }
 0x652   :  { %1594 = vmatpush.msrb.mxu3 %v4544_v26  ;;  %1633 = vmatpush.msra.mxu1 %v4649_v20 }
 0x653   :  { %1700 = vmatpush.msra.mxu2 %v4525_v10 }
 0x654   :  { %1595 = vmatpush.msrb.mxu3 %v4558_v43  ;;  %1634 = vmatpush.msra.mxu1 %v4658_v52 }
 0x655   :  { %1701 = vmatpush.msra.mxu2 %v4532_v18 }
 0x656   :  { %1596 = vmatpush.msrb.mxu3 %v4572_v17  ;;  %1635 = vmatpush.msra.mxu1 %v4665_v6 }
 0x657   :  { %1702 = vmatpush.msra.mxu2 %v4544_v26 }
 0x658   :  { %1597 = vmatpush.msrb.mxu3 %v4586_v49  ;;  %1636 = vmatpush.msra.mxu1 %v4671_v34 }
 0x659   :  { %1703 = vmatpush.msra.mxu2 %v4558_v43 }
 0x65a   :  { %1710 = vmatpush.msra.mxu3 %v4240_v62  ;;  %1637 = vmatpush.msra.mxu1 %v4679_v40 }
 0x65b   :  { %1704 = vmatpush.msra.mxu2 %v4572_v17 }
 0x65c   :  { %1711 = vmatpush.msra.mxu3 %v4252_v29  ;;  %1798 = vmatpush.msrb.mxu1 %v4448_v37 }
 0x65d   :  { %1705 = vmatpush.msra.mxu2 %v4586_v49 }
 0x65e   :  { %1712 = vmatpush.msra.mxu3 %v4264_v19  ;;  %1799 = vmatpush.msrb.mxu1 %v4457_v42 }
 0x65f   :  { %1818 = vmatpush.msrb.mxu2 %v4240_v62 }
 0x660   :  { %1713 = vmatpush.msra.mxu3 %v4273_v0  ;;  %1800 = vmatpush.msrb.mxu1 %v4466_v50 }
 0x661   :  { %1819 = vmatpush.msrb.mxu2 %v4252_v29 }
 0x662   :  { %1714 = vmatpush.msra.mxu3 %v4282_v11  ;;  %1801 = vmatpush.msrb.mxu1 %v4473_v59 }
 0x663   :  { %1820 = vmatpush.msrb.mxu2 %v4264_v19 }
 0x664   :  { %1715 = vmatpush.msra.mxu3 %v4291_v23  ;;  %1802 = vmatpush.msrb.mxu1 %v4480_v4 }
 0x665   :  { %1821 = vmatpush.msrb.mxu2 %v4273_v0 }
 0x666   :  { %1716 = vmatpush.msra.mxu3 %v4300_v27  ;;  %1803 = vmatpush.msrb.mxu1 %v4487_v12 }
 0x667   :  { %1822 = vmatpush.msrb.mxu2 %v4282_v11 }
 0x668   :  { %1717 = vmatpush.msra.mxu3 %v4309_v51  ;;  %1804 = vmatpush.msrb.mxu1 %v4497_v9 }
 0x669   :  { %1823 = vmatpush.msrb.mxu2 %v4291_v23 }
 0x66a   :  { %1718 = vmatpush.msra.mxu3 %v4318_v41  ;;  %1805 = vmatpush.msrb.mxu1 %v4502_v15 }
 0x66b   :  { %1824 = vmatpush.msrb.mxu2 %v4300_v27 }
 0x66c   :  { %1719 = vmatpush.msra.mxu3 %v4331_v45  ;;  %1806 = vmatpush.msrb.mxu1 %v4509_v55 }
 0x66d   :  { %1825 = vmatpush.msrb.mxu2 %v4309_v51 }
 0x66e   :  { %1720 = vmatpush.msra.mxu3 %v4343_v24  ;;  %1807 = vmatpush.msrb.mxu1 %v4518_v47 }
 0x66f   :  { %1826 = vmatpush.msrb.mxu2 %v4318_v41 }
 0x670   :  { %1721 = vmatpush.msra.mxu3 %v4355_v8  ;;  %1808 = vmatpush.msrb.mxu1 %v4525_v10 }
 0x671   :  { %1827 = vmatpush.msrb.mxu2 %v4331_v45 }
 0x672   :  { %1722 = vmatpush.msra.mxu3 %v4364_v28  ;;  %1809 = vmatpush.msrb.mxu1 %v4532_v18 }
 0x673   :  { %1828 = vmatpush.msrb.mxu2 %v4343_v24 }
 0x674   :  { %1723 = vmatpush.msra.mxu3 %v4372_v38  ;;  %1810 = vmatpush.msrb.mxu1 %v4544_v26 }
 0x675   :  { %1829 = vmatpush.msrb.mxu2 %v4355_v8 }
 0x676   :  { %1724 = vmatpush.msra.mxu3 %v4381_v44  ;;  %1811 = vmatpush.msrb.mxu1 %v4558_v43 }
 0x677   :  { %1830 = vmatpush.msrb.mxu2 %v4364_v28 }
 0x678   :  { %1725 = vmatpush.msra.mxu3 %v4390_v16  ;;  %1812 = vmatpush.msrb.mxu1 %v4572_v17 }
 0x679   :  { %1831 = vmatpush.msrb.mxu2 %v4372_v38 }
 0x67a   :  { %1813 = vmatpush.msrb.mxu1 %v4586_v49 }
 0x67b   :  { %1832 = vmatpush.msrb.mxu2 %v4381_v44 }
 0x67d   :  { %1833 = vmatpush.msrb.mxu2 %v4390_v16 }
 0x6b6   :  { %v1430_v2 = vpop.f32.mrf.mxu1 }
 0x6bc   :  { %v1349_v30 = vpop.f32.mrf.mxu3 }
 0x6bd   :  { %v1350_v61 = vadd.f32 %v1349_v30, %v1331_v14  ;;  %v1450_v58 = vpop.f32.mrf.mxu2 }
 0x6be   :  { %v4778_v63 = vadd.f32 %v1450_v58, %v1411_v21  ;;  %v1511_v1 = vpop.f32.mrf.mxu1 }
 0x6bf   :  { %vm1352_vm9 = vcmp.gt.f32.partialorder %v1350_v61, 0.0  ;;  %v1353_v22 = vmul.f32 0.01, %v1350_v61 }
 0x6c0   :  { %5528 = vst [vmem:[#allocation11_spill] sm:$0xff] %v4778_v63  ;;  %v1554_v3 = vadd.f32 %v1511_v1, %v4778_v63 }
 0x6c1   :  { %v1354_v33 = vsel %vm1352_vm9, %v1350_v61, %v1353_v22  ;;  %v1379_v61 = vperm.slane %v4785_v46, 0  ;;  %v1410_v22 = vperm.slane %v4424_v56, 2 }
 0x6c2   :  { %1372 = vmatmul.f32.vlgmr.msra.gmra.mxu0 %v1354_v33 }
 0x6c3   :  { %1602 = vmatpush.msra.mxu0 %v4240_v62  ;;  %v4789_v58 = vadd.f32 %v1430_v2, %v1410_v22  ;;  %v4793_v2 = vperm.slane %v4424_v56, 3 }
 0x6c5   :  { %1603 = vmatpush.msra.mxu0 %v4252_v29  ;;  %5530 = vst [vmem:[#allocation5_spill] sm:$0xff] %v4789_v58 }
 0x6c6   :  { %v1531_v22 = vpop.f32.mrf.mxu2 }
 0x6c7   :  { %1604 = vmatpush.msra.mxu0 %v4264_v19 }
 0x6c9   :  { %1605 = vmatpush.msra.mxu0 %v4273_v0 }
 0x6ca   :  { %1490 = vmatmul.f32.vlgmr.msrb.gmra.mxu0 %v5523_v54  ;;  %v2445_v54 = vmul.f32 -1.442695, %v1554_v3 }
 0x6cb   :  { %1606 = vmatpush.msra.mxu0 %v4282_v11 }
 0x6cc   :  { %2559 = vpow2.f32 %v2445_v54 }
 0x6cd   :  { %1607 = vmatpush.msra.mxu0 %v4291_v23 }
 0x6cf   :  { %1608 = vmatpush.msra.mxu0 %v4300_v27 }
 0x6d1   :  { %1609 = vmatpush.msra.mxu0 %v4309_v51 }
 0x6d3   :  { %1610 = vmatpush.msra.mxu0 %v4318_v41 }
 0x6d5   :  { %1611 = vmatpush.msra.mxu0 %v4331_v45 }
 0x6d7   :  { %1612 = vmatpush.msra.mxu0 %v4343_v24 }
 0x6d9   :  { %1613 = vmatpush.msra.mxu0 %v4355_v8 }
 0x6db   :  { %1614 = vmatpush.msra.mxu0 %v4364_v28 }
 0x6dd   :  { %1615 = vmatpush.msra.mxu0 %v4372_v38 }
 0x6df   :  { %1616 = vmatpush.msra.mxu0 %v4381_v44 }
 0x6e1   :  { %1617 = vmatpush.msra.mxu0 %v4390_v16  ;;  %v2560_v16 = vpop.eup %2559 }
 0x6e2   :  { %v1558_v3 = vadd.f32 1.0, %v2560_v16 }
 0x6e3   :  { %1730 = vmatpush.msrb.mxu0 %v4537_v25 }
 0x6e4   :  { %v1570_v17 = vand.u32 2147483648, %v1558_v3  ;;  %vm1564_vm0 = vweird.f32 %v1558_v3  ;;  %v1568_v38 = vand.u32 2147483647, %v1558_v3 }
 0x6e5   :  { %1731 = vmatpush.msrb.mxu0 %v4549_v32 }
 0x6e6   :  { %vm1569_vm2 = vcmp.eq.f32.partialorder %v1568_v38, 8.507059e+37 }
 0x6e7   :  { %1732 = vmatpush.msrb.mxu0 %v4563_v35 }
 0x6e9   :  { %1733 = vmatpush.msrb.mxu0 %v4577_v36 }
 0x6eb   :  { %1734 = vmatpush.msrb.mxu0 %v4591_v57 }
 0x6ed   :  { %1735 = vmatpush.msrb.mxu0 %v4600_v7 }
 0x6ef   :  { %1736 = vmatpush.msrb.mxu0 %v4609_v13 }
 0x6f1   :  { %1737 = vmatpush.msrb.mxu0 %v4617_v31 }
 0x6f3   :  { %1738 = vmatpush.msrb.mxu0 %v4625_v53 }
 0x6f5   :  { %1739 = vmatpush.msrb.mxu0 %v4633_v5 }
 0x6f7   :  { %1740 = vmatpush.msrb.mxu0 %v4641_v48 }
 0x6f9   :  { %1741 = vmatpush.msrb.mxu0 %v4649_v20 }
 0x6fb   :  { %1742 = vmatpush.msrb.mxu0 %v4658_v52 }
 0x6fd   :  { %1743 = vmatpush.msrb.mxu0 %v4665_v6 }
 0x6ff   :  { %1744 = vmatpush.msrb.mxu0 %v4671_v34 }
 0x701   :  { %1745 = vmatpush.msrb.mxu0 %v4679_v40 }
 0x73f   :  { %v1373_v14 = vpop.f32.mrf.mxu0 }
 0x740   :  { %v1374_v30 = vadd.f32 %v1373_v14, %v1355_v60 }
 0x742   :  { %v1377_v33 = vmul.f32 0.01, %v1374_v30  ;;  %vm1376_vm10 = vcmp.gt.f32.partialorder %v1374_v30, 0.0 }
 0x744   :  { %v1378_v39 = vsel %vm1376_vm10, %v1374_v30, %v1377_v33 }
 0x745   :  { %v1380_v21 = vmul.f32 %v1379_v61, %v1378_v39 }
 0x747   :  { %v1491_v1 = vpop.f32.mrf.mxu0  ;;  %1381 = vadd.xlane.f32.xlu0 %v1380_v21 }
 0x748   :  { %v1534_v63 = vadd.f32 %v1491_v1, %v4789_v58 }
 0x74a   :  { %v2444_v49 = vmul.f32 -1.442695, %v1534_v63 }
 0x74c   :  { %2561 = vpow2.f32 %v2444_v49  ;;  %v2693_v49 = vld [vmem:[%s5394_s3 + $0x10] sm:$0xff] }
 0x74d   :  { %2563 = vrcp.f32 %v1558_v3  ;;  %v1412_v21 = vperm.slane %v2693_v49, 2  ;;  %v1571_v49 = vor.u32 1.1754944e-38, %v1570_v17 }
 0x752   :  { %v2562_v60 = vpop.eup %2561 }
 0x753   :  { %v1538_v14 = vadd.f32 1.0, %v2562_v60  ;;  %v2564_v46 = vpop.eup %2563  ;;  %v1574_v60 = vadd.f32 %v1531_v22, %v4793_v2 }
 0x754   :  { %v1560_v40 = vmul.f32 %v2564_v46, %v1558_v3  ;;  %vm1565_vm15 = vweird.f32 %v2564_v46 }
 0x755   :  { %2565 = vrcp.f32 %v1538_v14  ;;  %v1550_v33 = vand.u32 2147483648, %v1538_v14  ;;  %v1548_v63 = vand.u32 2147483647, %v1538_v14  ;;  %vm1544_vm12 = vweird.f32 %v1538_v14  ;;  %vm1566_vm1 = vmor %vm1564_vm0, %vm1565_vm15 }
 0x756   :  { %v1561_v30 = vsub.f32 1.0, %v1560_v40  ;;  %v1470_v40 = vpop.f32.mrf.mxu3 }
 0x757   :  { %v1551_v56 = vor.u32 1.1754944e-38, %v1550_v33  ;;  %vm1549_vm14 = vcmp.eq.f32.partialorder %v1548_v63, 8.507059e+37  ;;  %v4799_v34 = vadd.f32 %v1470_v40, %v1412_v21 }
 0x758   :  { %v1562_v16 = vmul.f32 %v2564_v46, %v1561_v30 }
 0x75b   :  { %v2566_v44 = vpop.eup %2565 }
 0x75c   :  { %v1540_v54 = vmul.f32 %v2566_v44, %v1538_v14  ;;  %vm1545_vm11 = vweird.f32 %v2566_v44 }
 0x75d   :  { %vm1546_vm13 = vmor %vm1544_vm12, %vm1545_vm11 }
 0x75e   :  { %v1541_v61 = vsub.f32 1.0, %v1540_v54  ;;  %v1563_v54 = vadd.f32 %v2564_v46, %v1562_v16 }
 0x760   :  { %v1542_v39 = vmul.f32 %v2566_v44, %v1541_v61  ;;  %v1567_v14 = vsel %vm1566_vm1, %v2564_v46, %v1563_v54 }
 0x761   :  { %v1572_v22 = vsel %vm1569_vm2, %v1571_v49, %v1567_v14 }
 0x762   :  { %v1543_v1 = vadd.f32 %v2566_v44, %v1542_v39  ;;  %v1578_v33 = vsub.f32 1.0, %v1572_v22  ;;  %v1580_v16 = vmul.f32 0.0, %v1572_v22 }
 0x764   :  { %v1547_v58 = vsel %vm1546_vm13, %v2566_v44, %v1543_v1 }
 0x765   :  { %v1552_v61 = vsel %vm1549_vm14, %v1551_v56, %v1547_v58 }
 0x766   :  { %v1575_v30 = vmul.f32 %v1574_v60, %v1552_v61 }
 0x768   :  { %v1576_v39 = vadd.f32 %v1575_v30, %v4799_v34 }
 0x76a   :  { %2567 = vtanh.f32 %v1576_v39 }
 0x770   :  { %v2568_v44 = vpop.eup %2567 }
 0x771   :  { %v1579_v63 = vmul.f32 %v2568_v44, %v1578_v33  ;;  %v5539_v44 = vld [vmem:[#allocation11_spill] sm:$0xff] }
 0x773   :  { %v4802_v1 = vadd.f32 %v1580_v16, %v1579_v63 }
 0x775   :  { %1598 = vmatmul.f32.vlgmr.msrb.gmra.mxu3 %v4802_v1  ;;  %1618 = vmatmul.f32.vlgmr.msra.gmra.mxu0 %v4802_v1 }
 0x776   :  { %1638 = vmatmul.f32.vlgmr.msra.gmra.mxu1 %v4802_v1  ;;  %1838 = vmatpush.msrb.mxu3 %v4537_v25 }
 0x777   :  { %1906 = vmatpush.msra.mxu0 %v4448_v37  ;;  %1926 = vmatpush.msra.mxu1 %v4240_v62  ;;  %v5531_v62 = vld [vmem:[#allocation13_spill] sm:$0xff] }
 0x778   :  { %1839 = vmatpush.msrb.mxu3 %v4549_v32 }
 0x779   :  { %1907 = vmatpush.msra.mxu0 %v4457_v42  ;;  %1927 = vmatpush.msra.mxu1 %v4252_v29  ;;  %v5532_v29 = vld [vmem:[#allocation8_spill] sm:$0xff] }
 0x77a   :  { %1840 = vmatpush.msrb.mxu3 %v4563_v35 }
 0x77b   :  { %1908 = vmatpush.msra.mxu0 %v4466_v50  ;;  %1928 = vmatpush.msra.mxu1 %v4264_v19  ;;  %v5533_v19 = vld [vmem:[#allocation2_spill] sm:$0xff] }
 0x77c   :  { %1841 = vmatpush.msrb.mxu3 %v4577_v36 }
 0x77d   :  { %1909 = vmatpush.msra.mxu0 %v4473_v59  ;;  %1929 = vmatpush.msra.mxu1 %v4273_v0  ;;  %v5534_v0 = vld [vmem:[#allocation21_spill] sm:$0xff] }
 0x77e   :  { %1842 = vmatpush.msrb.mxu3 %v4591_v57 }
 0x77f   :  { %1910 = vmatpush.msra.mxu0 %v4480_v4  ;;  %1930 = vmatpush.msra.mxu1 %v4282_v11  ;;  %v5535_v11 = vld [vmem:[#allocation7_spill] sm:$0xff] }
 0x780   :  { %1843 = vmatpush.msrb.mxu3 %v4600_v7 }
 0x781   :  { %1911 = vmatpush.msra.mxu0 %v4487_v12  ;;  %1931 = vmatpush.msra.mxu1 %v4291_v23  ;;  %v5536_v23 = vld [vmem:[#allocation3_spill] sm:$0xff] }
 0x782   :  { %1844 = vmatpush.msrb.mxu3 %v4609_v13 }
 0x783   :  { %1912 = vmatpush.msra.mxu0 %v4497_v9  ;;  %1932 = vmatpush.msra.mxu1 %v4300_v27  ;;  %v5537_v27 = vld [vmem:[#allocation15_spill] sm:$0xff] }
 0x784   :  { %1845 = vmatpush.msrb.mxu3 %v4617_v31 }
 0x785   :  { %1913 = vmatpush.msra.mxu0 %v4502_v15  ;;  %1933 = vmatpush.msra.mxu1 %v4309_v51  ;;  %v2744_v51 = vmov 0  }
 0x786   :  { %1846 = vmatpush.msrb.mxu3 %v4625_v53  ;;  %2478 = vset.pattern.permute.xlu0 %v2744_v51 }
 0x787   :  { %1914 = vmatpush.msra.mxu0 %v4509_v55  ;;  %1934 = vmatpush.msra.mxu1 %v4318_v41  ;;  %v5538_v41 = vld [vmem:[#allocation18_spill] sm:$0xff] }
 0x788   :  { %1847 = vmatpush.msrb.mxu3 %v4633_v5  ;;  %v1383_v38 = vperm.slane %v5538_v41, 1  ;;  %v5540_v41 = vld [vmem:[#allocation5_spill] sm:$0xff] }
 0x789   :  { %1915 = vmatpush.msra.mxu0 %v4518_v47  ;;  %1935 = vmatpush.msra.mxu1 %v4331_v45 }
 0x78a   :  { %1848 = vmatpush.msrb.mxu3 %v4641_v48 }
 0x78b   :  { %1916 = vmatpush.msra.mxu0 %v4525_v10  ;;  %1936 = vmatpush.msra.mxu1 %v4343_v24 }
 0x78c   :  { %1849 = vmatpush.msrb.mxu3 %v4649_v20 }
 0x78d   :  { %1917 = vmatpush.msra.mxu0 %v4532_v18  ;;  %1937 = vmatpush.msra.mxu1 %v4355_v8 }
 0x78e   :  { %1850 = vmatpush.msrb.mxu3 %v4658_v52 }
 0x78f   :  { %1918 = vmatpush.msra.mxu0 %v4544_v26  ;;  %1938 = vmatpush.msra.mxu1 %v4364_v28 }
 0x790   :  { %1851 = vmatpush.msrb.mxu3 %v4665_v6 }
 0x791   :  { %1919 = vmatpush.msra.mxu0 %v4558_v43  ;;  %1939 = vmatpush.msra.mxu1 %v5531_v62 }
 0x792   :  { %1852 = vmatpush.msrb.mxu3 %v5532_v29 }
 0x793   :  { %1920 = vmatpush.msra.mxu0 %v5533_v19  ;;  %1940 = vmatpush.msra.mxu1 %v5534_v0 }
 0x794   :  { %1853 = vmatpush.msrb.mxu3 %v5535_v11 }
 0x795   :  { %1921 = vmatpush.msra.mxu0 %v5536_v23  ;;  %1941 = vmatpush.msra.mxu1 %v5537_v27 }
 0x7ba   :  { %v1382_v17 = vpop.xlane.xlu0 %1381 }
 0x7bb   :  { %v1384_v46 = vadd.f32 %v1383_v38, %v1382_v17 }
 0x7bd   :  { %v2443_v58 = vmul.f32 -1.442695, %v1384_v46 }
 0x7bf   :  { %2569 = vpow2.f32 %v2443_v58 }
 0x7c5   :  { %v2570_v3 = vpop.eup %2569 }
 0x7c6   :  { %v1388_v21 = vadd.f32 1.0, %v2570_v3 }
 0x7c8   :  { %2571 = vrcp.f32 %v1388_v21  ;;  %v1400_v54 = vand.u32 2147483648, %v1388_v21  ;;  %v1398_v30 = vand.u32 2147483647, %v1388_v21  ;;  %vm1394_vm4 = vweird.f32 %v1388_v21 }
 0x7ca   :  { %v1401_v14 = vor.u32 1.1754944e-38, %v1400_v54  ;;  %vm1399_vm6 = vcmp.eq.f32.partialorder %v1398_v30, 8.507059e+37 }
 0x7ce   :  { %v2572_v60 = vpop.eup %2571 }
 0x7cf   :  { %v1390_v40 = vmul.f32 %v2572_v60, %v1388_v21  ;;  %vm1395_vm3 = vweird.f32 %v2572_v60 }
 0x7d0   :  { %vm1396_vm5 = vmor %vm1394_vm4, %vm1395_vm3 }
 0x7d1   :  { %v1391_v56 = vsub.f32 1.0, %v1390_v40 }
 0x7d3   :  { %v1392_v61 = vmul.f32 %v2572_v60, %v1391_v56 }
 0x7d5   :  { %v1393_v39 = vadd.f32 %v2572_v60, %v1392_v61 }
 0x7d7   :  { %v1397_v49 = vsel %vm1396_vm5, %v2572_v60, %v1393_v39 }
 0x7d8   :  { %v1402_v22 = vsel %vm1399_vm6, %v1401_v14, %v1397_v49 }
 0x7d9   :  { %1406 = vperm.xlu0 %2478, %v1402_v22  }
 0x7f2   :  { %v1619_v33 = vpop.f32.mrf.mxu0 }
 0x7f3   :  { %v1662_v63 = vadd.f32 %v1619_v33, %v5539_v44  ;;  %v1639_v33 = vpop.f32.mrf.mxu1 }
 0x7f5   :  { %v2447_v16 = vmul.f32 -1.442695, %v1662_v63 }
 0x7f7   :  { %2573 = vpow2.f32 %v2447_v16 }
 0x7f8   :  { %v1599_v51 = vpop.f32.mrf.mxu3 }
 0x7f9   :  { %v1642_v38 = vadd.f32 %v1599_v51, %v5540_v41  ;;  %v1682_v51 = vadd.f32 %v1639_v33, %v4793_v2 }
 0x7fb   :  { %v2446_v17 = vmul.f32 -1.442695, %v1642_v38 }
 0x7fd   :  { %v2574_v46 = vpop.eup %2573  ;;  %2575 = vpow2.f32 %v2446_v17 }
 0x7fe   :  { %v1666_v58 = vadd.f32 1.0, %v2574_v46 }
 0x800   :  { %2577 = vrcp.f32 %v1666_v58  ;;  %vm1672_vm12 = vweird.f32 %v1666_v58 }
 0x803   :  { %v2576_v3 = vpop.eup %2575 }
 0x804   :  { %v1646_v21 = vadd.f32 1.0, %v2576_v3  ;;  %v1678_v3 = vand.u32 2147483648, %v1666_v58 }
 0x806   :  { %2579 = vrcp.f32 %v1646_v21  ;;  %v2578_v60 = vpop.eup %2577  ;;  %v1658_v39 = vand.u32 2147483648, %v1646_v21  ;;  %v1656_v49 = vand.u32 2147483647, %v1646_v21  ;;  %vm1652_vm8 = vweird.f32 %v1646_v21 }
 0x807   :  { %v1668_v40 = vmul.f32 %v2578_v60, %v1666_v58  ;;  %vm1673_vm11 = vweird.f32 %v2578_v60  ;;  %v1679_v44 = vor.u32 1.1754944e-38, %v1678_v3 }
 0x808   :  { %v1659_v16 = vor.u32 1.1754944e-38, %v1658_v39  ;;  %vm1657_vm10 = vcmp.eq.f32.partialorder %v1656_v49, 8.507059e+37  ;;  %vm1674_vm13 = vmor %vm1672_vm12, %vm1673_vm11 }
 0x809   :  { %v1669_v61 = vsub.f32 1.0, %v1668_v40 }
 0x80b   :  { %v1670_v22 = vmul.f32 %v2578_v60, %v1669_v61 }
 0x80c   :  { %v2580_v56 = vpop.eup %2579 }
 0x80d   :  { %v1648_v54 = vmul.f32 %v2580_v56, %v1646_v21  ;;  %vm1653_vm7 = vweird.f32 %v2580_v56  ;;  %v1671_v17 = vadd.f32 %v2578_v60, %v1670_v22 }
 0x80e   :  { %vm1654_vm9 = vmor %vm1652_vm8, %vm1653_vm7 }
 0x80f   :  { %v1649_v30 = vsub.f32 1.0, %v1648_v54  ;;  %v1676_v54 = vand.u32 2147483647, %v1666_v58  ;;  %v1675_v61 = vsel %vm1674_vm13, %v2578_v60, %v1671_v17  ;;  %v4879_v58 = vld [vmem:[%s5392_s2 + $0x5d8] sm:$0xff]  ;;  %v4935_v60 = vld [vmem:[%s5392_s2 + $0x530] sm:$0xff] }
 0x811   :  { %v1650_v14 = vmul.f32 %v2580_v56, %v1649_v30  ;;  %vm1677_vm14 = vcmp.eq.f32.partialorder %v1676_v54, 8.507059e+37 }
 0x812   :  { %v1680_v21 = vsel %vm1677_vm14, %v1679_v44, %v1675_v61  ;;  %v4871_v44 = vld [vmem:[%s5392_s2 + $0x5f0] sm:$0xff] }
 0x813   :  { %v1651_v63 = vadd.f32 %v2580_v56, %v1650_v14  ;;  %v1686_v39 = vsub.f32 1.0, %v1680_v21 }
 0x815   :  { %v1655_v38 = vsel %vm1654_vm9, %v2580_v56, %v1651_v63  ;;  %v1688_v56 = vmul.f32 %v1680_v21, %v4802_v1 }
 0x816   :  { %v1660_v46 = vsel %vm1657_vm10, %v1659_v16, %v1655_v38 }
 0x817   :  { %v1683_v40 = vmul.f32 %v1682_v51, %v1660_v46 }
 0x819   :  { %v1684_v30 = vadd.f32 %v1683_v40, %v4799_v34 }
 0x81b   :  { %2581 = vtanh.f32 %v1684_v30 }
 0x821   :  { %v2582_v14 = vpop.eup %2581 }
 0x822   :  { %v1687_v33 = vmul.f32 %v2582_v14, %v1686_v39 }
 0x824   :  { %v4861_v49 = vadd.f32 %v1688_v56, %v1687_v33 }
 0x826   :  { %1706 = vmatmul.f32.vlgmr.msra.gmra.mxu2 %v4861_v49  ;;  %1726 = vmatmul.f32.vlgmr.msra.gmra.mxu3 %v4861_v49 }
 0x827   :  { %1746 = vmatmul.f32.vlgmr.msrb.gmra.mxu0 %v4861_v49  ;;  %1946 = vmatpush.msra.mxu2 %v4537_v25 }
 0x828   :  { %2014 = vmatpush.msra.mxu3 %v4448_v37  ;;  %2034 = vmatpush.msrb.mxu0 %v4871_v44  ;;  %v4887_v37 = vld [vmem:[%s5392_s2 + $0x5c0] sm:$0xff] }
 0x829   :  { %1947 = vmatpush.msra.mxu2 %v4549_v32 }
 0x82a   :  { %2015 = vmatpush.msra.mxu3 %v4457_v42  ;;  %2035 = vmatpush.msrb.mxu0 %v4879_v58  ;;  %v4895_v42 = vld [vmem:[%s5392_s2 + $0x5a8] sm:$0xff] }
 0x82b   :  { %1948 = vmatpush.msra.mxu2 %v4563_v35 }
 0x82c   :  { %2016 = vmatpush.msra.mxu3 %v4466_v50  ;;  %2036 = vmatpush.msrb.mxu0 %v4887_v37  ;;  %v4903_v50 = vld [vmem:[%s5392_s2 + $0x590] sm:$0xff] }
 0x82d   :  { %1949 = vmatpush.msra.mxu2 %v4577_v36 }
 0x82e   :  { %2017 = vmatpush.msra.mxu3 %v4473_v59  ;;  %2037 = vmatpush.msrb.mxu0 %v4895_v42  ;;  %v4911_v59 = vld [vmem:[%s5392_s2 + $0x578] sm:$0xff] }
 0x82f   :  { %1950 = vmatpush.msra.mxu2 %v4591_v57 }
 0x830   :  { %2018 = vmatpush.msra.mxu3 %v4480_v4  ;;  %2038 = vmatpush.msrb.mxu0 %v4903_v50  ;;  %v4919_v4 = vld [vmem:[%s5392_s2 + $0x560] sm:$0xff] }
 0x831   :  { %1951 = vmatpush.msra.mxu2 %v4600_v7 }
 0x832   :  { %2019 = vmatpush.msra.mxu3 %v4487_v12  ;;  %2039 = vmatpush.msrb.mxu0 %v4911_v59  ;;  %v4927_v12 = vld [vmem:[%s5392_s2 + $0x548] sm:$0xff] }
 0x833   :  { %1952 = vmatpush.msra.mxu2 %v4609_v13 }
 0x834   :  { %2020 = vmatpush.msra.mxu3 %v4497_v9  ;;  %2040 = vmatpush.msrb.mxu0 %v4919_v4 }
 0x835   :  { %1953 = vmatpush.msra.mxu2 %v4617_v31 }
 0x836   :  { %2021 = vmatpush.msra.mxu3 %v4502_v15  ;;  %2041 = vmatpush.msrb.mxu0 %v4927_v12  ;;  %v5541_v15 = vld [vmem:[#allocation11_spill] sm:$0xff] }
 0x837   :  { %1954 = vmatpush.msra.mxu2 %v4625_v53 }
 0x838   :  { %2022 = vmatpush.msra.mxu3 %v4509_v55  ;;  %2042 = vmatpush.msrb.mxu0 %v4935_v60 }
 0x839   :  { %1955 = vmatpush.msra.mxu2 %v4633_v5 }
 0x83a   :  { %2023 = vmatpush.msra.mxu3 %v4518_v47  ;;  %2043 = vmatpush.msrb.mxu0 %v4331_v45 }
 0x83b   :  { %1956 = vmatpush.msra.mxu2 %v4641_v48 }
 0x83c   :  { %2024 = vmatpush.msra.mxu3 %v4525_v10  ;;  %2044 = vmatpush.msrb.mxu0 %v4343_v24 }
 0x83d   :  { %1957 = vmatpush.msra.mxu2 %v4649_v20 }
 0x83e   :  { %2025 = vmatpush.msra.mxu3 %v4532_v18  ;;  %2045 = vmatpush.msrb.mxu0 %v4355_v8 }
 0x83f   :  { %1958 = vmatpush.msra.mxu2 %v4658_v52 }
 0x840   :  { %2026 = vmatpush.msra.mxu3 %v4544_v26  ;;  %2046 = vmatpush.msrb.mxu0 %v4364_v28 }
 0x841   :  { %1959 = vmatpush.msra.mxu2 %v4665_v6 }
 0x842   :  { %2027 = vmatpush.msra.mxu3 %v4558_v43  ;;  %2047 = vmatpush.msrb.mxu0 %v5531_v62 }
 0x843   :  { %1960 = vmatpush.msra.mxu2 %v5532_v29 }
 0x844   :  { %2028 = vmatpush.msra.mxu3 %v5533_v19  ;;  %2048 = vmatpush.msrb.mxu0 %v5534_v0 }
 0x845   :  { %1961 = vmatpush.msra.mxu2 %v5535_v11 }
 0x846   :  { %2029 = vmatpush.msra.mxu3 %v5536_v23  ;;  %2049 = vmatpush.msrb.mxu0 %v5537_v27 }
 0x84b   :  { %v1407_v45 = vpop.permute.xlu0 %1406 }
 0x84c   :  { %1409 = vst [vmem:[%s5398_s7] sm:$0xff] %v1407_v45 }
 0x8a4   :  { %v1747_v21 = vpop.f32.mrf.mxu0 }
 0x8a5   :  { %v1790_v56 = vadd.f32 %v1747_v21, %v4793_v2 }
 0x8a9   :  { %v1707_v24 = vpop.f32.mrf.mxu2  ;;  %v1727_v8 = vpop.f32.mrf.mxu3 }
 0x8aa   :  { %v1750_v28 = vadd.f32 %v1707_v24, %v5540_v41  ;;  %v1770_v55 = vadd.f32 %v1727_v8, %v5541_v15 }
 0x8ac   :  { %v2448_v62 = vmul.f32 -1.442695, %v1750_v28  ;;  %v2449_v22 = vmul.f32 -1.442695, %v1770_v55 }
 0x8ae   :  { %2583 = vpow2.f32 %v2448_v62 }
 0x8af   :  { %2585 = vpow2.f32 %v2449_v22 }
 0x8b4   :  { %v2584_v0 = vpop.eup %2583 }
 0x8b5   :  { %v2586_v63 = vpop.eup %2585  ;;  %v1754_v16 = vadd.f32 1.0, %v2584_v0 }
 0x8b6   :  { %v1774_v51 = vadd.f32 1.0, %v2586_v63 }
 0x8b7   :  { %2587 = vrcp.f32 %v1754_v16  ;;  %v1766_v40 = vand.u32 2147483648, %v1754_v16  ;;  %v1764_v61 = vand.u32 2147483647, %v1754_v16  ;;  %vm1760_vm0 = vweird.f32 %v1754_v16 }
 0x8b8   :  { %2589 = vrcp.f32 %v1774_v51  ;;  %v1786_v55 = vand.u32 2147483648, %v1774_v51  ;;  %vm1780_vm4 = vweird.f32 %v1774_v51  ;;  %v1784_v62 = vand.u32 2147483647, %v1774_v51 }
 0x8b9   :  { %v1767_v33 = vor.u32 1.1754944e-38, %v1766_v40  ;;  %vm1765_vm2 = vcmp.eq.f32.partialorder %v1764_v61, 8.507059e+37 }
 0x8ba   :  { %v1787_v63 = vor.u32 1.1754944e-38, %v1786_v55  ;;  %vm1785_vm6 = vcmp.eq.f32.partialorder %v1784_v62, 8.507059e+37 }
 0x8bd   :  { %v2588_v27 = vpop.eup %2587 }
 0x8be   :  { %v2590_v38 = vpop.eup %2589  ;;  %v1756_v17 = vmul.f32 %v2588_v27, %v1754_v16  ;;  %vm1761_vm15 = vweird.f32 %v2588_v27 }
 0x8bf   :  { %v1776_v46 = vmul.f32 %v2590_v38, %v1774_v51  ;;  %vm1762_vm1 = vmor %vm1760_vm0, %vm1761_vm15  ;;  %vm1781_vm3 = vweird.f32 %v2590_v38  ;;  %v4976_v51 = vld [vmem:[%s5392_s2 + $0x5e8] sm:$0xff] }
 0x8c0   :  { %v1757_v3 = vsub.f32 1.0, %v1756_v17  ;;  %vm1782_vm5 = vmor %vm1780_vm4, %vm1781_vm3 }
 0x8c1   :  { %v1777_v54 = vsub.f32 1.0, %v1776_v46 }
 0x8c2   :  { %v1758_v30 = vmul.f32 %v2588_v27, %v1757_v3 }
 0x8c3   :  { %v1778_v39 = vmul.f32 %v2590_v38, %v1777_v54 }
 0x8c4   :  { %v1759_v14 = vadd.f32 %v2588_v27, %v1758_v30 }
 0x8c5   :  { %v1779_v8 = vadd.f32 %v2590_v38, %v1778_v39 }
 0x8c6   :  { %v1763_v45 = vsel %vm1762_vm1, %v2588_v27, %v1759_v14 }
 0x8c7   :  { %v1768_v24 = vsel %vm1765_vm2, %v1767_v33, %v1763_v45  ;;  %v1783_v0 = vsel %vm1782_vm5, %v2590_v38, %v1779_v8  ;;  %v4984_v38 = vld [vmem:[%s5392_s2 + $0x5d0] sm:$0xff] }
 0x8c8   :  { %v1791_v28 = vmul.f32 %v1790_v56, %v1768_v24  ;;  %v1788_v16 = vsel %vm1785_vm6, %v1787_v63, %v1783_v0 }
 0x8c9   :  { %v1794_v17 = vsub.f32 1.0, %v1788_v16  ;;  %v1796_v27 = vmul.f32 %v1788_v16, %v4861_v49 }
 0x8ca   :  { %v1792_v22 = vadd.f32 %v1791_v28, %v4799_v34 }
 0x8cc   :  { %2591 = vtanh.f32 %v1792_v22 }
 0x8d2   :  { %v2592_v46 = vpop.eup %2591 }
 0x8d3   :  { %v1795_v3 = vmul.f32 %v2592_v46, %v1794_v17 }
 0x8d5   :  { %v4967_v40 = vadd.f32 %v1796_v27, %v1795_v3 }
 0x8d7   :  { %1814 = vmatmul.f32.vlgmr.msrb.gmra.mxu1 %v4967_v40  ;;  %1834 = vmatmul.f32.vlgmr.msrb.gmra.mxu2 %v4967_v40 }
 0x8d8   :  { %1854 = vmatmul.f32.vlgmr.msrb.gmra.mxu3 %v4967_v40  ;;  %2054 = vmatpush.msrb.mxu1 %v4537_v25  ;;  %v4992_v25 = vld [vmem:[%s5392_s2 + $0x5b8] sm:$0xff] }
 0x8d9   :  { %2122 = vmatpush.msrb.mxu2 %v4976_v51  ;;  %2142 = vmatpush.msrb.mxu3 %v4871_v44 }
 0x8da   :  { %2055 = vmatpush.msrb.mxu1 %v4549_v32  ;;  %v5000_v32 = vld [vmem:[%s5392_s2 + $0x5a0] sm:$0xff] }
 0x8db   :  { %2123 = vmatpush.msrb.mxu2 %v4984_v38  ;;  %2143 = vmatpush.msrb.mxu3 %v4879_v58 }
 0x8dc   :  { %2056 = vmatpush.msrb.mxu1 %v4563_v35  ;;  %v5008_v35 = vld [vmem:[%s5392_s2 + $0x588] sm:$0xff] }
 0x8dd   :  { %2124 = vmatpush.msrb.mxu2 %v4992_v25  ;;  %2144 = vmatpush.msrb.mxu3 %v4887_v37 }
 0x8de   :  { %2057 = vmatpush.msrb.mxu1 %v4577_v36  ;;  %v5016_v36 = vld [vmem:[%s5392_s2 + $0x570] sm:$0xff] }
 0x8df   :  { %2125 = vmatpush.msrb.mxu2 %v5000_v32  ;;  %2145 = vmatpush.msrb.mxu3 %v4895_v42 }
 0x8e0   :  { %2058 = vmatpush.msrb.mxu1 %v4591_v57  ;;  %v5027_v57 = vld [vmem:[%s5392_s2 + $0x540] sm:$0xff] }
 0x8e1   :  { %2126 = vmatpush.msrb.mxu2 %v5008_v35  ;;  %2146 = vmatpush.msrb.mxu3 %v4903_v50 }
 0x8e2   :  { %2059 = vmatpush.msrb.mxu1 %v4600_v7  ;;  %v5035_v7 = vld [vmem:[%s5392_s2 + $0x528] sm:$0xff] }
 0x8e3   :  { %2127 = vmatpush.msrb.mxu2 %v5016_v36  ;;  %2147 = vmatpush.msrb.mxu3 %v4911_v59 }
 0x8e4   :  { %2060 = vmatpush.msrb.mxu1 %v4609_v13  ;;  %v5052_v13 = vld [vmem:[%s5392_s2 + $0x500] sm:$0xff] }
 0x8e5   :  { %2128 = vmatpush.msrb.mxu2 %v4497_v9  ;;  %2148 = vmatpush.msrb.mxu3 %v4919_v4  ;;  %v5044_v9 = vld [vmem:[%s5392_s2 + $0x518] sm:$0xff] }
 0x8e6   :  { %2061 = vmatpush.msrb.mxu1 %v4617_v31 }
 0x8e7   :  { %2129 = vmatpush.msrb.mxu2 %v5027_v57  ;;  %2149 = vmatpush.msrb.mxu3 %v4927_v12 }
 0x8e8   :  { %2062 = vmatpush.msrb.mxu1 %v4625_v53 }
 0x8e9   :  { %2130 = vmatpush.msrb.mxu2 %v5035_v7  ;;  %2150 = vmatpush.msrb.mxu3 %v4935_v60 }
 0x8ea   :  { %2063 = vmatpush.msrb.mxu1 %v4633_v5 }
 0x8eb   :  { %2131 = vmatpush.msrb.mxu2 %v4518_v47  ;;  %2151 = vmatpush.msrb.mxu3 %v5044_v9  ;;  %v5060_v47 = vld [vmem:[%s5392_s2 + $0x4e8] sm:$0xff] }
 0x8ec   :  { %2064 = vmatpush.msrb.mxu1 %v4641_v48 }
 0x8ed   :  { %2132 = vmatpush.msrb.mxu2 %v4525_v10  ;;  %2152 = vmatpush.msrb.mxu3 %v5052_v13  ;;  %v5068_v10 = vld [vmem:[%s5392_s2 + $0x4d0] sm:$0xff] }
 0x8ee   :  { %2065 = vmatpush.msrb.mxu1 %v4649_v20 }
 0x8ef   :  { %2133 = vmatpush.msrb.mxu2 %v4532_v18  ;;  %2153 = vmatpush.msrb.mxu3 %v5060_v47  ;;  %v5076_v18 = vld [vmem:[%s5392_s2 + $0x4b8] sm:$0xff] }
 0x8f0   :  { %2066 = vmatpush.msrb.mxu1 %v4658_v52 }
 0x8f1   :  { %2134 = vmatpush.msrb.mxu2 %v4544_v26  ;;  %2154 = vmatpush.msrb.mxu3 %v5068_v10  ;;  %v5084_v26 = vld [vmem:[%s5392_s2 + $0x4a0] sm:$0xff] }
 0x8f2   :  { %2067 = vmatpush.msrb.mxu1 %v4665_v6 }
 0x8f3   :  { %2135 = vmatpush.msrb.mxu2 %v4558_v43  ;;  %2155 = vmatpush.msrb.mxu3 %v5076_v18  ;;  %v5092_v43 = vld [vmem:[%s5392_s2 + $0x488] sm:$0xff] }
 0x8f4   :  { %2068 = vmatpush.msrb.mxu1 %v5532_v29 }
 0x8f5   :  { %2136 = vmatpush.msrb.mxu2 %v5533_v19  ;;  %2156 = vmatpush.msrb.mxu3 %v5084_v26 }
 0x8f6   :  { %2069 = vmatpush.msrb.mxu1 %v5535_v11 }
 0x8f7   :  { %2137 = vmatpush.msrb.mxu2 %v5536_v23  ;;  %2157 = vmatpush.msrb.mxu3 %v5092_v43 }
 0x954   :  { %v1815_v31 = vpop.f32.mrf.mxu1 }
 0x955   :  { %v1858_v53 = vadd.f32 %v1815_v31, %v5540_v41 }
 0x957   :  { %v2450_v5 = vmul.f32 -1.442695, %v1858_v53 }
 0x959   :  { %2593 = vpow2.f32 %v2450_v5 }
 0x95a   :  { %v1835_v48 = vpop.f32.mrf.mxu2 }
 0x95b   :  { %v1878_v20 = vadd.f32 %v1835_v48, %v5541_v15  ;;  %v1855_v33 = vpop.f32.mrf.mxu3 }
 0x95c   :  { %v1898_v55 = vadd.f32 %v1855_v33, %v4793_v2 }
 0x95d   :  { %v2451_v52 = vmul.f32 -1.442695, %v1878_v20 }
 0x95f   :  { %v2594_v6 = vpop.eup %2593  ;;  %2595 = vpow2.f32 %v2451_v52 }
 0x960   :  { %v1862_v29 = vadd.f32 1.0, %v2594_v6  ;;  %v5108_v6 = vld [vmem:[%s5392_s2 + $0x5f8] sm:$0xff] }
 0x962   :  { %2597 = vrcp.f32 %v1862_v29  ;;  %v1874_v61 = vand.u32 2147483648, %v1862_v29  ;;  %v1872_v39 = vand.u32 2147483647, %v1862_v29  ;;  %vm1868_vm8 = vweird.f32 %v1862_v29 }
 0x964   :  { %v1875_v24 = vor.u32 1.1754944e-38, %v1874_v61  ;;  %vm1873_vm10 = vcmp.eq.f32.partialorder %v1872_v39, 8.507059e+37 }
 0x965   :  { %v2596_v19 = vpop.eup %2595 }
 0x966   :  { %v1882_v11 = vadd.f32 1.0, %v2596_v19  ;;  %v5124_v19 = vld [vmem:[%s5392_s2 + $0x5c8] sm:$0xff] }
 0x968   :  { %v2598_v23 = vpop.eup %2597  ;;  %2599 = vrcp.f32 %v1882_v11  ;;  %v1894_v0 = vand.u32 2147483648, %v1882_v11  ;;  %v1892_v16 = vand.u32 2147483647, %v1882_v11  ;;  %vm1888_vm12 = vweird.f32 %v1882_v11 }
 0x969   :  { %v1864_v54 = vmul.f32 %v2598_v23, %v1862_v29  ;;  %vm1869_vm7 = vweird.f32 %v2598_v23  ;;  %v5116_v29 = vld [vmem:[%s5392_s2 + $0x5e0] sm:$0xff] }
 0x96a   :  { %vm1870_vm9 = vmor %vm1868_vm8, %vm1869_vm7  ;;  %v1895_v3 = vor.u32 1.1754944e-38, %v1894_v0  ;;  %vm1893_vm14 = vcmp.eq.f32.partialorder %v1892_v16, 8.507059e+37 }
 0x96b   :  { %v1865_v30 = vsub.f32 1.0, %v1864_v54 }
 0x96d   :  { %v1866_v21 = vmul.f32 %v2598_v23, %v1865_v30 }
 0x96e   :  { %v2600_v14 = vpop.eup %2599 }
 0x96f   :  { %v1884_v56 = vmul.f32 %v2600_v14, %v1882_v11  ;;  %v1867_v45 = vadd.f32 %v2598_v23, %v1866_v21  ;;  %vm1889_vm11 = vweird.f32 %v2600_v14 }
 0x970   :  { %vm1890_vm13 = vmor %vm1888_vm12, %vm1889_vm11 }
 0x971   :  { %v1885_v8 = vsub.f32 1.0, %v1884_v56  ;;  %v1871_v28 = vsel %vm1870_vm9, %v2598_v23, %v1867_v45 }
 0x972   :  { %v1876_v62 = vsel %vm1873_vm10, %v1875_v24, %v1871_v28 }
 0x973   :  { %v1886_v22 = vmul.f32 %v2600_v14, %v1885_v8  ;;  %v1899_v63 = vmul.f32 %v1898_v55, %v1876_v62 }
 0x975   :  { %v1887_v17 = vadd.f32 %v2600_v14, %v1886_v22  ;;  %v1900_v46 = vadd.f32 %v1899_v63, %v4799_v34 }
 0x977   :  { %v1891_v27 = vsel %vm1890_vm13, %v2600_v14, %v1887_v17  ;;  %2601 = vtanh.f32 %v1900_v46 }
 0x978   :  { %v1896_v31 = vsel %vm1893_vm14, %v1895_v3, %v1891_v27 }
 0x979   :  { %v1902_v53 = vsub.f32 1.0, %v1896_v31  ;;  %v1904_v20 = vmul.f32 %v1896_v31, %v4967_v40 }
 0x97d   :  { %v2602_v5 = vpop.eup %2601 }
 0x97e   :  { %v1903_v48 = vmul.f32 %v2602_v5, %v1902_v53 }
 0x980   :  { %v5100_v52 = vadd.f32 %v1904_v20, %v1903_v48 }
 0x982   :  { %1922 = vmatmul.f32.vlgmr.msra.gmra.mxu0 %v5100_v52  ;;  %1942 = vmatmul.f32.vlgmr.msra.gmra.mxu1 %v5100_v52 }
 0x983   :  { %1962 = vmatmul.f32.vlgmr.msra.gmra.mxu2 %v5100_v52  ;;  %2162 = vmatpush.msra.mxu0 %v5108_v6 }
 0x984   :  { %2230 = vmatpush.msra.mxu1 %v4976_v51  ;;  %2250 = vmatpush.msra.mxu2 %v4871_v44  ;;  %v5132_v44 = vld [vmem:[%s5392_s2 + $0x5b0] sm:$0xff] }
 0x985   :  { %2163 = vmatpush.msra.mxu0 %v5116_v29  ;;  %v5166_v51 = vld [vmem:[%s5392_s2 + $0x550] sm:$0xff] }
 0x986   :  { %2231 = vmatpush.msra.mxu1 %v4984_v38  ;;  %2251 = vmatpush.msra.mxu2 %v4879_v58  ;;  %v5140_v58 = vld [vmem:[%s5392_s2 + $0x598] sm:$0xff]  ;;  %v5192_v38 = vld [vmem:[%s5392_s2 + $0x508] sm:$0xff] }
 0x987   :  { %2164 = vmatpush.msra.mxu0 %v5124_v19 }
 0x988   :  { %2232 = vmatpush.msra.mxu1 %v4992_v25  ;;  %2252 = vmatpush.msra.mxu2 %v4887_v37  ;;  %v5148_v37 = vld [vmem:[%s5392_s2 + $0x580] sm:$0xff]  ;;  %v5202_v25 = vld [vmem:[%s5392_s2 + $0x4f0] sm:$0xff] }
 0x989   :  { %2165 = vmatpush.msra.mxu0 %v5132_v44 }
 0x98a   :  { %2233 = vmatpush.msra.mxu1 %v5000_v32  ;;  %2253 = vmatpush.msra.mxu2 %v4895_v42  ;;  %v5156_v42 = vld [vmem:[%s5392_s2 + $0x568] sm:$0xff]  ;;  %v2733_v32 = vld [vmem:[%s5392_s2 + $0x4e0] sm:$0xff] }
 0x98b   :  { %2166 = vmatpush.msra.mxu0 %v5140_v58 }
 0x98c   :  { %2234 = vmatpush.msra.mxu1 %v5008_v35  ;;  %2254 = vmatpush.msra.mxu2 %v4903_v50  ;;  %v2725_v50 = vld [vmem:[%s5392_s2 + $0x558] sm:$0xff] }
 0x98d   :  { %2167 = vmatpush.msra.mxu0 %v5148_v37  ;;  %v5212_v35 = vld [vmem:[%s5392_s2 + $0x4d8] sm:$0xff] }
 0x98e   :  { %2235 = vmatpush.msra.mxu1 %v5016_v36  ;;  %2255 = vmatpush.msra.mxu2 %v4911_v59  ;;  %v5174_v59 = vld [vmem:[%s5392_s2 + $0x538] sm:$0xff]  ;;  %v2735_v36 = vld [vmem:[%s5392_s2 + $0x4c8] sm:$0xff] }
 0x98f   :  { %2168 = vmatpush.msra.mxu0 %v5156_v42 }
 0x990   :  { %2236 = vmatpush.msra.mxu1 %v2725_v50  ;;  %2256 = vmatpush.msra.mxu2 %v4919_v4  ;;  %v5182_v4 = vld [vmem:[%s5392_s2 + $0x520] sm:$0xff] }
 0x991   :  { %2169 = vmatpush.msra.mxu0 %v5166_v51 }
 0x992   :  { %2237 = vmatpush.msra.mxu1 %v5027_v57  ;;  %2257 = vmatpush.msra.mxu2 %v4927_v12  ;;  %v2729_v12 = vld [vmem:[%s5392_s2 + $0x510] sm:$0xff]  ;;  %v5222_v57 = vld [vmem:[%s5392_s2 + $0x4c0] sm:$0xff] }
 0x993   :  { %2170 = vmatpush.msra.mxu0 %v5174_v59 }
 0x994   :  { %2238 = vmatpush.msra.mxu1 %v5035_v7  ;;  %2258 = vmatpush.msra.mxu2 %v4935_v60  ;;  %v2731_v60 = vld [vmem:[%s5392_s2 + $0x4f8] sm:$0xff]  ;;  %v2737_v7 = vld [vmem:[%s5392_s2 + $0x4b0] sm:$0xff] }
 0x995   :  { %2171 = vmatpush.msra.mxu0 %v5182_v4 }
 0x996   :  { %2239 = vmatpush.msra.mxu1 %v2729_v12  ;;  %2259 = vmatpush.msra.mxu2 %v5044_v9  ;;  %v5232_v9 = vld [vmem:[%s5392_s2 + $0x4a8] sm:$0xff] }
 0x997   :  { %2172 = vmatpush.msra.mxu0 %v5192_v38 }
 0x998   :  { %2240 = vmatpush.msra.mxu1 %v2731_v60  ;;  %2260 = vmatpush.msra.mxu2 %v5052_v13  ;;  %v2739_v13 = vld [vmem:[%s5392_s2 + $0x498] sm:$0xff] }
 0x999   :  { %2173 = vmatpush.msra.mxu0 %v5202_v25 }
 0x99a   :  { %2241 = vmatpush.msra.mxu1 %v2733_v32  ;;  %2261 = vmatpush.msra.mxu2 %v5060_v47  ;;  %v5242_v47 = vld [vmem:[%s5392_s2 + $0x490] sm:$0xff] }
 0x99b   :  { %2174 = vmatpush.msra.mxu0 %v5212_v35 }
 0x99c   :  { %2242 = vmatpush.msra.mxu1 %v2735_v36  ;;  %2262 = vmatpush.msra.mxu2 %v5068_v10  ;;  %v2741_v10 = vld [vmem:[%s5392_s2 + $0x480] sm:$0xff] }
 0x99d   :  { %2175 = vmatpush.msra.mxu0 %v5222_v57 }
 0x99e   :  { %2243 = vmatpush.msra.mxu1 %v2737_v7  ;;  %2263 = vmatpush.msra.mxu2 %v5076_v18 }
 0x99f   :  { %2176 = vmatpush.msra.mxu0 %v5232_v9 }
 0x9a0   :  { %2244 = vmatpush.msra.mxu1 %v2739_v13  ;;  %2264 = vmatpush.msra.mxu2 %v5084_v26 }
 0x9a1   :  { %2177 = vmatpush.msra.mxu0 %v5242_v47 }
 0x9a2   :  { %2245 = vmatpush.msra.mxu1 %v2741_v10  ;;  %2265 = vmatpush.msra.mxu2 %v5092_v43 }
 0x9ff   :  { %v1923_v18 = vpop.f32.mrf.mxu0  ;;  %v1943_v11 = vpop.f32.mrf.mxu1 }
 0xa00   :  { %v1966_v23 = vadd.f32 %v1923_v18, %v5540_v41  ;;  %v1986_v26 = vadd.f32 %v1943_v11, %v5541_v15  ;;  %v257_v18 = vld [vmem:[%s5396_s4 + $0xb0] sm:$0xff]  ;;  %v256_v11 = vld [vmem:[%s5396_s4 + $0xa8] sm:$0xff] }
 0xa02   :  { %v2452_v54 = vmul.f32 -1.442695, %v1966_v23  ;;  %v2453_v30 = vmul.f32 -1.442695, %v1986_v26  ;;  %v255_v26 = vld [vmem:[%s5396_s4 + $0xa0] sm:$0xff] }
 0xa04   :  { %2603 = vpow2.f32 %v2452_v54 }
 0xa05   :  { %2605 = vpow2.f32 %v2453_v30 }
 0xa06   :  { %v1963_v0 = vpop.f32.mrf.mxu2 }
 0xa07   :  { %v2006_v46 = vadd.f32 %v1963_v0, %v4793_v2 }
 0xa0a   :  { %v2604_v61 = vpop.eup %2603 }
 0xa0b   :  { %v2606_v21 = vpop.eup %2605  ;;  %v1970_v39 = vadd.f32 1.0, %v2604_v61  ;;  %v254_v61 = vld [vmem:[%s5396_s4 + $0x98] sm:$0xff] }
 0xa0c   :  { %v1990_v14 = vadd.f32 1.0, %v2606_v21  ;;  %v253_v21 = vld [vmem:[%s5396_s4 + $0x90] sm:$0xff] }
 0xa0d   :  { %2607 = vrcp.f32 %v1970_v39  ;;  %v1982_v28 = vand.u32 2147483648, %v1970_v39  ;;  %v1980_v62 = vand.u32 2147483647, %v1970_v39  ;;  %vm1976_vm0 = vweird.f32 %v1970_v39 }
 0xa0e   :  { %2609 = vrcp.f32 %v1990_v14  ;;  %v2002_v31 = vand.u32 2147483648, %v1990_v14  ;;  %vm1996_vm4 = vweird.f32 %v1990_v14  ;;  %v2000_v5 = vand.u32 2147483647, %v1990_v14 }
 0xa0f   :  { %v1983_v16 = vor.u32 1.1754944e-38, %v1982_v28  ;;  %vm1981_vm2 = vcmp.eq.f32.partialorder %v1980_v62, 8.507059e+37 }
 0xa10   :  { %v2003_v50 = vor.u32 1.1754944e-38, %v2002_v31  ;;  %vm2001_vm6 = vcmp.eq.f32.partialorder %v2000_v5, 8.507059e+37 }
 0xa13   :  { %v2608_v33 = vpop.eup %2607 }
 0xa14   :  { %v2610_v56 = vpop.eup %2609  ;;  %v1972_v45 = vmul.f32 %v2608_v33, %v1970_v39  ;;  %vm1977_vm15 = vweird.f32 %v2608_v33  ;;  %v252_v39 = vld [vmem:[%s5396_s4 + $0x88] sm:$0xff] }
 0xa15   :  { %v1992_v43 = vmul.f32 %v2610_v56, %v1990_v14  ;;  %vm1978_vm1 = vmor %vm1976_vm0, %vm1977_vm15  ;;  %vm1997_vm3 = vweird.f32 %v2610_v56 }
 0xa16   :  { %v1973_v24 = vsub.f32 1.0, %v1972_v45  ;;  %vm1998_vm5 = vmor %vm1996_vm4, %vm1997_vm3 }
 0xa17   :  { %v1993_v8 = vsub.f32 1.0, %v1992_v43 }
 0xa18   :  { %v1974_v55 = vmul.f32 %v2608_v33, %v1973_v24 }
 0xa19   :  { %v1994_v22 = vmul.f32 %v2610_v56, %v1993_v8 }
 0xa1a   :  { %v1975_v63 = vadd.f32 %v2608_v33, %v1974_v55 }
 0xa1b   :  { %v1995_v3 = vadd.f32 %v2610_v56, %v1994_v22 }
 0xa1c   :  { %v1979_v17 = vsel %vm1978_vm1, %v2608_v33, %v1975_v63  ;;  %v251_v33 = vld [vmem:[%s5396_s4 + $0x80] sm:$0xff] }
 0xa1d   :  { %v1984_v27 = vsel %vm1981_vm2, %v1983_v16, %v1979_v17  ;;  %v1999_v20 = vsel %vm1998_vm5, %v2610_v56, %v1995_v3 }
 0xa1e   :  { %v2007_v53 = vmul.f32 %v2006_v46, %v1984_v27  ;;  %v2004_v12 = vsel %vm2001_vm6, %v2003_v50, %v1999_v20 }
 0xa1f   :  { %v2010_v60 = vsub.f32 1.0, %v2004_v12  ;;  %v2012_v7 = vmul.f32 %v2004_v12, %v5100_v52 }
 0xa20   :  { %v2008_v48 = vadd.f32 %v2007_v53, %v4799_v34 }
 0xa22   :  { %2611 = vtanh.f32 %v2008_v48 }
 0xa28   :  { %v2612_v32 = vpop.eup %2611 }
 0xa29   :  { %v2011_v36 = vmul.f32 %v2612_v32, %v2010_v60 }
 0xa2b   :  { %v5254_v13 = vadd.f32 %v2012_v7, %v2011_v36 }
 0xa2d   :  { %2030 = vmatmul.f32.vlgmr.msra.gmra.mxu3 %v5254_v13  ;;  %2050 = vmatmul.f32.vlgmr.msrb.gmra.mxu0 %v5254_v13 }
 0xa2e   :  { %2070 = vmatmul.f32.vlgmr.msrb.gmra.mxu1 %v5254_v13  ;;  %2270 = vmatpush.msra.mxu3 %v5108_v6  ;;  %v266_v6 = vld [vmem:[%s5396_s4 + $0xf8] sm:$0xff] }
 0xa2f   :  { %2339 = vmatpush.msrb.mxu0 %v266_v6 }
 0xa30   :  { %2271 = vmatpush.msra.mxu3 %v5116_v29  ;;  %v265_v29 = vld [vmem:[%s5396_s4 + $0xf0] sm:$0xff] }
 0xa31   :  { %2340 = vmatpush.msrb.mxu0 %v265_v29 }
 0xa32   :  { %2272 = vmatpush.msra.mxu3 %v5124_v19 }
 0xa34   :  { %2273 = vmatpush.msra.mxu3 %v5132_v44 }
 0xa36   :  { %2274 = vmatpush.msra.mxu3 %v5140_v58  ;;  %v264_v58 = vld [vmem:[%s5396_s4 + $0xe8] sm:$0xff] }
 0xa37   :  { %2341 = vmatpush.msrb.mxu0 %v264_v58 }
 0xa38   :  { %2275 = vmatpush.msra.mxu3 %v5148_v37 }
 0xa3a   :  { %2276 = vmatpush.msra.mxu3 %v5156_v42  ;;  %v263_v42 = vld [vmem:[%s5396_s4 + $0xe0] sm:$0xff] }
 0xa3b   :  { %2342 = vmatpush.msrb.mxu0 %v263_v42 }
 0xa3c   :  { %2277 = vmatpush.msra.mxu3 %v5166_v51  ;;  %v262_v51 = vld [vmem:[%s5396_s4 + $0xd8] sm:$0xff] }
 0xa3d   :  { %2343 = vmatpush.msrb.mxu0 %v262_v51 }
 0xa3e   :  { %2278 = vmatpush.msra.mxu3 %v5174_v59  ;;  %v261_v59 = vld [vmem:[%s5396_s4 + $0xd0] sm:$0xff] }
 0xa3f   :  { %2344 = vmatpush.msrb.mxu0 %v261_v59 }
 0xa40   :  { %2279 = vmatpush.msra.mxu3 %v5182_v4 }
 0xa42   :  { %2280 = vmatpush.msra.mxu3 %v5192_v38 }
 0xa44   :  { %2281 = vmatpush.msra.mxu3 %v5202_v25  ;;  %v260_v25 = vld [vmem:[%s5396_s4 + $0xc8] sm:$0xff] }
 0xa45   :  { %2345 = vmatpush.msrb.mxu0 %v260_v25 }
 0xa46   :  { %2282 = vmatpush.msra.mxu3 %v5212_v35 }
 0xa48   :  { %2283 = vmatpush.msra.mxu3 %v5222_v57  ;;  %v259_v57 = vld [vmem:[%s5396_s4 + $0xc0] sm:$0xff] }
 0xa49   :  { %2346 = vmatpush.msrb.mxu0 %v259_v57 }
 0xa4a   :  { %2284 = vmatpush.msra.mxu3 %v5232_v9 }
 0xa4c   :  { %2285 = vmatpush.msra.mxu3 %v5242_v47  ;;  %v258_v47 = vld [vmem:[%s5396_s4 + $0xb8] sm:$0xff] }
 0xa4d   :  { %2347 = vmatpush.msrb.mxu0 %v258_v47 }
 0xa4f   :  { %2348 = vmatpush.msrb.mxu0 %v257_v18 }
 0xa51   :  { %2349 = vmatpush.msrb.mxu0 %v256_v11 }
 0xa53   :  { %2350 = vmatpush.msrb.mxu0 %v255_v26 }
 0xa55   :  { %2351 = vmatpush.msrb.mxu0 %v254_v61 }
 0xa57   :  { %2352 = vmatpush.msrb.mxu0 %v253_v21 }
 0xa59   :  { %2353 = vmatpush.msrb.mxu0 %v252_v39 }
 0xa5b   :  { %2354 = vmatpush.msrb.mxu0 %v251_v33 }
 0xaaa   :  { %v2051_v19 = vpop.f32.mrf.mxu0 }
 0xaab   :  { %v2094_v44 = vadd.f32 %v2051_v19, %v5541_v15  ;;  %v2071_v22 = vpop.f32.mrf.mxu1 }
 0xaac   :  { %v2114_v16 = vadd.f32 %v2071_v22, %v4793_v2 }
 0xaad   :  { %v2455_v37 = vmul.f32 -1.442695, %v2094_v44  ;;  %v2742_v44 = vld [vmem:[%s5394_s3] sm:$0xff] }
 0xaae   :  { %v5342_v58 = vperm.slane %v2742_v44, 5 }
 0xaaf   :  { %2613 = vpow2.f32 %v2455_v37 }
 0xab0   :  { %v2031_v4 = vpop.f32.mrf.mxu3 }
 0xab1   :  { %v2074_v38 = vadd.f32 %v2031_v4, %v5540_v41 }
 0xab3   :  { %v2454_v35 = vmul.f32 -1.442695, %v2074_v38 }
 0xab5   :  { %v2614_v9 = vpop.eup %2613  ;;  %2615 = vpow2.f32 %v2454_v35 }
 0xab6   :  { %v2098_v10 = vadd.f32 1.0, %v2614_v9 }
 0xab8   :  { %2617 = vrcp.f32 %v2098_v10  ;;  %v2110_v27 = vand.u32 2147483648, %v2098_v10  ;;  %vm2104_vm12 = vweird.f32 %v2098_v10  ;;  %v2108_v53 = vand.u32 2147483647, %v2098_v10 }
 0xaba   :  { %v2111_v20 = vor.u32 1.1754944e-38, %v2110_v27  ;;  %vm2109_vm14 = vcmp.eq.f32.partialorder %v2108_v53, 8.507059e+37 }
 0xabb   :  { %v2616_v23 = vpop.eup %2615 }
 0xabc   :  { %v2078_v54 = vadd.f32 1.0, %v2616_v23 }
 0xabe   :  { %2619 = vrcp.f32 %v2078_v54  ;;  %v2618_v30 = vpop.eup %2617  ;;  %v2090_v8 = vand.u32 2147483648, %v2078_v54  ;;  %v2088_v55 = vand.u32 2147483647, %v2078_v54  ;;  %vm2084_vm8 = vweird.f32 %v2078_v54 }
 0xabf   :  { %v2100_v14 = vmul.f32 %v2618_v30, %v2098_v10  ;;  %vm2105_vm11 = vweird.f32 %v2618_v30 }
 0xac0   :  { %v2091_v63 = vor.u32 1.1754944e-38, %v2090_v8  ;;  %vm2089_vm10 = vcmp.eq.f32.partialorder %v2088_v55, 8.507059e+37  ;;  %vm2106_vm13 = vmor %vm2104_vm12, %vm2105_vm11 }
 0xac1   :  { %v2101_v43 = vsub.f32 1.0, %v2100_v14 }
 0xac3   :  { %v2102_v62 = vmul.f32 %v2618_v30, %v2101_v43 }
 0xac4   :  { %v2620_v56 = vpop.eup %2619 }
 0xac5   :  { %v2080_v45 = vmul.f32 %v2620_v56, %v2078_v54  ;;  %vm2085_vm7 = vweird.f32 %v2620_v56  ;;  %v2103_v46 = vadd.f32 %v2618_v30, %v2102_v62 }
 0xac6   :  { %vm2086_vm9 = vmor %vm2084_vm8, %vm2085_vm7 }
 0xac7   :  { %v2081_v24 = vsub.f32 1.0, %v2080_v45  ;;  %v2107_v48 = vsel %vm2106_vm13, %v2618_v30, %v2103_v46 }
 0xac8   :  { %v2112_v50 = vsel %vm2109_vm14, %v2111_v20, %v2107_v48 }
 0xac9   :  { %v2082_v28 = vmul.f32 %v2620_v56, %v2081_v24  ;;  %v2118_v12 = vsub.f32 1.0, %v2112_v50  ;;  %v2120_v36 = vmul.f32 %v2112_v50, %v5254_v13 }
 0xacb   :  { %v2083_v0 = vadd.f32 %v2620_v56, %v2082_v28 }
 0xacd   :  { %v2087_v17 = vsel %vm2086_vm9, %v2620_v56, %v2083_v0 }
 0xace   :  { %v2092_v3 = vsel %vm2089_vm10, %v2091_v63, %v2087_v17 }
 0xacf   :  { %v2115_v31 = vmul.f32 %v2114_v16, %v2092_v3 }
 0xad1   :  { %v2116_v5 = vadd.f32 %v2115_v31, %v4799_v34 }
 0xad3   :  { %2621 = vtanh.f32 %v2116_v5 }
 0xad9   :  { %v2622_v60 = vpop.eup %2621 }
 0xada   :  { %v2119_v32 = vmul.f32 %v2622_v60, %v2118_v12 }
 0xadc   :  { %v5328_v7 = vadd.f32 %v2120_v36, %v2119_v32 }
 0xade   :  { %2138 = vmatmul.f32.vlgmr.msrb.gmra.mxu2 %v5328_v7  ;;  %2158 = vmatmul.f32.vlgmr.msrb.gmra.mxu3 %v5328_v7 }
 0xadf   :  { %2178 = vmatmul.f32.vlgmr.msra.gmra.mxu0 %v5328_v7 }
 0xae7   :  { %2355 = vmatmul.f32.vlgmr.msrb.gmra.mxu0 %v4802_v1 }
 0xaef   :  { %2358 = vmatmul.f32.gmra.mxu0 %v4861_v49 }
 0xaf7   :  { %2361 = vmatmul.f32.gmra.mxu0 %v4967_v40 }
 0xaff   :  { %2364 = vmatmul.f32.gmra.mxu0 %v5100_v52 }
 0xb07   :  { %2367 = vmatmul.f32.gmra.mxu0 %v5254_v13 }
 0xb0f   :  { %2370 = vmatmul.f32.gmra.mxu0 %v5328_v7 }
 0xb5c   :  { %v2179_v6 = vpop.f32.mrf.mxu0 }
 0xb5d   :  { %v2222_v55 = vadd.f32 %v2179_v6, %v4793_v2 }
 0xb61   :  { %v2139_v29 = vpop.f32.mrf.mxu2  ;;  %v2159_v19 = vpop.f32.mrf.mxu3 }
 0xb62   :  { %v2182_v1 = vadd.f32 %v2139_v29, %v5540_v41  ;;  %v2202_v49 = vadd.f32 %v2159_v19, %v5541_v15 }
 0xb64   :  { %v2456_v40 = vmul.f32 -1.442695, %v2182_v1  ;;  %v2457_v37 = vmul.f32 -1.442695, %v2202_v49  ;;  %v2356_v52 = vpop.f32.mrf.mxu0 }
 0xb65   :  { %v2357_v13 = vadd.f32 %v2356_v52, %v5342_v58 }
 0xb66   :  { %2623 = vpow2.f32 %v2456_v40 }
 0xb67   :  { %2625 = vpow2.f32 %v2457_v37  ;;  %vm2380_vm15 = vcmp.gt.f32.partialorder %v2357_v13, 0.0  ;;  %v2388_v42 = vmul.f32 0.01, %v2357_v13 }
 0xb69   :  { %v2396_v51 = vsel %vm2380_vm15, %v2357_v13, %v2388_v42 }
 0xb6a   :  { %2404 = vst [vmem:[%s5399_s5] sm:$0xff] %v2396_v51 }
 0xb6c   :  { %v2624_v59 = vpop.eup %2623  ;;  %v2359_v4 = vpop.f32.mrf.mxu0 }
 0xb6d   :  { %v2626_v38 = vpop.eup %2625  ;;  %v2186_v25 = vadd.f32 1.0, %v2624_v59  ;;  %v2360_v35 = vadd.f32 %v2359_v4, %v5342_v58 }
 0xb6e   :  { %v2206_v57 = vadd.f32 1.0, %v2626_v38 }
 0xb6f   :  { %2627 = vrcp.f32 %v2186_v25  ;;  %vm2381_vm0 = vcmp.gt.f32.partialorder %v2360_v35, 0.0  ;;  %v2389_v9 = vmul.f32 0.01, %v2360_v35  ;;  %v2198_v21 = vand.u32 2147483648, %v2186_v25 }
 0xb70   :  { %2629 = vrcp.f32 %v2206_v57  ;;  %v2196_v56 = vand.u32 2147483647, %v2186_v25  ;;  %vm2192_vm3 = vweird.f32 %v2186_v25  ;;  %v2218_v17 = vand.u32 2147483648, %v2206_v57 }
 0xb71   :  { %v2397_v47 = vsel %vm2381_vm0, %v2360_v35, %v2389_v9  ;;  %v2199_v8 = vor.u32 1.1754944e-38, %v2198_v21  ;;  %vm2212_vm8 = vweird.f32 %v2206_v57  ;;  %v2216_v46 = vand.u32 2147483647, %v2206_v57 }
 0xb72   :  { %2405 = vst [vmem:[%s5399_s5 + $0x8] sm:$0xff] %v2397_v47  ;;  %vm2197_vm5 = vcmp.eq.f32.partialorder %v2196_v56, 8.507059e+37  ;;  %v2219_v53 = vor.u32 1.1754944e-38, %v2218_v17 }
 0xb73   :  { %vm2217_vm10 = vcmp.eq.f32.partialorder %v2216_v46, 8.507059e+37 }
 0xb74   :  { %v2362_v10 = vpop.f32.mrf.mxu0 }
 0xb75   :  { %v2628_v18 = vpop.eup %2627  ;;  %v2363_v11 = vadd.f32 %v2362_v10, %v5342_v58 }
 0xb76   :  { %v2630_v23 = vpop.eup %2629  ;;  %v2188_v26 = vmul.f32 %v2628_v18, %v2186_v25  ;;  %vm2193_vm2 = vweird.f32 %v2628_v18 }
 0xb77   :  { %v2208_v54 = vmul.f32 %v2630_v23, %v2206_v57  ;;  %vm2382_vm1 = vcmp.gt.f32.partialorder %v2363_v11, 0.0  ;;  %v2390_v30 = vmul.f32 0.01, %v2363_v11  ;;  %vm2194_vm4 = vmor %vm2192_vm3, %vm2193_vm2  ;;  %vm2213_vm6 = vweird.f32 %v2630_v23 }
 0xb78   :  { %v2189_v61 = vsub.f32 1.0, %v2188_v26  ;;  %vm2214_vm9 = vmor %vm2212_vm8, %vm2213_vm6 }
 0xb79   :  { %v2209_v39 = vsub.f32 1.0, %v2208_v54  ;;  %v2398_v14 = vsel %vm2382_vm1, %v2363_v11, %v2390_v30 }
 0xb7a   :  { %v2190_v33 = vmul.f32 %v2628_v18, %v2189_v61  ;;  %2406 = vst [vmem:[%s5399_s5 + $0x10] sm:$0xff] %v2398_v14 }
 0xb7b   :  { %v2210_v45 = vmul.f32 %v2630_v23, %v2209_v39 }
 0xb7c   :  { %v2191_v43 = vadd.f32 %v2628_v18, %v2190_v33  ;;  %v2365_v24 = vpop.f32.mrf.mxu0 }
 0xb7d   :  { %v2366_v28 = vadd.f32 %v2365_v24, %v5342_v58  ;;  %v2211_v0 = vadd.f32 %v2630_v23, %v2210_v45 }
 0xb7e   :  { %v2195_v62 = vsel %vm2194_vm4, %v2628_v18, %v2191_v43 }
 0xb7f   :  { %v2200_v22 = vsel %vm2197_vm5, %v2199_v8, %v2195_v62  ;;  %vm2383_vm7 = vcmp.gt.f32.partialorder %v2366_v28, 0.0  ;;  %v2391_v63 = vmul.f32 0.01, %v2366_v28  ;;  %v2215_v31 = vsel %vm2214_vm9, %v2630_v23, %v2211_v0 }
 0xb80   :  { %v2223_v16 = vmul.f32 %v2222_v55, %v2200_v22  ;;  %v2220_v20 = vsel %vm2217_vm10, %v2219_v53, %v2215_v31 }
 0xb81   :  { %v2399_v3 = vsel %vm2383_vm7, %v2366_v28, %v2391_v63  ;;  %v2226_v60 = vsub.f32 1.0, %v2220_v20  ;;  %v2228_v6 = vmul.f32 %v2220_v20, %v5328_v7 }
 0xb82   :  { %2407 = vst [vmem:[%s5399_s5 + $0x18] sm:$0xff] %v2399_v3  ;;  %v2224_v27 = vadd.f32 %v2223_v16, %v4799_v34 }
 0xb84   :  { %v2368_v5 = vpop.f32.mrf.mxu0  ;;  %2631 = vtanh.f32 %v2224_v27 }
 0xb85   :  { %v2369_v48 = vadd.f32 %v2368_v5, %v5342_v58 }
 0xb87   :  { %vm2384_vm11 = vcmp.gt.f32.partialorder %v2369_v48, 0.0  ;;  %v2392_v50 = vmul.f32 0.01, %v2369_v48 }
 0xb89   :  { %v2400_v12 = vsel %vm2384_vm11, %v2369_v48, %v2392_v50 }
 0xb8a   :  { %v2632_v32 = vpop.eup %2631  ;;  %2408 = vst [vmem:[%s5399_s5 + $0x20] sm:$0xff] %v2400_v12 }
 0xb8b   :  { %v2227_v36 = vmul.f32 %v2632_v32, %v2226_v60 }
 0xb8c   :  { %v2371_v29 = vpop.f32.mrf.mxu0 }
 0xb8d   :  { %v2372_v19 = vadd.f32 %v2371_v29, %v5342_v58  ;;  %v5370_v44 = vadd.f32 %v2228_v6, %v2227_v36 }
 0xb8f   :  { %vm2385_vm12 = vcmp.gt.f32.partialorder %v2372_v19, 0.0  ;;  %v2393_v1 = vmul.f32 0.01, %v2372_v19  ;;  %2246 = vmatmul.f32.vlgmr.msra.gmra.mxu1 %v5370_v44  ;;  %2266 = vmatmul.f32.vlgmr.msra.gmra.mxu2 %v5370_v44 }
 0xb90   :  { %2286 = vmatmul.f32.vlgmr.msra.gmra.mxu3 %v5370_v44  ;;  %2373 = vmatmul.f32.gmra.mxu0 %v5370_v44 }
 0xb91   :  { %v2401_v49 = vsel %vm2385_vm12, %v2372_v19, %v2393_v1 }
 0xb92   :  { %2409 = vst [vmem:[%s5399_s5 + $0x28] sm:$0xff] %v2401_v49 }
 0xc0c   :  { %v2247_v7 = vpop.f32.mrf.mxu1 }
 0xc0d   :  { %v2290_v40 = vadd.f32 %v2247_v7, %v5540_v41  ;;  %v2374_v37 = vpop.f32.mrf.mxu0 }
 0xc0e   :  { %v2375_v52 = vadd.f32 %v2374_v37, %v5342_v58 }
 0xc0f   :  { %v2458_v13 = vmul.f32 -1.442695, %v2290_v40 }
 0xc10   :  { %vm2386_vm13 = vcmp.gt.f32.partialorder %v2375_v52, 0.0  ;;  %v2394_v42 = vmul.f32 0.01, %v2375_v52 }
 0xc11   :  { %2633 = vpow2.f32 %v2458_v13 }
 0xc12   :  { %v2402_v51 = vsel %vm2386_vm13, %v2375_v52, %v2394_v42  ;;  %v2267_v59 = vpop.f32.mrf.mxu2 }
 0xc13   :  { %2410 = vst [vmem:[%s5399_s5 + $0x30] sm:$0xff] %v2402_v51  ;;  %v2310_v4 = vadd.f32 %v2267_v59, %v5541_v15  ;;  %v2287_v54 = vpop.f32.mrf.mxu3 }
 0xc14   :  { %v2330_v39 = vadd.f32 %v2287_v54, %v4793_v2 }
 0xc15   :  { %v2459_v38 = vmul.f32 -1.442695, %v2310_v4 }
 0xc17   :  { %v2634_v25 = vpop.eup %2633  ;;  %2635 = vpow2.f32 %v2459_v38 }
 0xc18   :  { %v2294_v35 = vadd.f32 1.0, %v2634_v25 }
 0xc1a   :  { %2637 = vrcp.f32 %v2294_v35  ;;  %v2306_v18 = vand.u32 2147483648, %v2294_v35  ;;  %v2304_v23 = vand.u32 2147483647, %v2294_v35  ;;  %vm2300_vm15 = vweird.f32 %v2294_v35 }
 0xc1c   :  { %v2307_v61 = vor.u32 1.1754944e-38, %v2306_v18  ;;  %vm2305_vm1 = vcmp.eq.f32.partialorder %v2304_v23, 8.507059e+37 }
 0xc1d   :  { %v2636_v41 = vpop.eup %2635 }
 0xc1e   :  { %v2314_v57 = vadd.f32 1.0, %v2636_v41 }
 0xc20   :  { %v2638_v9 = vpop.eup %2637  ;;  %2639 = vrcp.f32 %v2314_v57  ;;  %v2326_v43 = vand.u32 2147483648, %v2314_v57  ;;  %v2324_v24 = vand.u32 2147483647, %v2314_v57  ;;  %vm2320_vm3 = vweird.f32 %v2314_v57 }
 0xc21   :  { %v2296_v47 = vmul.f32 %v2638_v9, %v2294_v35  ;;  %vm2301_vm14 = vweird.f32 %v2638_v9 }
 0xc22   :  { %vm2302_vm0 = vmor %vm2300_vm15, %vm2301_vm14  ;;  %v2327_v62 = vor.u32 1.1754944e-38, %v2326_v43  ;;  %vm2325_vm5 = vcmp.eq.f32.partialorder %v2324_v24, 8.507059e+37 }
 0xc23   :  { %v2297_v10 = vsub.f32 1.0, %v2296_v47 }
 0xc25   :  { %v2298_v11 = vmul.f32 %v2638_v9, %v2297_v10 }
 0xc26   :  { %v2640_v26 = vpop.eup %2639 }
 0xc27   :  { %v2299_v30 = vadd.f32 %v2638_v9, %v2298_v11  ;;  %v2316_v15 = vmul.f32 %v2640_v26, %v2314_v57  ;;  %vm2321_vm2 = vweird.f32 %v2640_v26 }
 0xc28   :  { %vm2322_vm4 = vmor %vm2320_vm3, %vm2321_vm2 }
 0xc29   :  { %v2303_v21 = vsel %vm2302_vm0, %v2638_v9, %v2299_v30  ;;  %v2317_v14 = vsub.f32 1.0, %v2316_v15 }
 0xc2a   :  { %v2308_v33 = vsel %vm2305_vm1, %v2307_v61, %v2303_v21 }
 0xc2b   :  { %v2331_v56 = vmul.f32 %v2330_v39, %v2308_v33  ;;  %v2318_v45 = vmul.f32 %v2640_v26, %v2317_v14 }
 0xc2d   :  { %v2332_v8 = vadd.f32 %v2331_v56, %v4799_v34  ;;  %v2319_v28 = vadd.f32 %v2640_v26, %v2318_v45 }
 0xc2f   :  { %2641 = vtanh.f32 %v2332_v8  ;;  %v2323_v55 = vsel %vm2322_vm4, %v2640_v26, %v2319_v28 }
 0xc30   :  { %v2328_v22 = vsel %vm2325_vm5, %v2327_v62, %v2323_v55 }
 0xc31   :  { %v2334_v0 = vsub.f32 1.0, %v2328_v22  ;;  %v2336_v16 = vmul.f32 %v2328_v22, %v5370_v44 }
 0xc35   :  { %v2642_v63 = vpop.eup %2641 }
 0xc36   :  { %v2335_v2 = vmul.f32 %v2642_v63, %v2334_v0 }
 0xc38   :  { %v2337_v17 = vadd.f32 %v2336_v16, %v2335_v2 }
 0xc3a   :  { %2376 = vmatmul.f32.gmra.mxu0 %v2337_v17 }
 0xcb7   :  { %v2377_v46 = vpop.f32.mrf.mxu0 }
 0xcb8   :  { %v2378_v3 = vadd.f32 %v2377_v46, %v5342_v58 }
 0xcba   :  { %vm2387_vm6 = vcmp.gt.f32.partialorder %v2378_v3, 0.0  ;;  %v2395_v34 = vmul.f32 0.01, %v2378_v3 }
 0xcbc   :  { %v2403_v27 = vsel %vm2387_vm6, %v2378_v3, %v2395_v34 }
 0xcbd   :  { %2411 = vst [vmem:[%s5399_s5 + $0x38] sm:$0xff] %v2403_v27 }

</bundles_post_ra>
